<compile_context>
chip_gen: v7x
topology: tpu7x:2x2x1
jax: 0.10.0
libtpu: 0.0.40
codegen_flags: <defaults>
</compile_context>

<pallas_src>
import jax
import jax.numpy as jnp
import numpy as np
from jax import lax
from jax.experimental import pallas as pl
from jax.experimental.pallas import tpu as pltpu

# ------------------------------------------------------------- dimensions ---
H_IN, W_IN = 11, 61
C1, C2 = 10, 20
KH, KW = 3, 3
TAPS = KH * KW                            # 9
H_C1, W_C1 = H_IN - 2, W_IN - 2           # 9, 59   conv1 output
H_P1, W_P1 = H_C1 // 2, W_C1 // 2         # 4, 29   pool1 output
H_C2, W_C2 = H_P1 - 2, W_P1 - 2           # 2, 27   conv2 output
H_P2, W_P2 = H_C2 // 2, W_C2 // 2         # 1, 13   pool2 output
FC_IN = C2 * H_P2 * W_P2                  # 260
FC_HID = 64
N_OUT = 3


# ------------------------------------------------------------------ kernel ---
def _conv2net_kernel(x_ref, w1_ref, b1_ref, w2_ref, b2_ref,
                     sel1_ref, sel2_ref,
                     wf1_ref, bf1_ref, wf2_ref, bf2_ref, wf3_ref, bf3_ref,
                     out_ref):
    f32 = jnp.float32
    bsz = x_ref.shape[0]                                 # samples in this step

    # conv1 weights: 9 lane-broadcast taps, hoisted out of every loop.
    w1 = w1_ref[...]                                     # (10, 9)  [c, kh*3+kw]
    w1b = [jnp.broadcast_to(w1[:, t:t + 1], (C1, W_C1)) for t in range(TAPS)]

    # ---- conv1 (9-tap VPU stencil) fused with the row/pair stage of pool1.
    # Conv row 8 is dropped by the floor-mode pool, so only rows 0..7 are built.
    pair_rows = []                                       # bsz*4 pieces of (10, 58)
    for b in range(bsz):
        xb = x_ref[b, 0]                                 # (11, 61)
        xs = [xb[:, kw:kw + W_C1] for kw in range(KW)]   # 3 shifted views (11, 59)
        # hoisted sublane-broadcasts: input rows 0..9 x 3 column shifts
        xbc = [[jnp.broadcast_to(xs[kw][r:r + 1, :], (C1, W_C1))
                for kw in range(KW)]
               for r in range(2 * H_P1 + KH - 1)]
        for jp in range(H_P1):
            rows = []
            for dr in range(2):
                r = 2 * jp + dr
                acc = w1b[0] * xbc[r][0]
                for t in range(1, TAPS):
                    kh, kw = divmod(t, KW)
                    acc = acc + w1b[t] * xbc[r + kh][kw]
                rows.append(acc)                         # (10, 59); bias/ReLU deferred
            rmax = jnp.maximum(rows[0], rows[1])
            pair_rows.append(jnp.maximum(rmax[:, :W_C1 - 1], rmax[:, 1:]))

    # pool1 stride-2 column pick: ONE MXU matmul for the whole step.
    pair_all = jnp.concatenate(pair_rows, axis=0)                      # (bsz*40, 58)
    pooled1 = jnp.dot(pair_all, sel1_ref[...],
                      preferred_element_type=f32)                      # (bsz*40, 29)

    # ---- conv2: ONE im2col matmul for the whole step: (20,90)@(90, bsz*54).
    # pooled1 rows are ordered jp*10 + c, so each tap column-shift needs only a
    # contiguous 30-row slice (contraction order kw*30 + kh*10 + c, folded into
    # w2 at init).
    b1 = b1_ref[...]                                     # (40, 1), row = jp*10 + c
    rhs_cols = []
    for b in range(bsz):
        pf = jnp.maximum(pooled1[b * 40:(b + 1) * 40, :] + b1, 0.0)    # (40, 29)
        for i in range(H_C2):
            rhs_cols.append(jnp.concatenate(
                [pf[i * C1:(i + KH) * C1, kw:kw + W_C2] for kw in range(KW)],
                axis=0))                                               # (90, 27)
    rhs = jnp.concatenate(rhs_cols, axis=1)                            # (90, bsz*54)
    conv2 = jnp.dot(w2_ref[...], rhs,
                    preferred_element_type=f32) + b2_ref[...]          # (20, bsz*54)

    # ---- pool2 2x2 (floor): row max + pair max (VPU), even-col pick (1 matmul).
    pair2 = []
    for b in range(bsz):
        r0 = conv2[:, (b * 2) * W_C2:(b * 2 + 1) * W_C2]
        r1 = conv2[:, (b * 2 + 1) * W_C2:(b * 2 + 2) * W_C2]
        rmax = jnp.maximum(r0, r1)                                     # (20, 27)
        pair2.append(jnp.maximum(rmax[:, :W_C2 - 1], rmax[:, 1:]))     # (20, 26)
    pair2_all = jnp.concatenate(pair2, axis=0)                         # (bsz*20, 26)
    p2 = jnp.maximum(jnp.dot(pair2_all, sel2_ref[...],
                             preferred_element_type=f32), 0.0)         # (bsz*20, 13)

    # ---- flatten in torch order (c*13 + v) and run the batched FC stack.
    flat = jnp.concatenate(
        [jnp.concatenate([p2[b * C2 + c:b * C2 + c + 1, :] for c in range(C2)],
                         axis=1)
         for b in range(bsz)], axis=0)                                 # (bsz, 260)
    h = jnp.maximum(jnp.dot(flat, wf1_ref[...], preferred_element_type=f32)
                    + bf1_ref[...], 0.0)
    h = jnp.maximum(jnp.dot(h, wf2_ref[...], preferred_element_type=f32)
                    + bf2_ref[...], 0.0)
    out_ref[...] = (jnp.dot(h, wf3_ref[...], preferred_element_type=f32)
                    + bf3_ref[...])


# ---------------------------------------------------------------- wrapper ---
def _const_spec(arr):
    nd = arr.ndim
    return pl.BlockSpec(arr.shape, lambda i, nd=nd: (0,) * nd)


_PARAM_KEYS = ("w1", "b1", "w2", "b2", "sel1", "sel2",
               "wf1", "bf1", "wf2", "bf2", "wf3", "bf3")


def conv2net_forward(x, kp, *, batch_tile=8):
    """x: (N, 1, 11, 61) float32 NCHW. Returns (N, 3) float32 logits."""
    n = x.shape[0]
    b = n if n <= batch_tile else batch_tile             # samples per grid step
    n_pad = -(-n // b) * b
    if n_pad != n:
        x = jnp.pad(x, ((0, n_pad - n), (0, 0), (0, 0), (0, 0)))
    out = pl.pallas_call(
        _conv2net_kernel,
        out_shape=jax.ShapeDtypeStruct((n_pad, N_OUT), jnp.float32),
        grid=(n_pad // b,),
        in_specs=[pl.BlockSpec((b, 1, H_IN, W_IN), lambda i: (i, 0, 0, 0))]
                 + [_const_spec(kp[k]) for k in _PARAM_KEYS],
        out_specs=pl.BlockSpec((b, N_OUT), lambda i: (i, 0)),
        compiler_params=pltpu.CompilerParams(dimension_semantics=("parallel",)),
    )(x, *[kp[k] for k in _PARAM_KEYS])
    return out[:n]


# -------------------------------------------------- params (torch layouts) ---
def init_torch_params(key):
    # Deterministic synthetic weights in PyTorch layouts.
    ks = jax.random.split(key, 10)

    def w(k, shape, scale):
        return jax.random.normal(k, shape, jnp.float32) * scale

    return {
        "conv1_w": w(ks[0], (C1, 1, KH, KW), 0.30), "conv1_b": w(ks[1], (C1,), 0.05),
        "conv2_w": w(ks[2], (C2, C1, KH, KW), 0.15), "conv2_b": w(ks[3], (C2,), 0.05),
        "fc1_w": w(ks[4], (FC_HID, FC_IN), 0.05), "fc1_b": w(ks[5], (FC_HID,), 0.05),
        "fc2_w": w(ks[6], (FC_HID, FC_HID), 0.10), "fc2_b": w(ks[7], (FC_HID,), 0.05),
        "fc3_w": w(ks[8], (N_OUT, FC_HID), 0.10), "fc3_b": w(ks[9], (N_OUT,), 0.05),
    }


def _even_selector(in_cols, out_cols):
    # 0/1 matrix picking columns 0, 2, 4, ... (stride-2 pooling pick on the MXU).
    j = np.arange(in_cols)[:, None]
    v = np.arange(out_cols)[None, :]
    return jnp.asarray((j == 2 * v).astype(np.float32))


def prepare_kernel_params(tp):
    # One-time (init) re-layout so the kernel needs no runtime transposes.
    return {
        "w1": tp["conv1_w"].reshape(C1, TAPS),                         # [c, kh*3+kw]
        # conv1 bias tiled to the pooled1 row order (jp*10 + c)
        "b1": jnp.tile(tp["conv1_b"].reshape(1, C1), (H_P1, 1)).reshape(H_P1 * C1, 1),
        # conv2 weight flattened with contraction order kw*30 + kh*10 + c
        "w2": jnp.transpose(tp["conv2_w"], (0, 3, 2, 1)).reshape(C2, TAPS * C1),
        "b2": tp["conv2_b"].reshape(C2, 1),
        "sel1": _even_selector(W_C1 - 1, W_P1),                        # (58, 29)
        "sel2": _even_selector(W_C2 - 1, W_P2),                        # (26, 13)
        "wf1": tp["fc1_w"].T,                                          # (260, 64)
        "bf1": tp["fc1_b"].reshape(1, FC_HID),
        "wf2": tp["fc2_w"].T,                                          # (64, 64)
        "bf2": tp["fc2_b"].reshape(1, FC_HID),
        "wf3": tp["fc3_w"].T,                                          # (64, 3)
        "bf3": tp["fc3_b"].reshape(1, N_OUT),
    }


# -------------------------------------------------------- pure-JAX reference -
def conv2net_reference(x, tp):
    dn = ("NCHW", "OIHW", "NCHW")
    o = lax.conv_general_dilated(x, tp["conv1_w"], (1, 1), "VALID", dimension_numbers=dn)
    o = jnp.maximum(o + tp["conv1_b"][None, :, None, None], 0.0)
    o = lax.reduce_window(o, -jnp.inf, lax.max, (1, 1, 2, 2), (1, 1, 2, 2), "VALID")
    o = lax.conv_general_dilated(o, tp["conv2_w"], (1, 1), "VALID", dimension_numbers=dn)
    o = jnp.maximum(o + tp["conv2_b"][None, :, None, None], 0.0)
    o = lax.reduce_window(o, -jnp.inf, lax.max, (1, 1, 2, 2), (1, 1, 2, 2), "VALID")
    flat = o.reshape(o.shape[0], -1)                                   # (N, 260)
    h = jnp.maximum(flat @ tp["fc1_w"].T + tp["fc1_b"], 0.0)
    h = jnp.maximum(h @ tp["fc2_w"].T + tp["fc2_b"], 0.0)
    return h @ tp["fc3_w"].T + tp["fc3_b"]


# -------------------------------------------------------------------- main ---
if __name__ == "__main__":
    key = jax.random.PRNGKey(0)
    pkey, xkey = jax.random.split(key)
    tparams = init_torch_params(pkey)
    kparams = prepare_kernel_params(tparams)

    x = jax.random.normal(xkey, (2, 1, H_IN, W_IN), jnp.float32)       # batch=2, NCHW

    fwd = jax.jit(conv2net_forward)
    out = jax.block_until_ready(fwd(x, kparams))
    ref = jax.block_until_ready(conv2net_reference(x, tparams))

    assert out.shape == (2, N_OUT) and out.dtype == jnp.float32
    assert jnp.allclose(out, ref, atol=2e-3, rtol=2e-3)
    print("KERNEL_OK")
</pallas_src>

<mosaic_0001>
module attributes {stable_mosaic.version = 11 : i64} {
  func.func @_conv2net_kernel(%arg0: i32, %arg1: memref<2x1x11x61xf32, #tpu.memory_space<vmem>>, %arg2: memref<10x9xf32, #tpu.memory_space<vmem>>, %arg3: memref<40x1xf32, #tpu.memory_space<vmem>>, %arg4: memref<20x90xf32, #tpu.memory_space<vmem>>, %arg5: memref<20x1xf32, #tpu.memory_space<vmem>>, %arg6: memref<58x29xf32, #tpu.memory_space<vmem>>, %arg7: memref<26x13xf32, #tpu.memory_space<vmem>>, %arg8: memref<260x64xf32, #tpu.memory_space<vmem>>, %arg9: memref<1x64xf32, #tpu.memory_space<vmem>>, %arg10: memref<64x64xf32, #tpu.memory_space<vmem>>, %arg11: memref<1x64xf32, #tpu.memory_space<vmem>>, %arg12: memref<64x3xf32, #tpu.memory_space<vmem>>, %arg13: memref<1x3xf32, #tpu.memory_space<vmem>>, %arg14: memref<2x3xf32, #tpu.memory_space<vmem>>) attributes {dimension_semantics = [#tpu.dimension_semantics<parallel>], iteration_bounds = array<i64: 1>, scalar_prefetch = 0 : i64, scratch_operands = 0 : i64, tpu.core_type = #tpu.core_type<tc>, window_params = [{transform_indices = @transform_0, window_bounds = array<i64: 2, 1, 11, 61>}, {pipeline_mode = #tpu.pipeline_mode<synchronous>, transform_indices = @transform_1, window_bounds = array<i64: 10, 9>}, {pipeline_mode = #tpu.pipeline_mode<synchronous>, transform_indices = @transform_2, window_bounds = array<i64: 40, 1>}, {pipeline_mode = #tpu.pipeline_mode<synchronous>, transform_indices = @transform_3, window_bounds = array<i64: 20, 90>}, {pipeline_mode = #tpu.pipeline_mode<synchronous>, transform_indices = @transform_4, window_bounds = array<i64: 20, 1>}, {pipeline_mode = #tpu.pipeline_mode<synchronous>, transform_indices = @transform_5, window_bounds = array<i64: 58, 29>}, {pipeline_mode = #tpu.pipeline_mode<synchronous>, transform_indices = @transform_6, window_bounds = array<i64: 26, 13>}, {pipeline_mode = #tpu.pipeline_mode<synchronous>, transform_indices = @transform_7, window_bounds = array<i64: 260, 64>}, {pipeline_mode = #tpu.pipeline_mode<synchronous>, transform_indices = @transform_8, window_bounds = array<i64: 1, 64>}, {pipeline_mode = #tpu.pipeline_mode<synchronous>, transform_indices = @transform_9, window_bounds = array<i64: 64, 64>}, {pipeline_mode = #tpu.pipeline_mode<synchronous>, transform_indices = @transform_10, window_bounds = array<i64: 1, 64>}, {pipeline_mode = #tpu.pipeline_mode<synchronous>, transform_indices = @transform_11, window_bounds = array<i64: 64, 3>}, {pipeline_mode = #tpu.pipeline_mode<synchronous>, transform_indices = @transform_12, window_bounds = array<i64: 1, 3>}, {transform_indices = @transform_13, window_bounds = array<i64: 2, 3>}]} {
    %c0 = arith.constant 0 : index
    %c0_0 = arith.constant 0 : index
    %0 = vector.load %arg2[%c0, %c0_0] : memref<10x9xf32, #tpu.memory_space<vmem>>, vector<10x9xf32>
    %1 = vector.extract_strided_slice %0 {offsets = [0, 0], sizes = [10, 1], strides = [1, 1]} : vector<10x9xf32> to vector<10x1xf32>
    %2 = vector.shape_cast %1 : vector<10x1xf32> to vector<10x1xf32>
    %3 = vector.broadcast %2 : vector<10x1xf32> to vector<10x59xf32>
    %4 = vector.extract_strided_slice %0 {offsets = [0, 1], sizes = [10, 1], strides = [1, 1]} : vector<10x9xf32> to vector<10x1xf32>
    %5 = vector.shape_cast %4 : vector<10x1xf32> to vector<10x1xf32>
    %6 = vector.broadcast %5 : vector<10x1xf32> to vector<10x59xf32>
    %7 = vector.extract_strided_slice %0 {offsets = [0, 2], sizes = [10, 1], strides = [1, 1]} : vector<10x9xf32> to vector<10x1xf32>
    %8 = vector.shape_cast %7 : vector<10x1xf32> to vector<10x1xf32>
    %9 = vector.broadcast %8 : vector<10x1xf32> to vector<10x59xf32>
    %10 = vector.extract_strided_slice %0 {offsets = [0, 3], sizes = [10, 1], strides = [1, 1]} : vector<10x9xf32> to vector<10x1xf32>
    %11 = vector.shape_cast %10 : vector<10x1xf32> to vector<10x1xf32>
    %12 = vector.broadcast %11 : vector<10x1xf32> to vector<10x59xf32>
    %13 = vector.extract_strided_slice %0 {offsets = [0, 4], sizes = [10, 1], strides = [1, 1]} : vector<10x9xf32> to vector<10x1xf32>
    %14 = vector.shape_cast %13 : vector<10x1xf32> to vector<10x1xf32>
    %15 = vector.broadcast %14 : vector<10x1xf32> to vector<10x59xf32>
    %16 = vector.extract_strided_slice %0 {offsets = [0, 5], sizes = [10, 1], strides = [1, 1]} : vector<10x9xf32> to vector<10x1xf32>
    %17 = vector.shape_cast %16 : vector<10x1xf32> to vector<10x1xf32>
    %18 = vector.broadcast %17 : vector<10x1xf32> to vector<10x59xf32>
    %19 = vector.extract_strided_slice %0 {offsets = [0, 6], sizes = [10, 1], strides = [1, 1]} : vector<10x9xf32> to vector<10x1xf32>
    %20 = vector.shape_cast %19 : vector<10x1xf32> to vector<10x1xf32>
    %21 = vector.broadcast %20 : vector<10x1xf32> to vector<10x59xf32>
    %22 = vector.extract_strided_slice %0 {offsets = [0, 7], sizes = [10, 1], strides = [1, 1]} : vector<10x9xf32> to vector<10x1xf32>
    %23 = vector.shape_cast %22 : vector<10x1xf32> to vector<10x1xf32>
    %24 = vector.broadcast %23 : vector<10x1xf32> to vector<10x59xf32>
    %25 = vector.extract_strided_slice %0 {offsets = [0, 8], sizes = [10, 1], strides = [1, 1]} : vector<10x9xf32> to vector<10x1xf32>
    %26 = vector.shape_cast %25 : vector<10x1xf32> to vector<10x1xf32>
    %27 = vector.broadcast %26 : vector<10x1xf32> to vector<10x59xf32>
    %c0_1 = arith.constant 0 : index
    %c0_2 = arith.constant 0 : index
    %c0_3 = arith.constant 0 : index
    %c0_4 = arith.constant 0 : index
    %28 = vector.load %arg1[%c0_1, %c0_2, %c0_3, %c0_4] : memref<2x1x11x61xf32, #tpu.memory_space<vmem>>, vector<1x1x11x61xf32>
    %29 = vector.shape_cast %28 : vector<1x1x11x61xf32> to vector<11x61xf32>
    %30 = vector.extract_strided_slice %29 {offsets = [0, 0], sizes = [11, 59], strides = [1, 1]} : vector<11x61xf32> to vector<11x59xf32>
    %31 = vector.extract_strided_slice %29 {offsets = [0, 1], sizes = [11, 59], strides = [1, 1]} : vector<11x61xf32> to vector<11x59xf32>
    %32 = vector.extract_strided_slice %29 {offsets = [0, 2], sizes = [11, 59], strides = [1, 1]} : vector<11x61xf32> to vector<11x59xf32>
    %33 = vector.extract_strided_slice %30 {offsets = [0, 0], sizes = [1, 59], strides = [1, 1]} : vector<11x59xf32> to vector<1x59xf32>
    %34 = vector.shape_cast %33 : vector<1x59xf32> to vector<1x59xf32>
    %35 = vector.broadcast %34 : vector<1x59xf32> to vector<10x59xf32>
    %36 = vector.extract_strided_slice %31 {offsets = [0, 0], sizes = [1, 59], strides = [1, 1]} : vector<11x59xf32> to vector<1x59xf32>
    %37 = vector.shape_cast %36 : vector<1x59xf32> to vector<1x59xf32>
    %38 = vector.broadcast %37 : vector<1x59xf32> to vector<10x59xf32>
    %39 = vector.extract_strided_slice %32 {offsets = [0, 0], sizes = [1, 59], strides = [1, 1]} : vector<11x59xf32> to vector<1x59xf32>
    %40 = vector.shape_cast %39 : vector<1x59xf32> to vector<1x59xf32>
    %41 = vector.broadcast %40 : vector<1x59xf32> to vector<10x59xf32>
    %42 = vector.extract_strided_slice %30 {offsets = [1, 0], sizes = [1, 59], strides = [1, 1]} : vector<11x59xf32> to vector<1x59xf32>
    %43 = vector.shape_cast %42 : vector<1x59xf32> to vector<1x59xf32>
    %44 = vector.broadcast %43 : vector<1x59xf32> to vector<10x59xf32>
    %45 = vector.extract_strided_slice %31 {offsets = [1, 0], sizes = [1, 59], strides = [1, 1]} : vector<11x59xf32> to vector<1x59xf32>
    %46 = vector.shape_cast %45 : vector<1x59xf32> to vector<1x59xf32>
    %47 = vector.broadcast %46 : vector<1x59xf32> to vector<10x59xf32>
    %48 = vector.extract_strided_slice %32 {offsets = [1, 0], sizes = [1, 59], strides = [1, 1]} : vector<11x59xf32> to vector<1x59xf32>
    %49 = vector.shape_cast %48 : vector<1x59xf32> to vector<1x59xf32>
    %50 = vector.broadcast %49 : vector<1x59xf32> to vector<10x59xf32>
    %51 = vector.extract_strided_slice %30 {offsets = [2, 0], sizes = [1, 59], strides = [1, 1]} : vector<11x59xf32> to vector<1x59xf32>
    %52 = vector.shape_cast %51 : vector<1x59xf32> to vector<1x59xf32>
    %53 = vector.broadcast %52 : vector<1x59xf32> to vector<10x59xf32>
    %54 = vector.extract_strided_slice %31 {offsets = [2, 0], sizes = [1, 59], strides = [1, 1]} : vector<11x59xf32> to vector<1x59xf32>
    %55 = vector.shape_cast %54 : vector<1x59xf32> to vector<1x59xf32>
    %56 = vector.broadcast %55 : vector<1x59xf32> to vector<10x59xf32>
    %57 = vector.extract_strided_slice %32 {offsets = [2, 0], sizes = [1, 59], strides = [1, 1]} : vector<11x59xf32> to vector<1x59xf32>
    %58 = vector.shape_cast %57 : vector<1x59xf32> to vector<1x59xf32>
    %59 = vector.broadcast %58 : vector<1x59xf32> to vector<10x59xf32>
    %60 = vector.extract_strided_slice %30 {offsets = [3, 0], sizes = [1, 59], strides = [1, 1]} : vector<11x59xf32> to vector<1x59xf32>
    %61 = vector.shape_cast %60 : vector<1x59xf32> to vector<1x59xf32>
    %62 = vector.broadcast %61 : vector<1x59xf32> to vector<10x59xf32>
    %63 = vector.extract_strided_slice %31 {offsets = [3, 0], sizes = [1, 59], strides = [1, 1]} : vector<11x59xf32> to vector<1x59xf32>
    %64 = vector.shape_cast %63 : vector<1x59xf32> to vector<1x59xf32>
    %65 = vector.broadcast %64 : vector<1x59xf32> to vector<10x59xf32>
    %66 = vector.extract_strided_slice %32 {offsets = [3, 0], sizes = [1, 59], strides = [1, 1]} : vector<11x59xf32> to vector<1x59xf32>
    %67 = vector.shape_cast %66 : vector<1x59xf32> to vector<1x59xf32>
    %68 = vector.broadcast %67 : vector<1x59xf32> to vector<10x59xf32>
    %69 = vector.extract_strided_slice %30 {offsets = [4, 0], sizes = [1, 59], strides = [1, 1]} : vector<11x59xf32> to vector<1x59xf32>
    %70 = vector.shape_cast %69 : vector<1x59xf32> to vector<1x59xf32>
    %71 = vector.broadcast %70 : vector<1x59xf32> to vector<10x59xf32>
    %72 = vector.extract_strided_slice %31 {offsets = [4, 0], sizes = [1, 59], strides = [1, 1]} : vector<11x59xf32> to vector<1x59xf32>
    %73 = vector.shape_cast %72 : vector<1x59xf32> to vector<1x59xf32>
    %74 = vector.broadcast %73 : vector<1x59xf32> to vector<10x59xf32>
    %75 = vector.extract_strided_slice %32 {offsets = [4, 0], sizes = [1, 59], strides = [1, 1]} : vector<11x59xf32> to vector<1x59xf32>
    %76 = vector.shape_cast %75 : vector<1x59xf32> to vector<1x59xf32>
    %77 = vector.broadcast %76 : vector<1x59xf32> to vector<10x59xf32>
    %78 = vector.extract_strided_slice %30 {offsets = [5, 0], sizes = [1, 59], strides = [1, 1]} : vector<11x59xf32> to vector<1x59xf32>
    %79 = vector.shape_cast %78 : vector<1x59xf32> to vector<1x59xf32>
    %80 = vector.broadcast %79 : vector<1x59xf32> to vector<10x59xf32>
    %81 = vector.extract_strided_slice %31 {offsets = [5, 0], sizes = [1, 59], strides = [1, 1]} : vector<11x59xf32> to vector<1x59xf32>
    %82 = vector.shape_cast %81 : vector<1x59xf32> to vector<1x59xf32>
    %83 = vector.broadcast %82 : vector<1x59xf32> to vector<10x59xf32>
    %84 = vector.extract_strided_slice %32 {offsets = [5, 0], sizes = [1, 59], strides = [1, 1]} : vector<11x59xf32> to vector<1x59xf32>
    %85 = vector.shape_cast %84 : vector<1x59xf32> to vector<1x59xf32>
    %86 = vector.broadcast %85 : vector<1x59xf32> to vector<10x59xf32>
    %87 = vector.extract_strided_slice %30 {offsets = [6, 0], sizes = [1, 59], strides = [1, 1]} : vector<11x59xf32> to vector<1x59xf32>
    %88 = vector.shape_cast %87 : vector<1x59xf32> to vector<1x59xf32>
    %89 = vector.broadcast %88 : vector<1x59xf32> to vector<10x59xf32>
    %90 = vector.extract_strided_slice %31 {offsets = [6, 0], sizes = [1, 59], strides = [1, 1]} : vector<11x59xf32> to vector<1x59xf32>
    %91 = vector.shape_cast %90 : vector<1x59xf32> to vector<1x59xf32>
    %92 = vector.broadcast %91 : vector<1x59xf32> to vector<10x59xf32>
    %93 = vector.extract_strided_slice %32 {offsets = [6, 0], sizes = [1, 59], strides = [1, 1]} : vector<11x59xf32> to vector<1x59xf32>
    %94 = vector.shape_cast %93 : vector<1x59xf32> to vector<1x59xf32>
    %95 = vector.broadcast %94 : vector<1x59xf32> to vector<10x59xf32>
    %96 = vector.extract_strided_slice %30 {offsets = [7, 0], sizes = [1, 59], strides = [1, 1]} : vector<11x59xf32> to vector<1x59xf32>
    %97 = vector.shape_cast %96 : vector<1x59xf32> to vector<1x59xf32>
    %98 = vector.broadcast %97 : vector<1x59xf32> to vector<10x59xf32>
    %99 = vector.extract_strided_slice %31 {offsets = [7, 0], sizes = [1, 59], strides = [1, 1]} : vector<11x59xf32> to vector<1x59xf32>
    %100 = vector.shape_cast %99 : vector<1x59xf32> to vector<1x59xf32>
    %101 = vector.broadcast %100 : vector<1x59xf32> to vector<10x59xf32>
    %102 = vector.extract_strided_slice %32 {offsets = [7, 0], sizes = [1, 59], strides = [1, 1]} : vector<11x59xf32> to vector<1x59xf32>
    %103 = vector.shape_cast %102 : vector<1x59xf32> to vector<1x59xf32>
    %104 = vector.broadcast %103 : vector<1x59xf32> to vector<10x59xf32>
    %105 = vector.extract_strided_slice %30 {offsets = [8, 0], sizes = [1, 59], strides = [1, 1]} : vector<11x59xf32> to vector<1x59xf32>
    %106 = vector.shape_cast %105 : vector<1x59xf32> to vector<1x59xf32>
    %107 = vector.broadcast %106 : vector<1x59xf32> to vector<10x59xf32>
    %108 = vector.extract_strided_slice %31 {offsets = [8, 0], sizes = [1, 59], strides = [1, 1]} : vector<11x59xf32> to vector<1x59xf32>
    %109 = vector.shape_cast %108 : vector<1x59xf32> to vector<1x59xf32>
    %110 = vector.broadcast %109 : vector<1x59xf32> to vector<10x59xf32>
    %111 = vector.extract_strided_slice %32 {offsets = [8, 0], sizes = [1, 59], strides = [1, 1]} : vector<11x59xf32> to vector<1x59xf32>
    %112 = vector.shape_cast %111 : vector<1x59xf32> to vector<1x59xf32>
    %113 = vector.broadcast %112 : vector<1x59xf32> to vector<10x59xf32>
    %114 = vector.extract_strided_slice %30 {offsets = [9, 0], sizes = [1, 59], strides = [1, 1]} : vector<11x59xf32> to vector<1x59xf32>
    %115 = vector.shape_cast %114 : vector<1x59xf32> to vector<1x59xf32>
    %116 = vector.broadcast %115 : vector<1x59xf32> to vector<10x59xf32>
    %117 = vector.extract_strided_slice %31 {offsets = [9, 0], sizes = [1, 59], strides = [1, 1]} : vector<11x59xf32> to vector<1x59xf32>
    %118 = vector.shape_cast %117 : vector<1x59xf32> to vector<1x59xf32>
    %119 = vector.broadcast %118 : vector<1x59xf32> to vector<10x59xf32>
    %120 = vector.extract_strided_slice %32 {offsets = [9, 0], sizes = [1, 59], strides = [1, 1]} : vector<11x59xf32> to vector<1x59xf32>
    %121 = vector.shape_cast %120 : vector<1x59xf32> to vector<1x59xf32>
    %122 = vector.broadcast %121 : vector<1x59xf32> to vector<10x59xf32>
    %123 = arith.mulf %3, %35 : vector<10x59xf32>
    %124 = arith.mulf %6, %38 : vector<10x59xf32>
    %125 = arith.addf %123, %124 : vector<10x59xf32>
    %126 = arith.mulf %9, %41 : vector<10x59xf32>
    %127 = arith.addf %125, %126 : vector<10x59xf32>
    %128 = arith.mulf %12, %44 : vector<10x59xf32>
    %129 = arith.addf %127, %128 : vector<10x59xf32>
    %130 = arith.mulf %15, %47 : vector<10x59xf32>
    %131 = arith.addf %129, %130 : vector<10x59xf32>
    %132 = arith.mulf %18, %50 : vector<10x59xf32>
    %133 = arith.addf %131, %132 : vector<10x59xf32>
    %134 = arith.mulf %21, %53 : vector<10x59xf32>
    %135 = arith.addf %133, %134 : vector<10x59xf32>
    %136 = arith.mulf %24, %56 : vector<10x59xf32>
    %137 = arith.addf %135, %136 : vector<10x59xf32>
    %138 = arith.mulf %27, %59 : vector<10x59xf32>
    %139 = arith.addf %137, %138 : vector<10x59xf32>
    %140 = arith.mulf %3, %44 : vector<10x59xf32>
    %141 = arith.mulf %6, %47 : vector<10x59xf32>
    %142 = arith.addf %140, %141 : vector<10x59xf32>
    %143 = arith.mulf %9, %50 : vector<10x59xf32>
    %144 = arith.addf %142, %143 : vector<10x59xf32>
    %145 = arith.mulf %12, %53 : vector<10x59xf32>
    %146 = arith.addf %144, %145 : vector<10x59xf32>
    %147 = arith.mulf %15, %56 : vector<10x59xf32>
    %148 = arith.addf %146, %147 : vector<10x59xf32>
    %149 = arith.mulf %18, %59 : vector<10x59xf32>
    %150 = arith.addf %148, %149 : vector<10x59xf32>
    %151 = arith.mulf %21, %62 : vector<10x59xf32>
    %152 = arith.addf %150, %151 : vector<10x59xf32>
    %153 = arith.mulf %24, %65 : vector<10x59xf32>
    %154 = arith.addf %152, %153 : vector<10x59xf32>
    %155 = arith.mulf %27, %68 : vector<10x59xf32>
    %156 = arith.addf %154, %155 : vector<10x59xf32>
    %157 = arith.maximumf %139, %156 : vector<10x59xf32>
    %158 = vector.extract_strided_slice %157 {offsets = [0, 0], sizes = [10, 58], strides = [1, 1]} : vector<10x59xf32> to vector<10x58xf32>
    %159 = vector.extract_strided_slice %157 {offsets = [0, 1], sizes = [10, 58], strides = [1, 1]} : vector<10x59xf32> to vector<10x58xf32>
    %160 = arith.maximumf %158, %159 : vector<10x58xf32>
    %161 = arith.mulf %3, %53 : vector<10x59xf32>
    %162 = arith.mulf %6, %56 : vector<10x59xf32>
    %163 = arith.addf %161, %162 : vector<10x59xf32>
    %164 = arith.mulf %9, %59 : vector<10x59xf32>
    %165 = arith.addf %163, %164 : vector<10x59xf32>
    %166 = arith.mulf %12, %62 : vector<10x59xf32>
    %167 = arith.addf %165, %166 : vector<10x59xf32>
    %168 = arith.mulf %15, %65 : vector<10x59xf32>
    %169 = arith.addf %167, %168 : vector<10x59xf32>
    %170 = arith.mulf %18, %68 : vector<10x59xf32>
    %171 = arith.addf %169, %170 : vector<10x59xf32>
    %172 = arith.mulf %21, %71 : vector<10x59xf32>
    %173 = arith.addf %171, %172 : vector<10x59xf32>
    %174 = arith.mulf %24, %74 : vector<10x59xf32>
    %175 = arith.addf %173, %174 : vector<10x59xf32>
    %176 = arith.mulf %27, %77 : vector<10x59xf32>
    %177 = arith.addf %175, %176 : vector<10x59xf32>
    %178 = arith.mulf %3, %62 : vector<10x59xf32>
    %179 = arith.mulf %6, %65 : vector<10x59xf32>
    %180 = arith.addf %178, %179 : vector<10x59xf32>
    %181 = arith.mulf %9, %68 : vector<10x59xf32>
    %182 = arith.addf %180, %181 : vector<10x59xf32>
    %183 = arith.mulf %12, %71 : vector<10x59xf32>
    %184 = arith.addf %182, %183 : vector<10x59xf32>
    %185 = arith.mulf %15, %74 : vector<10x59xf32>
    %186 = arith.addf %184, %185 : vector<10x59xf32>
    %187 = arith.mulf %18, %77 : vector<10x59xf32>
    %188 = arith.addf %186, %187 : vector<10x59xf32>
    %189 = arith.mulf %21, %80 : vector<10x59xf32>
    %190 = arith.addf %188, %189 : vector<10x59xf32>
    %191 = arith.mulf %24, %83 : vector<10x59xf32>
    %192 = arith.addf %190, %191 : vector<10x59xf32>
    %193 = arith.mulf %27, %86 : vector<10x59xf32>
    %194 = arith.addf %192, %193 : vector<10x59xf32>
    %195 = arith.maximumf %177, %194 : vector<10x59xf32>
    %196 = vector.extract_strided_slice %195 {offsets = [0, 0], sizes = [10, 58], strides = [1, 1]} : vector<10x59xf32> to vector<10x58xf32>
    %197 = vector.extract_strided_slice %195 {offsets = [0, 1], sizes = [10, 58], strides = [1, 1]} : vector<10x59xf32> to vector<10x58xf32>
    %198 = arith.maximumf %196, %197 : vector<10x58xf32>
    %199 = arith.mulf %3, %71 : vector<10x59xf32>
    %200 = arith.mulf %6, %74 : vector<10x59xf32>
    %201 = arith.addf %199, %200 : vector<10x59xf32>
    %202 = arith.mulf %9, %77 : vector<10x59xf32>
    %203 = arith.addf %201, %202 : vector<10x59xf32>
    %204 = arith.mulf %12, %80 : vector<10x59xf32>
    %205 = arith.addf %203, %204 : vector<10x59xf32>
    %206 = arith.mulf %15, %83 : vector<10x59xf32>
    %207 = arith.addf %205, %206 : vector<10x59xf32>
    %208 = arith.mulf %18, %86 : vector<10x59xf32>
    %209 = arith.addf %207, %208 : vector<10x59xf32>
    %210 = arith.mulf %21, %89 : vector<10x59xf32>
    %211 = arith.addf %209, %210 : vector<10x59xf32>
    %212 = arith.mulf %24, %92 : vector<10x59xf32>
    %213 = arith.addf %211, %212 : vector<10x59xf32>
    %214 = arith.mulf %27, %95 : vector<10x59xf32>
    %215 = arith.addf %213, %214 : vector<10x59xf32>
    %216 = arith.mulf %3, %80 : vector<10x59xf32>
    %217 = arith.mulf %6, %83 : vector<10x59xf32>
    %218 = arith.addf %216, %217 : vector<10x59xf32>
    %219 = arith.mulf %9, %86 : vector<10x59xf32>
    %220 = arith.addf %218, %219 : vector<10x59xf32>
    %221 = arith.mulf %12, %89 : vector<10x59xf32>
    %222 = arith.addf %220, %221 : vector<10x59xf32>
    %223 = arith.mulf %15, %92 : vector<10x59xf32>
    %224 = arith.addf %222, %223 : vector<10x59xf32>
    %225 = arith.mulf %18, %95 : vector<10x59xf32>
    %226 = arith.addf %224, %225 : vector<10x59xf32>
    %227 = arith.mulf %21, %98 : vector<10x59xf32>
    %228 = arith.addf %226, %227 : vector<10x59xf32>
    %229 = arith.mulf %24, %101 : vector<10x59xf32>
    %230 = arith.addf %228, %229 : vector<10x59xf32>
    %231 = arith.mulf %27, %104 : vector<10x59xf32>
    %232 = arith.addf %230, %231 : vector<10x59xf32>
    %233 = arith.maximumf %215, %232 : vector<10x59xf32>
    %234 = vector.extract_strided_slice %233 {offsets = [0, 0], sizes = [10, 58], strides = [1, 1]} : vector<10x59xf32> to vector<10x58xf32>
    %235 = vector.extract_strided_slice %233 {offsets = [0, 1], sizes = [10, 58], strides = [1, 1]} : vector<10x59xf32> to vector<10x58xf32>
    %236 = arith.maximumf %234, %235 : vector<10x58xf32>
    %237 = arith.mulf %3, %89 : vector<10x59xf32>
    %238 = arith.mulf %6, %92 : vector<10x59xf32>
    %239 = arith.addf %237, %238 : vector<10x59xf32>
    %240 = arith.mulf %9, %95 : vector<10x59xf32>
    %241 = arith.addf %239, %240 : vector<10x59xf32>
    %242 = arith.mulf %12, %98 : vector<10x59xf32>
    %243 = arith.addf %241, %242 : vector<10x59xf32>
    %244 = arith.mulf %15, %101 : vector<10x59xf32>
    %245 = arith.addf %243, %244 : vector<10x59xf32>
    %246 = arith.mulf %18, %104 : vector<10x59xf32>
    %247 = arith.addf %245, %246 : vector<10x59xf32>
    %248 = arith.mulf %21, %107 : vector<10x59xf32>
    %249 = arith.addf %247, %248 : vector<10x59xf32>
    %250 = arith.mulf %24, %110 : vector<10x59xf32>
    %251 = arith.addf %249, %250 : vector<10x59xf32>
    %252 = arith.mulf %27, %113 : vector<10x59xf32>
    %253 = arith.addf %251, %252 : vector<10x59xf32>
    %254 = arith.mulf %3, %98 : vector<10x59xf32>
    %255 = arith.mulf %6, %101 : vector<10x59xf32>
    %256 = arith.addf %254, %255 : vector<10x59xf32>
    %257 = arith.mulf %9, %104 : vector<10x59xf32>
    %258 = arith.addf %256, %257 : vector<10x59xf32>
    %259 = arith.mulf %12, %107 : vector<10x59xf32>
    %260 = arith.addf %258, %259 : vector<10x59xf32>
    %261 = arith.mulf %15, %110 : vector<10x59xf32>
    %262 = arith.addf %260, %261 : vector<10x59xf32>
    %263 = arith.mulf %18, %113 : vector<10x59xf32>
    %264 = arith.addf %262, %263 : vector<10x59xf32>
    %265 = arith.mulf %21, %116 : vector<10x59xf32>
    %266 = arith.addf %264, %265 : vector<10x59xf32>
    %267 = arith.mulf %24, %119 : vector<10x59xf32>
    %268 = arith.addf %266, %267 : vector<10x59xf32>
    %269 = arith.mulf %27, %122 : vector<10x59xf32>
    %270 = arith.addf %268, %269 : vector<10x59xf32>
    %271 = arith.maximumf %253, %270 : vector<10x59xf32>
    %272 = vector.extract_strided_slice %271 {offsets = [0, 0], sizes = [10, 58], strides = [1, 1]} : vector<10x59xf32> to vector<10x58xf32>
    %273 = vector.extract_strided_slice %271 {offsets = [0, 1], sizes = [10, 58], strides = [1, 1]} : vector<10x59xf32> to vector<10x58xf32>
    %274 = arith.maximumf %272, %273 : vector<10x58xf32>
    %c1 = arith.constant 1 : index
    %c0_5 = arith.constant 0 : index
    %c0_6 = arith.constant 0 : index
    %c0_7 = arith.constant 0 : index
    %275 = vector.load %arg1[%c1, %c0_5, %c0_6, %c0_7] : memref<2x1x11x61xf32, #tpu.memory_space<vmem>>, vector<1x1x11x61xf32>
    %276 = vector.shape_cast %275 : vector<1x1x11x61xf32> to vector<11x61xf32>
    %277 = vector.extract_strided_slice %276 {offsets = [0, 0], sizes = [11, 59], strides = [1, 1]} : vector<11x61xf32> to vector<11x59xf32>
    %278 = vector.extract_strided_slice %276 {offsets = [0, 1], sizes = [11, 59], strides = [1, 1]} : vector<11x61xf32> to vector<11x59xf32>
    %279 = vector.extract_strided_slice %276 {offsets = [0, 2], sizes = [11, 59], strides = [1, 1]} : vector<11x61xf32> to vector<11x59xf32>
    %280 = vector.extract_strided_slice %277 {offsets = [0, 0], sizes = [1, 59], strides = [1, 1]} : vector<11x59xf32> to vector<1x59xf32>
    %281 = vector.shape_cast %280 : vector<1x59xf32> to vector<1x59xf32>
    %282 = vector.broadcast %281 : vector<1x59xf32> to vector<10x59xf32>
    %283 = vector.extract_strided_slice %278 {offsets = [0, 0], sizes = [1, 59], strides = [1, 1]} : vector<11x59xf32> to vector<1x59xf32>
    %284 = vector.shape_cast %283 : vector<1x59xf32> to vector<1x59xf32>
    %285 = vector.broadcast %284 : vector<1x59xf32> to vector<10x59xf32>
    %286 = vector.extract_strided_slice %279 {offsets = [0, 0], sizes = [1, 59], strides = [1, 1]} : vector<11x59xf32> to vector<1x59xf32>
    %287 = vector.shape_cast %286 : vector<1x59xf32> to vector<1x59xf32>
    %288 = vector.broadcast %287 : vector<1x59xf32> to vector<10x59xf32>
    %289 = vector.extract_strided_slice %277 {offsets = [1, 0], sizes = [1, 59], strides = [1, 1]} : vector<11x59xf32> to vector<1x59xf32>
    %290 = vector.shape_cast %289 : vector<1x59xf32> to vector<1x59xf32>
    %291 = vector.broadcast %290 : vector<1x59xf32> to vector<10x59xf32>
    %292 = vector.extract_strided_slice %278 {offsets = [1, 0], sizes = [1, 59], strides = [1, 1]} : vector<11x59xf32> to vector<1x59xf32>
    %293 = vector.shape_cast %292 : vector<1x59xf32> to vector<1x59xf32>
    %294 = vector.broadcast %293 : vector<1x59xf32> to vector<10x59xf32>
    %295 = vector.extract_strided_slice %279 {offsets = [1, 0], sizes = [1, 59], strides = [1, 1]} : vector<11x59xf32> to vector<1x59xf32>
    %296 = vector.shape_cast %295 : vector<1x59xf32> to vector<1x59xf32>
    %297 = vector.broadcast %296 : vector<1x59xf32> to vector<10x59xf32>
    %298 = vector.extract_strided_slice %277 {offsets = [2, 0], sizes = [1, 59], strides = [1, 1]} : vector<11x59xf32> to vector<1x59xf32>
    %299 = vector.shape_cast %298 : vector<1x59xf32> to vector<1x59xf32>
    %300 = vector.broadcast %299 : vector<1x59xf32> to vector<10x59xf32>
    %301 = vector.extract_strided_slice %278 {offsets = [2, 0], sizes = [1, 59], strides = [1, 1]} : vector<11x59xf32> to vector<1x59xf32>
    %302 = vector.shape_cast %301 : vector<1x59xf32> to vector<1x59xf32>
    %303 = vector.broadcast %302 : vector<1x59xf32> to vector<10x59xf32>
    %304 = vector.extract_strided_slice %279 {offsets = [2, 0], sizes = [1, 59], strides = [1, 1]} : vector<11x59xf32> to vector<1x59xf32>
    %305 = vector.shape_cast %304 : vector<1x59xf32> to vector<1x59xf32>
    %306 = vector.broadcast %305 : vector<1x59xf32> to vector<10x59xf32>
    %307 = vector.extract_strided_slice %277 {offsets = [3, 0], sizes = [1, 59], strides = [1, 1]} : vector<11x59xf32> to vector<1x59xf32>
    %308 = vector.shape_cast %307 : vector<1x59xf32> to vector<1x59xf32>
    %309 = vector.broadcast %308 : vector<1x59xf32> to vector<10x59xf32>
    %310 = vector.extract_strided_slice %278 {offsets = [3, 0], sizes = [1, 59], strides = [1, 1]} : vector<11x59xf32> to vector<1x59xf32>
    %311 = vector.shape_cast %310 : vector<1x59xf32> to vector<1x59xf32>
    %312 = vector.broadcast %311 : vector<1x59xf32> to vector<10x59xf32>
    %313 = vector.extract_strided_slice %279 {offsets = [3, 0], sizes = [1, 59], strides = [1, 1]} : vector<11x59xf32> to vector<1x59xf32>
    %314 = vector.shape_cast %313 : vector<1x59xf32> to vector<1x59xf32>
    %315 = vector.broadcast %314 : vector<1x59xf32> to vector<10x59xf32>
    %316 = vector.extract_strided_slice %277 {offsets = [4, 0], sizes = [1, 59], strides = [1, 1]} : vector<11x59xf32> to vector<1x59xf32>
    %317 = vector.shape_cast %316 : vector<1x59xf32> to vector<1x59xf32>
    %318 = vector.broadcast %317 : vector<1x59xf32> to vector<10x59xf32>
    %319 = vector.extract_strided_slice %278 {offsets = [4, 0], sizes = [1, 59], strides = [1, 1]} : vector<11x59xf32> to vector<1x59xf32>
    %320 = vector.shape_cast %319 : vector<1x59xf32> to vector<1x59xf32>
    %321 = vector.broadcast %320 : vector<1x59xf32> to vector<10x59xf32>
    %322 = vector.extract_strided_slice %279 {offsets = [4, 0], sizes = [1, 59], strides = [1, 1]} : vector<11x59xf32> to vector<1x59xf32>
    %323 = vector.shape_cast %322 : vector<1x59xf32> to vector<1x59xf32>
    %324 = vector.broadcast %323 : vector<1x59xf32> to vector<10x59xf32>
    %325 = vector.extract_strided_slice %277 {offsets = [5, 0], sizes = [1, 59], strides = [1, 1]} : vector<11x59xf32> to vector<1x59xf32>
    %326 = vector.shape_cast %325 : vector<1x59xf32> to vector<1x59xf32>
    %327 = vector.broadcast %326 : vector<1x59xf32> to vector<10x59xf32>
    %328 = vector.extract_strided_slice %278 {offsets = [5, 0], sizes = [1, 59], strides = [1, 1]} : vector<11x59xf32> to vector<1x59xf32>
    %329 = vector.shape_cast %328 : vector<1x59xf32> to vector<1x59xf32>
    %330 = vector.broadcast %329 : vector<1x59xf32> to vector<10x59xf32>
    %331 = vector.extract_strided_slice %279 {offsets = [5, 0], sizes = [1, 59], strides = [1, 1]} : vector<11x59xf32> to vector<1x59xf32>
    %332 = vector.shape_cast %331 : vector<1x59xf32> to vector<1x59xf32>
    %333 = vector.broadcast %332 : vector<1x59xf32> to vector<10x59xf32>
    %334 = vector.extract_strided_slice %277 {offsets = [6, 0], sizes = [1, 59], strides = [1, 1]} : vector<11x59xf32> to vector<1x59xf32>
    %335 = vector.shape_cast %334 : vector<1x59xf32> to vector<1x59xf32>
    %336 = vector.broadcast %335 : vector<1x59xf32> to vector<10x59xf32>
    %337 = vector.extract_strided_slice %278 {offsets = [6, 0], sizes = [1, 59], strides = [1, 1]} : vector<11x59xf32> to vector<1x59xf32>
    %338 = vector.shape_cast %337 : vector<1x59xf32> to vector<1x59xf32>
    %339 = vector.broadcast %338 : vector<1x59xf32> to vector<10x59xf32>
    %340 = vector.extract_strided_slice %279 {offsets = [6, 0], sizes = [1, 59], strides = [1, 1]} : vector<11x59xf32> to vector<1x59xf32>
    %341 = vector.shape_cast %340 : vector<1x59xf32> to vector<1x59xf32>
    %342 = vector.broadcast %341 : vector<1x59xf32> to vector<10x59xf32>
    %343 = vector.extract_strided_slice %277 {offsets = [7, 0], sizes = [1, 59], strides = [1, 1]} : vector<11x59xf32> to vector<1x59xf32>
    %344 = vector.shape_cast %343 : vector<1x59xf32> to vector<1x59xf32>
    %345 = vector.broadcast %344 : vector<1x59xf32> to vector<10x59xf32>
    %346 = vector.extract_strided_slice %278 {offsets = [7, 0], sizes = [1, 59], strides = [1, 1]} : vector<11x59xf32> to vector<1x59xf32>
    %347 = vector.shape_cast %346 : vector<1x59xf32> to vector<1x59xf32>
    %348 = vector.broadcast %347 : vector<1x59xf32> to vector<10x59xf32>
    %349 = vector.extract_strided_slice %279 {offsets = [7, 0], sizes = [1, 59], strides = [1, 1]} : vector<11x59xf32> to vector<1x59xf32>
    %350 = vector.shape_cast %349 : vector<1x59xf32> to vector<1x59xf32>
    %351 = vector.broadcast %350 : vector<1x59xf32> to vector<10x59xf32>
    %352 = vector.extract_strided_slice %277 {offsets = [8, 0], sizes = [1, 59], strides = [1, 1]} : vector<11x59xf32> to vector<1x59xf32>
    %353 = vector.shape_cast %352 : vector<1x59xf32> to vector<1x59xf32>
    %354 = vector.broadcast %353 : vector<1x59xf32> to vector<10x59xf32>
    %355 = vector.extract_strided_slice %278 {offsets = [8, 0], sizes = [1, 59], strides = [1, 1]} : vector<11x59xf32> to vector<1x59xf32>
    %356 = vector.shape_cast %355 : vector<1x59xf32> to vector<1x59xf32>
    %357 = vector.broadcast %356 : vector<1x59xf32> to vector<10x59xf32>
    %358 = vector.extract_strided_slice %279 {offsets = [8, 0], sizes = [1, 59], strides = [1, 1]} : vector<11x59xf32> to vector<1x59xf32>
    %359 = vector.shape_cast %358 : vector<1x59xf32> to vector<1x59xf32>
    %360 = vector.broadcast %359 : vector<1x59xf32> to vector<10x59xf32>
    %361 = vector.extract_strided_slice %277 {offsets = [9, 0], sizes = [1, 59], strides = [1, 1]} : vector<11x59xf32> to vector<1x59xf32>
    %362 = vector.shape_cast %361 : vector<1x59xf32> to vector<1x59xf32>
    %363 = vector.broadcast %362 : vector<1x59xf32> to vector<10x59xf32>
    %364 = vector.extract_strided_slice %278 {offsets = [9, 0], sizes = [1, 59], strides = [1, 1]} : vector<11x59xf32> to vector<1x59xf32>
    %365 = vector.shape_cast %364 : vector<1x59xf32> to vector<1x59xf32>
    %366 = vector.broadcast %365 : vector<1x59xf32> to vector<10x59xf32>
    %367 = vector.extract_strided_slice %279 {offsets = [9, 0], sizes = [1, 59], strides = [1, 1]} : vector<11x59xf32> to vector<1x59xf32>
    %368 = vector.shape_cast %367 : vector<1x59xf32> to vector<1x59xf32>
    %369 = vector.broadcast %368 : vector<1x59xf32> to vector<10x59xf32>
    %370 = arith.mulf %3, %282 : vector<10x59xf32>
    %371 = arith.mulf %6, %285 : vector<10x59xf32>
    %372 = arith.addf %370, %371 : vector<10x59xf32>
    %373 = arith.mulf %9, %288 : vector<10x59xf32>
    %374 = arith.addf %372, %373 : vector<10x59xf32>
    %375 = arith.mulf %12, %291 : vector<10x59xf32>
    %376 = arith.addf %374, %375 : vector<10x59xf32>
    %377 = arith.mulf %15, %294 : vector<10x59xf32>
    %378 = arith.addf %376, %377 : vector<10x59xf32>
    %379 = arith.mulf %18, %297 : vector<10x59xf32>
    %380 = arith.addf %378, %379 : vector<10x59xf32>
    %381 = arith.mulf %21, %300 : vector<10x59xf32>
    %382 = arith.addf %380, %381 : vector<10x59xf32>
    %383 = arith.mulf %24, %303 : vector<10x59xf32>
    %384 = arith.addf %382, %383 : vector<10x59xf32>
    %385 = arith.mulf %27, %306 : vector<10x59xf32>
    %386 = arith.addf %384, %385 : vector<10x59xf32>
    %387 = arith.mulf %3, %291 : vector<10x59xf32>
    %388 = arith.mulf %6, %294 : vector<10x59xf32>
    %389 = arith.addf %387, %388 : vector<10x59xf32>
    %390 = arith.mulf %9, %297 : vector<10x59xf32>
    %391 = arith.addf %389, %390 : vector<10x59xf32>
    %392 = arith.mulf %12, %300 : vector<10x59xf32>
    %393 = arith.addf %391, %392 : vector<10x59xf32>
    %394 = arith.mulf %15, %303 : vector<10x59xf32>
    %395 = arith.addf %393, %394 : vector<10x59xf32>
    %396 = arith.mulf %18, %306 : vector<10x59xf32>
    %397 = arith.addf %395, %396 : vector<10x59xf32>
    %398 = arith.mulf %21, %309 : vector<10x59xf32>
    %399 = arith.addf %397, %398 : vector<10x59xf32>
    %400 = arith.mulf %24, %312 : vector<10x59xf32>
    %401 = arith.addf %399, %400 : vector<10x59xf32>
    %402 = arith.mulf %27, %315 : vector<10x59xf32>
    %403 = arith.addf %401, %402 : vector<10x59xf32>
    %404 = arith.maximumf %386, %403 : vector<10x59xf32>
    %405 = vector.extract_strided_slice %404 {offsets = [0, 0], sizes = [10, 58], strides = [1, 1]} : vector<10x59xf32> to vector<10x58xf32>
    %406 = vector.extract_strided_slice %404 {offsets = [0, 1], sizes = [10, 58], strides = [1, 1]} : vector<10x59xf32> to vector<10x58xf32>
    %407 = arith.maximumf %405, %406 : vector<10x58xf32>
    %408 = arith.mulf %3, %300 : vector<10x59xf32>
    %409 = arith.mulf %6, %303 : vector<10x59xf32>
    %410 = arith.addf %408, %409 : vector<10x59xf32>
    %411 = arith.mulf %9, %306 : vector<10x59xf32>
    %412 = arith.addf %410, %411 : vector<10x59xf32>
    %413 = arith.mulf %12, %309 : vector<10x59xf32>
    %414 = arith.addf %412, %413 : vector<10x59xf32>
    %415 = arith.mulf %15, %312 : vector<10x59xf32>
    %416 = arith.addf %414, %415 : vector<10x59xf32>
    %417 = arith.mulf %18, %315 : vector<10x59xf32>
    %418 = arith.addf %416, %417 : vector<10x59xf32>
    %419 = arith.mulf %21, %318 : vector<10x59xf32>
    %420 = arith.addf %418, %419 : vector<10x59xf32>
    %421 = arith.mulf %24, %321 : vector<10x59xf32>
    %422 = arith.addf %420, %421 : vector<10x59xf32>
    %423 = arith.mulf %27, %324 : vector<10x59xf32>
    %424 = arith.addf %422, %423 : vector<10x59xf32>
    %425 = arith.mulf %3, %309 : vector<10x59xf32>
    %426 = arith.mulf %6, %312 : vector<10x59xf32>
    %427 = arith.addf %425, %426 : vector<10x59xf32>
    %428 = arith.mulf %9, %315 : vector<10x59xf32>
    %429 = arith.addf %427, %428 : vector<10x59xf32>
    %430 = arith.mulf %12, %318 : vector<10x59xf32>
    %431 = arith.addf %429, %430 : vector<10x59xf32>
    %432 = arith.mulf %15, %321 : vector<10x59xf32>
    %433 = arith.addf %431, %432 : vector<10x59xf32>
    %434 = arith.mulf %18, %324 : vector<10x59xf32>
    %435 = arith.addf %433, %434 : vector<10x59xf32>
    %436 = arith.mulf %21, %327 : vector<10x59xf32>
    %437 = arith.addf %435, %436 : vector<10x59xf32>
    %438 = arith.mulf %24, %330 : vector<10x59xf32>
    %439 = arith.addf %437, %438 : vector<10x59xf32>
    %440 = arith.mulf %27, %333 : vector<10x59xf32>
    %441 = arith.addf %439, %440 : vector<10x59xf32>
    %442 = arith.maximumf %424, %441 : vector<10x59xf32>
    %443 = vector.extract_strided_slice %442 {offsets = [0, 0], sizes = [10, 58], strides = [1, 1]} : vector<10x59xf32> to vector<10x58xf32>
    %444 = vector.extract_strided_slice %442 {offsets = [0, 1], sizes = [10, 58], strides = [1, 1]} : vector<10x59xf32> to vector<10x58xf32>
    %445 = arith.maximumf %443, %444 : vector<10x58xf32>
    %446 = arith.mulf %3, %318 : vector<10x59xf32>
    %447 = arith.mulf %6, %321 : vector<10x59xf32>
    %448 = arith.addf %446, %447 : vector<10x59xf32>
    %449 = arith.mulf %9, %324 : vector<10x59xf32>
    %450 = arith.addf %448, %449 : vector<10x59xf32>
    %451 = arith.mulf %12, %327 : vector<10x59xf32>
    %452 = arith.addf %450, %451 : vector<10x59xf32>
    %453 = arith.mulf %15, %330 : vector<10x59xf32>
    %454 = arith.addf %452, %453 : vector<10x59xf32>
    %455 = arith.mulf %18, %333 : vector<10x59xf32>
    %456 = arith.addf %454, %455 : vector<10x59xf32>
    %457 = arith.mulf %21, %336 : vector<10x59xf32>
    %458 = arith.addf %456, %457 : vector<10x59xf32>
    %459 = arith.mulf %24, %339 : vector<10x59xf32>
    %460 = arith.addf %458, %459 : vector<10x59xf32>
    %461 = arith.mulf %27, %342 : vector<10x59xf32>
    %462 = arith.addf %460, %461 : vector<10x59xf32>
    %463 = arith.mulf %3, %327 : vector<10x59xf32>
    %464 = arith.mulf %6, %330 : vector<10x59xf32>
    %465 = arith.addf %463, %464 : vector<10x59xf32>
    %466 = arith.mulf %9, %333 : vector<10x59xf32>
    %467 = arith.addf %465, %466 : vector<10x59xf32>
    %468 = arith.mulf %12, %336 : vector<10x59xf32>
    %469 = arith.addf %467, %468 : vector<10x59xf32>
    %470 = arith.mulf %15, %339 : vector<10x59xf32>
    %471 = arith.addf %469, %470 : vector<10x59xf32>
    %472 = arith.mulf %18, %342 : vector<10x59xf32>
    %473 = arith.addf %471, %472 : vector<10x59xf32>
    %474 = arith.mulf %21, %345 : vector<10x59xf32>
    %475 = arith.addf %473, %474 : vector<10x59xf32>
    %476 = arith.mulf %24, %348 : vector<10x59xf32>
    %477 = arith.addf %475, %476 : vector<10x59xf32>
    %478 = arith.mulf %27, %351 : vector<10x59xf32>
    %479 = arith.addf %477, %478 : vector<10x59xf32>
    %480 = arith.maximumf %462, %479 : vector<10x59xf32>
    %481 = vector.extract_strided_slice %480 {offsets = [0, 0], sizes = [10, 58], strides = [1, 1]} : vector<10x59xf32> to vector<10x58xf32>
    %482 = vector.extract_strided_slice %480 {offsets = [0, 1], sizes = [10, 58], strides = [1, 1]} : vector<10x59xf32> to vector<10x58xf32>
    %483 = arith.maximumf %481, %482 : vector<10x58xf32>
    %484 = arith.mulf %3, %336 : vector<10x59xf32>
    %485 = arith.mulf %6, %339 : vector<10x59xf32>
    %486 = arith.addf %484, %485 : vector<10x59xf32>
    %487 = arith.mulf %9, %342 : vector<10x59xf32>
    %488 = arith.addf %486, %487 : vector<10x59xf32>
    %489 = arith.mulf %12, %345 : vector<10x59xf32>
    %490 = arith.addf %488, %489 : vector<10x59xf32>
    %491 = arith.mulf %15, %348 : vector<10x59xf32>
    %492 = arith.addf %490, %491 : vector<10x59xf32>
    %493 = arith.mulf %18, %351 : vector<10x59xf32>
    %494 = arith.addf %492, %493 : vector<10x59xf32>
    %495 = arith.mulf %21, %354 : vector<10x59xf32>
    %496 = arith.addf %494, %495 : vector<10x59xf32>
    %497 = arith.mulf %24, %357 : vector<10x59xf32>
    %498 = arith.addf %496, %497 : vector<10x59xf32>
    %499 = arith.mulf %27, %360 : vector<10x59xf32>
    %500 = arith.addf %498, %499 : vector<10x59xf32>
    %501 = arith.mulf %3, %345 : vector<10x59xf32>
    %502 = arith.mulf %6, %348 : vector<10x59xf32>
    %503 = arith.addf %501, %502 : vector<10x59xf32>
    %504 = arith.mulf %9, %351 : vector<10x59xf32>
    %505 = arith.addf %503, %504 : vector<10x59xf32>
    %506 = arith.mulf %12, %354 : vector<10x59xf32>
    %507 = arith.addf %505, %506 : vector<10x59xf32>
    %508 = arith.mulf %15, %357 : vector<10x59xf32>
    %509 = arith.addf %507, %508 : vector<10x59xf32>
    %510 = arith.mulf %18, %360 : vector<10x59xf32>
    %511 = arith.addf %509, %510 : vector<10x59xf32>
    %512 = arith.mulf %21, %363 : vector<10x59xf32>
    %513 = arith.addf %511, %512 : vector<10x59xf32>
    %514 = arith.mulf %24, %366 : vector<10x59xf32>
    %515 = arith.addf %513, %514 : vector<10x59xf32>
    %516 = arith.mulf %27, %369 : vector<10x59xf32>
    %517 = arith.addf %515, %516 : vector<10x59xf32>
    %518 = arith.maximumf %500, %517 : vector<10x59xf32>
    %519 = vector.extract_strided_slice %518 {offsets = [0, 0], sizes = [10, 58], strides = [1, 1]} : vector<10x59xf32> to vector<10x58xf32>
    %520 = vector.extract_strided_slice %518 {offsets = [0, 1], sizes = [10, 58], strides = [1, 1]} : vector<10x59xf32> to vector<10x58xf32>
    %521 = arith.maximumf %519, %520 : vector<10x58xf32>
    %522 = tpu.concatenate %160, %198, %236, %274, %407, %445, %483, %521 in 0 : vector<10x58xf32>, vector<10x58xf32>, vector<10x58xf32>, vector<10x58xf32>, vector<10x58xf32>, vector<10x58xf32>, vector<10x58xf32>, vector<10x58xf32> -> vector<80x58xf32>
    %c0_8 = arith.constant 0 : index
    %c0_9 = arith.constant 0 : index
    %523 = vector.load %arg6[%c0_8, %c0_9] : memref<58x29xf32, #tpu.memory_space<vmem>>, vector<58x29xf32>
    %cst = arith.constant dense<0.000000e+00> : vector<80x29xf32>
    %524 = tpu.matmul %522, %523, %cst {dimension_numbers = #tpu.dot_dimension_numbers<[1], [0], [0], [1], [0, 0, 1, 1], [], []>} : vector<80x58xf32>, vector<58x29xf32>, vector<80x29xf32> -> vector<80x29xf32>
    %c0_10 = arith.constant 0 : index
    %c0_11 = arith.constant 0 : index
    %525 = vector.load %arg3[%c0_10, %c0_11] : memref<40x1xf32, #tpu.memory_space<vmem>>, vector<40x1xf32>
    %526 = vector.extract_strided_slice %524 {offsets = [0, 0], sizes = [40, 29], strides = [1, 1]} : vector<80x29xf32> to vector<40x29xf32>
    %527 = vector.broadcast %525 : vector<40x1xf32> to vector<40x29xf32>
    %528 = arith.addf %526, %527 : vector<40x29xf32>
    %cst_12 = arith.constant 0.000000e+00 : f32
    %529 = vector.broadcast %cst_12 : f32 to vector<40x29xf32>
    %530 = arith.maximumf %528, %529 : vector<40x29xf32>
    %531 = vector.extract_strided_slice %530 {offsets = [0, 0], sizes = [30, 27], strides = [1, 1]} : vector<40x29xf32> to vector<30x27xf32>
    %532 = vector.extract_strided_slice %530 {offsets = [0, 1], sizes = [30, 27], strides = [1, 1]} : vector<40x29xf32> to vector<30x27xf32>
    %533 = vector.extract_strided_slice %530 {offsets = [0, 2], sizes = [30, 27], strides = [1, 1]} : vector<40x29xf32> to vector<30x27xf32>
    %534 = tpu.concatenate %531, %532, %533 in 0 : vector<30x27xf32>, vector<30x27xf32>, vector<30x27xf32> -> vector<90x27xf32>
    %535 = vector.extract_strided_slice %530 {offsets = [10, 0], sizes = [30, 27], strides = [1, 1]} : vector<40x29xf32> to vector<30x27xf32>
    %536 = vector.extract_strided_slice %530 {offsets = [10, 1], sizes = [30, 27], strides = [1, 1]} : vector<40x29xf32> to vector<30x27xf32>
    %537 = vector.extract_strided_slice %530 {offsets = [10, 2], sizes = [30, 27], strides = [1, 1]} : vector<40x29xf32> to vector<30x27xf32>
    %538 = tpu.concatenate %535, %536, %537 in 0 : vector<30x27xf32>, vector<30x27xf32>, vector<30x27xf32> -> vector<90x27xf32>
    %539 = vector.extract_strided_slice %524 {offsets = [40, 0], sizes = [40, 29], strides = [1, 1]} : vector<80x29xf32> to vector<40x29xf32>
    %540 = vector.broadcast %525 : vector<40x1xf32> to vector<40x29xf32>
    %541 = arith.addf %539, %540 : vector<40x29xf32>
    %cst_13 = arith.constant 0.000000e+00 : f32
    %542 = vector.broadcast %cst_13 : f32 to vector<40x29xf32>
    %543 = arith.maximumf %541, %542 : vector<40x29xf32>
    %544 = vector.extract_strided_slice %543 {offsets = [0, 0], sizes = [30, 27], strides = [1, 1]} : vector<40x29xf32> to vector<30x27xf32>
    %545 = vector.extract_strided_slice %543 {offsets = [0, 1], sizes = [30, 27], strides = [1, 1]} : vector<40x29xf32> to vector<30x27xf32>
    %546 = vector.extract_strided_slice %543 {offsets = [0, 2], sizes = [30, 27], strides = [1, 1]} : vector<40x29xf32> to vector<30x27xf32>
    %547 = tpu.concatenate %544, %545, %546 in 0 : vector<30x27xf32>, vector<30x27xf32>, vector<30x27xf32> -> vector<90x27xf32>
    %548 = vector.extract_strided_slice %543 {offsets = [10, 0], sizes = [30, 27], strides = [1, 1]} : vector<40x29xf32> to vector<30x27xf32>
    %549 = vector.extract_strided_slice %543 {offsets = [10, 1], sizes = [30, 27], strides = [1, 1]} : vector<40x29xf32> to vector<30x27xf32>
    %550 = vector.extract_strided_slice %543 {offsets = [10, 2], sizes = [30, 27], strides = [1, 1]} : vector<40x29xf32> to vector<30x27xf32>
    %551 = tpu.concatenate %548, %549, %550 in 0 : vector<30x27xf32>, vector<30x27xf32>, vector<30x27xf32> -> vector<90x27xf32>
    %552 = tpu.concatenate %534, %538, %547, %551 in 1 : vector<90x27xf32>, vector<90x27xf32>, vector<90x27xf32>, vector<90x27xf32> -> vector<90x108xf32>
    %c0_14 = arith.constant 0 : index
    %c0_15 = arith.constant 0 : index
    %553 = vector.load %arg4[%c0_14, %c0_15] : memref<20x90xf32, #tpu.memory_space<vmem>>, vector<20x90xf32>
    %cst_16 = arith.constant dense<0.000000e+00> : vector<20x108xf32>
    %554 = tpu.matmul %553, %552, %cst_16 {dimension_numbers = #tpu.dot_dimension_numbers<[1], [0], [0], [1], [0, 0, 1, 1], [], []>} : vector<20x90xf32>, vector<90x108xf32>, vector<20x108xf32> -> vector<20x108xf32>
    %c0_17 = arith.constant 0 : index
    %c0_18 = arith.constant 0 : index
    %555 = vector.load %arg5[%c0_17, %c0_18] : memref<20x1xf32, #tpu.memory_space<vmem>>, vector<20x1xf32>
    %556 = vector.broadcast %555 : vector<20x1xf32> to vector<20x108xf32>
    %557 = arith.addf %554, %556 : vector<20x108xf32>
    %558 = vector.extract_strided_slice %557 {offsets = [0, 0], sizes = [20, 27], strides = [1, 1]} : vector<20x108xf32> to vector<20x27xf32>
    %559 = vector.extract_strided_slice %557 {offsets = [0, 27], sizes = [20, 27], strides = [1, 1]} : vector<20x108xf32> to vector<20x27xf32>
    %560 = arith.maximumf %558, %559 : vector<20x27xf32>
    %561 = vector.extract_strided_slice %560 {offsets = [0, 0], sizes = [20, 26], strides = [1, 1]} : vector<20x27xf32> to vector<20x26xf32>
    %562 = vector.extract_strided_slice %560 {offsets = [0, 1], sizes = [20, 26], strides = [1, 1]} : vector<20x27xf32> to vector<20x26xf32>
    %563 = arith.maximumf %561, %562 : vector<20x26xf32>
    %564 = vector.extract_strided_slice %557 {offsets = [0, 54], sizes = [20, 27], strides = [1, 1]} : vector<20x108xf32> to vector<20x27xf32>
    %565 = vector.extract_strided_slice %557 {offsets = [0, 81], sizes = [20, 27], strides = [1, 1]} : vector<20x108xf32> to vector<20x27xf32>
    %566 = arith.maximumf %564, %565 : vector<20x27xf32>
    %567 = vector.extract_strided_slice %566 {offsets = [0, 0], sizes = [20, 26], strides = [1, 1]} : vector<20x27xf32> to vector<20x26xf32>
    %568 = vector.extract_strided_slice %566 {offsets = [0, 1], sizes = [20, 26], strides = [1, 1]} : vector<20x27xf32> to vector<20x26xf32>
    %569 = arith.maximumf %567, %568 : vector<20x26xf32>
    %570 = tpu.concatenate %563, %569 in 0 : vector<20x26xf32>, vector<20x26xf32> -> vector<40x26xf32>
    %c0_19 = arith.constant 0 : index
    %c0_20 = arith.constant 0 : index
    %571 = vector.load %arg7[%c0_19, %c0_20] : memref<26x13xf32, #tpu.memory_space<vmem>>, vector<26x13xf32>
    %cst_21 = arith.constant dense<0.000000e+00> : vector<40x13xf32>
    %572 = tpu.matmul %570, %571, %cst_21 {dimension_numbers = #tpu.dot_dimension_numbers<[1], [0], [0], [1], [0, 0, 1, 1], [], []>} : vector<40x26xf32>, vector<26x13xf32>, vector<40x13xf32> -> vector<40x13xf32>
    %cst_22 = arith.constant 0.000000e+00 : f32
    %573 = vector.broadcast %cst_22 : f32 to vector<40x13xf32>
    %574 = arith.maximumf %572, %573 : vector<40x13xf32>
    %575 = vector.extract_strided_slice %574 {offsets = [0, 0], sizes = [1, 13], strides = [1, 1]} : vector<40x13xf32> to vector<1x13xf32>
    %576 = vector.extract_strided_slice %574 {offsets = [1, 0], sizes = [1, 13], strides = [1, 1]} : vector<40x13xf32> to vector<1x13xf32>
    %577 = vector.extract_strided_slice %574 {offsets = [2, 0], sizes = [1, 13], strides = [1, 1]} : vector<40x13xf32> to vector<1x13xf32>
    %578 = vector.extract_strided_slice %574 {offsets = [3, 0], sizes = [1, 13], strides = [1, 1]} : vector<40x13xf32> to vector<1x13xf32>
    %579 = vector.extract_strided_slice %574 {offsets = [4, 0], sizes = [1, 13], strides = [1, 1]} : vector<40x13xf32> to vector<1x13xf32>
    %580 = vector.extract_strided_slice %574 {offsets = [5, 0], sizes = [1, 13], strides = [1, 1]} : vector<40x13xf32> to vector<1x13xf32>
    %581 = vector.extract_strided_slice %574 {offsets = [6, 0], sizes = [1, 13], strides = [1, 1]} : vector<40x13xf32> to vector<1x13xf32>
    %582 = vector.extract_strided_slice %574 {offsets = [7, 0], sizes = [1, 13], strides = [1, 1]} : vector<40x13xf32> to vector<1x13xf32>
    %583 = vector.extract_strided_slice %574 {offsets = [8, 0], sizes = [1, 13], strides = [1, 1]} : vector<40x13xf32> to vector<1x13xf32>
    %584 = vector.extract_strided_slice %574 {offsets = [9, 0], sizes = [1, 13], strides = [1, 1]} : vector<40x13xf32> to vector<1x13xf32>
    %585 = vector.extract_strided_slice %574 {offsets = [10, 0], sizes = [1, 13], strides = [1, 1]} : vector<40x13xf32> to vector<1x13xf32>
    %586 = vector.extract_strided_slice %574 {offsets = [11, 0], sizes = [1, 13], strides = [1, 1]} : vector<40x13xf32> to vector<1x13xf32>
    %587 = vector.extract_strided_slice %574 {offsets = [12, 0], sizes = [1, 13], strides = [1, 1]} : vector<40x13xf32> to vector<1x13xf32>
    %588 = vector.extract_strided_slice %574 {offsets = [13, 0], sizes = [1, 13], strides = [1, 1]} : vector<40x13xf32> to vector<1x13xf32>
    %589 = vector.extract_strided_slice %574 {offsets = [14, 0], sizes = [1, 13], strides = [1, 1]} : vector<40x13xf32> to vector<1x13xf32>
    %590 = vector.extract_strided_slice %574 {offsets = [15, 0], sizes = [1, 13], strides = [1, 1]} : vector<40x13xf32> to vector<1x13xf32>
    %591 = vector.extract_strided_slice %574 {offsets = [16, 0], sizes = [1, 13], strides = [1, 1]} : vector<40x13xf32> to vector<1x13xf32>
    %592 = vector.extract_strided_slice %574 {offsets = [17, 0], sizes = [1, 13], strides = [1, 1]} : vector<40x13xf32> to vector<1x13xf32>
    %593 = vector.extract_strided_slice %574 {offsets = [18, 0], sizes = [1, 13], strides = [1, 1]} : vector<40x13xf32> to vector<1x13xf32>
    %594 = vector.extract_strided_slice %574 {offsets = [19, 0], sizes = [1, 13], strides = [1, 1]} : vector<40x13xf32> to vector<1x13xf32>
    %595 = tpu.concatenate %575, %576, %577, %578, %579, %580, %581, %582, %583, %584, %585, %586, %587, %588, %589, %590 in 1 : vector<1x13xf32>, vector<1x13xf32>, vector<1x13xf32>, vector<1x13xf32>, vector<1x13xf32>, vector<1x13xf32>, vector<1x13xf32>, vector<1x13xf32>, vector<1x13xf32>, vector<1x13xf32>, vector<1x13xf32>, vector<1x13xf32>, vector<1x13xf32>, vector<1x13xf32>, vector<1x13xf32>, vector<1x13xf32> -> vector<1x208xf32>
    %596 = tpu.concatenate %591, %592, %593, %594 in 1 : vector<1x13xf32>, vector<1x13xf32>, vector<1x13xf32>, vector<1x13xf32> -> vector<1x52xf32>
    %597 = tpu.concatenate %595, %596 in 1 : vector<1x208xf32>, vector<1x52xf32> -> vector<1x260xf32>
    %598 = vector.extract_strided_slice %574 {offsets = [20, 0], sizes = [1, 13], strides = [1, 1]} : vector<40x13xf32> to vector<1x13xf32>
    %599 = vector.extract_strided_slice %574 {offsets = [21, 0], sizes = [1, 13], strides = [1, 1]} : vector<40x13xf32> to vector<1x13xf32>
    %600 = vector.extract_strided_slice %574 {offsets = [22, 0], sizes = [1, 13], strides = [1, 1]} : vector<40x13xf32> to vector<1x13xf32>
    %601 = vector.extract_strided_slice %574 {offsets = [23, 0], sizes = [1, 13], strides = [1, 1]} : vector<40x13xf32> to vector<1x13xf32>
    %602 = vector.extract_strided_slice %574 {offsets = [24, 0], sizes = [1, 13], strides = [1, 1]} : vector<40x13xf32> to vector<1x13xf32>
    %603 = vector.extract_strided_slice %574 {offsets = [25, 0], sizes = [1, 13], strides = [1, 1]} : vector<40x13xf32> to vector<1x13xf32>
    %604 = vector.extract_strided_slice %574 {offsets = [26, 0], sizes = [1, 13], strides = [1, 1]} : vector<40x13xf32> to vector<1x13xf32>
    %605 = vector.extract_strided_slice %574 {offsets = [27, 0], sizes = [1, 13], strides = [1, 1]} : vector<40x13xf32> to vector<1x13xf32>
    %606 = vector.extract_strided_slice %574 {offsets = [28, 0], sizes = [1, 13], strides = [1, 1]} : vector<40x13xf32> to vector<1x13xf32>
    %607 = vector.extract_strided_slice %574 {offsets = [29, 0], sizes = [1, 13], strides = [1, 1]} : vector<40x13xf32> to vector<1x13xf32>
    %608 = vector.extract_strided_slice %574 {offsets = [30, 0], sizes = [1, 13], strides = [1, 1]} : vector<40x13xf32> to vector<1x13xf32>
    %609 = vector.extract_strided_slice %574 {offsets = [31, 0], sizes = [1, 13], strides = [1, 1]} : vector<40x13xf32> to vector<1x13xf32>
    %610 = vector.extract_strided_slice %574 {offsets = [32, 0], sizes = [1, 13], strides = [1, 1]} : vector<40x13xf32> to vector<1x13xf32>
    %611 = vector.extract_strided_slice %574 {offsets = [33, 0], sizes = [1, 13], strides = [1, 1]} : vector<40x13xf32> to vector<1x13xf32>
    %612 = vector.extract_strided_slice %574 {offsets = [34, 0], sizes = [1, 13], strides = [1, 1]} : vector<40x13xf32> to vector<1x13xf32>
    %613 = vector.extract_strided_slice %574 {offsets = [35, 0], sizes = [1, 13], strides = [1, 1]} : vector<40x13xf32> to vector<1x13xf32>
    %614 = vector.extract_strided_slice %574 {offsets = [36, 0], sizes = [1, 13], strides = [1, 1]} : vector<40x13xf32> to vector<1x13xf32>
    %615 = vector.extract_strided_slice %574 {offsets = [37, 0], sizes = [1, 13], strides = [1, 1]} : vector<40x13xf32> to vector<1x13xf32>
    %616 = vector.extract_strided_slice %574 {offsets = [38, 0], sizes = [1, 13], strides = [1, 1]} : vector<40x13xf32> to vector<1x13xf32>
    %617 = vector.extract_strided_slice %574 {offsets = [39, 0], sizes = [1, 13], strides = [1, 1]} : vector<40x13xf32> to vector<1x13xf32>
    %618 = tpu.concatenate %598, %599, %600, %601, %602, %603, %604, %605, %606, %607, %608, %609, %610, %611, %612, %613 in 1 : vector<1x13xf32>, vector<1x13xf32>, vector<1x13xf32>, vector<1x13xf32>, vector<1x13xf32>, vector<1x13xf32>, vector<1x13xf32>, vector<1x13xf32>, vector<1x13xf32>, vector<1x13xf32>, vector<1x13xf32>, vector<1x13xf32>, vector<1x13xf32>, vector<1x13xf32>, vector<1x13xf32>, vector<1x13xf32> -> vector<1x208xf32>
    %619 = tpu.concatenate %614, %615, %616, %617 in 1 : vector<1x13xf32>, vector<1x13xf32>, vector<1x13xf32>, vector<1x13xf32> -> vector<1x52xf32>
    %620 = tpu.concatenate %618, %619 in 1 : vector<1x208xf32>, vector<1x52xf32> -> vector<1x260xf32>
    %621 = tpu.concatenate %597, %620 in 0 : vector<1x260xf32>, vector<1x260xf32> -> vector<2x260xf32>
    %c0_23 = arith.constant 0 : index
    %c0_24 = arith.constant 0 : index
    %622 = vector.load %arg8[%c0_23, %c0_24] : memref<260x64xf32, #tpu.memory_space<vmem>>, vector<260x64xf32>
    %cst_25 = arith.constant dense<0.000000e+00> : vector<2x64xf32>
    %623 = tpu.matmul %621, %622, %cst_25 {dimension_numbers = #tpu.dot_dimension_numbers<[1], [0], [0], [1], [0, 0, 1, 1], [], []>} : vector<2x260xf32>, vector<260x64xf32>, vector<2x64xf32> -> vector<2x64xf32>
    %c0_26 = arith.constant 0 : index
    %c0_27 = arith.constant 0 : index
    %624 = vector.load %arg9[%c0_26, %c0_27] : memref<1x64xf32, #tpu.memory_space<vmem>>, vector<1x64xf32>
    %625 = vector.broadcast %624 : vector<1x64xf32> to vector<2x64xf32>
    %626 = arith.addf %623, %625 : vector<2x64xf32>
    %cst_28 = arith.constant 0.000000e+00 : f32
    %627 = vector.broadcast %cst_28 : f32 to vector<2x64xf32>
    %628 = arith.maximumf %626, %627 : vector<2x64xf32>
    %c0_29 = arith.constant 0 : index
    %c0_30 = arith.constant 0 : index
    %629 = vector.load %arg10[%c0_29, %c0_30] : memref<64x64xf32, #tpu.memory_space<vmem>>, vector<64x64xf32>
    %cst_31 = arith.constant dense<0.000000e+00> : vector<2x64xf32>
    %630 = tpu.matmul %628, %629, %cst_31 {dimension_numbers = #tpu.dot_dimension_numbers<[1], [0], [0], [1], [0, 0, 1, 1], [], []>} : vector<2x64xf32>, vector<64x64xf32>, vector<2x64xf32> -> vector<2x64xf32>
    %c0_32 = arith.constant 0 : index
    %c0_33 = arith.constant 0 : index
    %631 = vector.load %arg11[%c0_32, %c0_33] : memref<1x64xf32, #tpu.memory_space<vmem>>, vector<1x64xf32>
    %632 = vector.broadcast %631 : vector<1x64xf32> to vector<2x64xf32>
    %633 = arith.addf %630, %632 : vector<2x64xf32>
    %cst_34 = arith.constant 0.000000e+00 : f32
    %634 = vector.broadcast %cst_34 : f32 to vector<2x64xf32>
    %635 = arith.maximumf %633, %634 : vector<2x64xf32>
    %c0_35 = arith.constant 0 : index
    %c0_36 = arith.constant 0 : index
    %636 = vector.load %arg12[%c0_35, %c0_36] : memref<64x3xf32, #tpu.memory_space<vmem>>, vector<64x3xf32>
    %cst_37 = arith.constant dense<0.000000e+00> : vector<2x3xf32>
    %637 = tpu.matmul %635, %636, %cst_37 {dimension_numbers = #tpu.dot_dimension_numbers<[1], [0], [0], [1], [0, 0, 1, 1], [], []>} : vector<2x64xf32>, vector<64x3xf32>, vector<2x3xf32> -> vector<2x3xf32>
    %c0_38 = arith.constant 0 : index
    %c0_39 = arith.constant 0 : index
    %638 = vector.load %arg13[%c0_38, %c0_39] : memref<1x3xf32, #tpu.memory_space<vmem>>, vector<1x3xf32>
    %639 = vector.broadcast %638 : vector<1x3xf32> to vector<2x3xf32>
    %640 = arith.addf %637, %639 : vector<2x3xf32>
    %c0_40 = arith.constant 0 : index
    %c0_41 = arith.constant 0 : index
    %641 = vector.load %arg14[%c0_40, %c0_41] : memref<2x3xf32, #tpu.memory_space<vmem>>, vector<2x3xf32>
    tpu.vector_store %arg14[%c0_40, %c0_41], %640 {strides = array<i32>} : memref<2x3xf32, #tpu.memory_space<vmem>>, vector<2x3xf32>,
    return
  }
  func.func @transform_0(%arg0: i32) -> (i32, i32, i32, i32) {
    %c0_i32 = arith.constant 0 : i32
    %c0_i32_0 = arith.constant 0 : i32
    %c0_i32_1 = arith.constant 0 : i32
    %c0_i32_2 = arith.constant 0 : i32
    return %arg0, %c0_i32, %c0_i32_0, %c0_i32_1 : i32, i32, i32, i32
  }
  func.func @transform_1(%arg0: i32) -> (i32, i32) {
    %c0_i32 = arith.constant 0 : i32
    %c0_i32_0 = arith.constant 0 : i32
    %c0_i32_1 = arith.constant 0 : i32
    return %c0_i32, %c0_i32_0 : i32, i32
  }
  func.func @transform_2(%arg0: i32) -> (i32, i32) {
    %c0_i32 = arith.constant 0 : i32
    %c0_i32_0 = arith.constant 0 : i32
    %c0_i32_1 = arith.constant 0 : i32
    return %c0_i32, %c0_i32_0 : i32, i32
  }
  func.func @transform_3(%arg0: i32) -> (i32, i32) {
    %c0_i32 = arith.constant 0 : i32
    %c0_i32_0 = arith.constant 0 : i32
    %c0_i32_1 = arith.constant 0 : i32
    return %c0_i32, %c0_i32_0 : i32, i32
  }
  func.func @transform_4(%arg0: i32) -> (i32, i32) {
    %c0_i32 = arith.constant 0 : i32
    %c0_i32_0 = arith.constant 0 : i32
    %c0_i32_1 = arith.constant 0 : i32
    return %c0_i32, %c0_i32_0 : i32, i32
  }
  func.func @transform_5(%arg0: i32) -> (i32, i32) {
    %c0_i32 = arith.constant 0 : i32
    %c0_i32_0 = arith.constant 0 : i32
    %c0_i32_1 = arith.constant 0 : i32
    return %c0_i32, %c0_i32_0 : i32, i32
  }
  func.func @transform_6(%arg0: i32) -> (i32, i32) {
    %c0_i32 = arith.constant 0 : i32
    %c0_i32_0 = arith.constant 0 : i32
    %c0_i32_1 = arith.constant 0 : i32
    return %c0_i32, %c0_i32_0 : i32, i32
  }
  func.func @transform_7(%arg0: i32) -> (i32, i32) {
    %c0_i32 = arith.constant 0 : i32
    %c0_i32_0 = arith.constant 0 : i32
    %c0_i32_1 = arith.constant 0 : i32
    return %c0_i32, %c0_i32_0 : i32, i32
  }
  func.func @transform_8(%arg0: i32) -> (i32, i32) {
    %c0_i32 = arith.constant 0 : i32
    %c0_i32_0 = arith.constant 0 : i32
    %c0_i32_1 = arith.constant 0 : i32
    return %c0_i32, %c0_i32_0 : i32, i32
  }
  func.func @transform_9(%arg0: i32) -> (i32, i32) {
    %c0_i32 = arith.constant 0 : i32
    %c0_i32_0 = arith.constant 0 : i32
    %c0_i32_1 = arith.constant 0 : i32
    return %c0_i32, %c0_i32_0 : i32, i32
  }
  func.func @transform_10(%arg0: i32) -> (i32, i32) {
    %c0_i32 = arith.constant 0 : i32
    %c0_i32_0 = arith.constant 0 : i32
    %c0_i32_1 = arith.constant 0 : i32
    return %c0_i32, %c0_i32_0 : i32, i32
  }
  func.func @transform_11(%arg0: i32) -> (i32, i32) {
    %c0_i32 = arith.constant 0 : i32
    %c0_i32_0 = arith.constant 0 : i32
    %c0_i32_1 = arith.constant 0 : i32
    return %c0_i32, %c0_i32_0 : i32, i32
  }
  func.func @transform_12(%arg0: i32) -> (i32, i32) {
    %c0_i32 = arith.constant 0 : i32
    %c0_i32_0 = arith.constant 0 : i32
    %c0_i32_1 = arith.constant 0 : i32
    return %c0_i32, %c0_i32_0 : i32, i32
  }
  func.func @transform_13(%arg0: i32) -> (i32, i32) {
    %c0_i32 = arith.constant 0 : i32
    %c0_i32_0 = arith.constant 0 : i32
    return %arg0, %c0_i32 : i32, i32
  }
}

</mosaic_0001>

<bundles_post_ra>
// kernel: conv2net_forward.1
= control target key start
LH: loop header
LB: loop body
LE: loop exit
PB: predicated region body
PF: predicated region fallthrough
CT: control target
= control target key end

     0   :  { %v123_v1 = vlaneseq  ;;  %v3726_v2 = vmov 1   ;;  %v3727_v3 = vmov 2   ;;  %s5851_s0 = inlined_call_operand.vmem [shape: f32[2,1,11,61], index: 0, kind: input, shape index: {}]   ;;  %s5852_s1 = inlined_call_operand.vmem [shape: f32[10,9], index: 1, kind: input, shape index: {}]   ;;  %s5853_s2 = inlined_call_operand.vmem [shape: f32[40,1], index: 2, kind: input, shape index: {}]   ;;  %s5854_s3 = inlined_call_operand.vmem [shape: f32[20,90], index: 3, kind: input, shape index: {}]   ;;  %s5855_s4 = inlined_call_operand.vmem [shape: f32[20,1], index: 4, kind: input, shape index: {}]   ;;  %s5856_s5 = inlined_call_operand.vmem [shape: f32[58,29], index: 5, kind: input, shape index: {}]   ;;  %s5857_s6 = inlined_call_operand.vmem [shape: f32[26,13], index: 6, kind: input, shape index: {}]   ;;  %s5858_s7 = inlined_call_operand.vmem [shape: f32[260,64], index: 7, kind: input, shape index: {}]   ;;  %s5859_s8 = inlined_call_operand.vmem [shape: f32[1,64], index: 8, kind: input, shape index: {}]   ;;  %s5860_s9 = inlined_call_operand.vmem [shape: f32[64,64], index: 9, kind: input, shape index: {}]   ;;  %s5861_s10 = inlined_call_operand.vmem [shape: f32[1,64], index: 10, kind: input, shape index: {}]   ;;  %s5862_s11 = inlined_call_operand.vmem [shape: f32[64,3], index: 11, kind: input, shape index: {}]   ;;  %s5863_s12 = inlined_call_operand.vmem [shape: f32[1,3], index: 12, kind: input, shape index: {}]   ;;  %s5864_s13 = inlined_call_operand.hbm [shape: f32[2,3], index: 13, kind: output, shape index: {}]  }
   0x1   :  { %v45_v0 = vld [vmem:[%s5852_s1] sm:$0xff]  ;;  %3443 = vset.pattern.permute.xlu0 %v3726_v2  ;;  %3444 = vset.pattern.permute.xlu1 %v3727_v3 }
   0x2   :  { %58 = vperm.xlu0 %3443, %v45_v0   ;;  %66 = vperm.xlu1 %3444, %v45_v0   ;;  %v3835_v4 = vshrl.u32 %v123_v1, 7 }
   0x3   :  { %18 = vsyncpa [#allocation3], 0  ;;  %v46_v5 = vld [vmem:[%s5852_s1 + $0x8] sm:$0x3]  ;;  %v3845_v8 = vld [vmem:[%s5851_s0 + $0x10] sm:$0xff]  ;;  %v3728_v9 = vmov 4  }
   0x4   :  { %v153_v6 = vsub.s32 7, %v3835_v4  ;;  %v149_v7 = vsub.s32 6, %v3835_v4  ;;  %v3729_v12 = vmov 5   ;;  %v3730_v13 = vmov 7   ;;  %v121_v20 = vld [vmem:[%s5851_s0] sm:$0xff]  ;;  %s3735_s15 = smov 127  }
   0x5   :  { %v3731_v14 = vmov 8   ;;  %v3732_v15 = vmov 6   ;;  %v3733_v16 = vmov 0   ;;  %v3734_v17 = vmov 3   ;;  %s3736_s16 = smov 126   ;;  %s3739_s28 = smov 27  }
   0x6   :  { %62 = vperm.xlu0 %3443, %v46_v5   ;;  %70 = vperm.xlu1 %3444, %v46_v5   ;;  %v3850_v10 = vrot.slane %v3845_v8, %v149_v7  ;;  %v3855_v11 = vrot.slane %v3845_v8, %v153_v6  ;;  %v137_v18 = vsub.s32 3, %v3835_v4  ;;  %v133_v19 = vsub.s32 2, %v3835_v4  ;;  %s3741_s29 = smov 81   ;;  %s3748_s30 = smov 39  }
   0x7   :  { %v3871_v23 = vsub.s32 1, %v3835_v4  ;;  %v3874_v24 = vsub.s32 0, %v3835_v4  ;;  %v141_v35 = vsub.s32 4, %v3835_v4  ;;  %v145_v41 = vsub.s32 5, %v3835_v4  ;;  %s3749_s1 = smov 117   ;;  %s3750_s14 = smov 2  }
   0x8   :  { %v3864_v21 = vrot.slane %v121_v20, %v137_v18  ;;  %v3868_v22 = vrot.slane %v121_v20, %v133_v19  ;;  %v3954_v53 = vrot.slane %v121_v20, %v153_v6  ;;  %v3970_v58 = vrot.slane %v121_v20, %v149_v7  ;;  %s3751_s17 = smov 15   ;;  %s3752_s18 = smov 52  }
   0x9   :  { %5879 = vst [vmem:[#allocation5_spill] sm:$0xff] %v3874_v24  ;;  %v3883_v28 = vrot.slane %v121_v20, %v3871_v23  ;;  %v3886_v29 = vrot.slane %v121_v20, %v3874_v24  ;;  %v3915_v39 = vrot.slane %v121_v20, %v141_v35  ;;  %v3926_v43 = vrot.slane %v121_v20, %v145_v41  ;;  %s3754_s19 = smov 78   ;;  %s3755_s24 = smov 91  }
   0xa   :  { %3445 = vset.pattern.permute.xlu0 %v3728_v9  ;;  %3446 = vset.pattern.permute.xlu1 %v3728_v9  ;;  %vm1616_vm0 = vcmask 1041408   ;;  %vm3737_vm1 = vmmov 1   ;;  %vm1671_vm3 = vcmask 474112   ;;  %vm1624_vm4 = vcmask 1043456   ;;  %s3756_s25 = smov 41   ;;  %s3758_s27 = smov 67  }
   0xb   :  { %82 = vperm.xlu0 %3445, %v45_v0   ;;  %86 = vperm.xlu1 %3446, %v46_v5   ;;  %vm5033_vm2 = vmpackc.low %vm1616_vm0, %vm3737_vm1  ;;  %vm1632_vm5 = vcmask 1045504   ;;  %vm2151_vm6 = vcmask 220160   ;;  %vm2164_vm7 = vcmask 441344   ;;  %vm2177_vm8 = vcmask 662528  }
   0xc   :  { %vm3742_vm9 = vmmov 0   ;;  %vm2211_vm10 = vcmask 736256   ;;  %vm2354_vm11 = vcmask 211968   ;;  %vm2525_vm12 = vcmask 105472  }
   0xd   :  { %vm2528_vm13 = vcmask 318464   ;;  %vm2530_vm14 = vcmask 424960   ;;  %vm2532_vm15 = vcmask 531456   ;;  %vm2536_vm1 = vcmask 744448  }
   0xf   :  { %3447 = vset.pattern.permute.xlu1 %v3729_v12  ;;  %3448 = vset.pattern.permute.xlu0 %v3729_v12 }
  0x10   :  { %90 = vperm.xlu1 %3447, %v45_v0   ;;  %94 = vperm.xlu0 %3448, %v46_v5  }
  0x14   :  { %3449 = vset.pattern.permute.xlu1 %v3730_v13  ;;  %3450 = vset.pattern.permute.xlu0 %v3731_v14 }
  0x15   :  { %106 = vperm.xlu1 %3449, %v45_v0   ;;  %114 = vperm.xlu0 %3450, %v45_v0  }
  0x19   :  { %110 = vperm.xlu1 %3449, %v46_v5   ;;  %3454 = vset.pattern.permute.xlu0 %v3732_v15 }
  0x1a   :  { %98 = vperm.xlu0 %3454, %v45_v0  }
  0x1d   :  { %3451 = vset.pattern.permute.xlu1 %v3731_v14 }
  0x1e   :  { %118 = vperm.xlu1 %3451, %v46_v5   ;;  %102 = vperm.xlu0 %3454, %v46_v5  }
  0x22   :  { %3452 = vset.pattern.permute.xlu1 %v3733_v16  ;;  %3455 = vset.pattern.permute.xlu0 %v3733_v16 }
  0x23   :  { %49 = vperm.xlu1 %3452, %v45_v0   ;;  %54 = vperm.xlu0 %3455, %v46_v5  }
  0x27   :  { %3453 = vset.pattern.permute.xlu1 %v3734_v17 }
  0x28   :  { %74 = vperm.xlu1 %3453, %v45_v0  }
  0x2c   :  { %78 = vperm.xlu1 %3453, %v46_v5  }
  0x30   :  { %3456 = vset.pattern.permute.xlu1 %v3733_v16 }
  0x81   :  { %v3876_v25 = vpop.permute.xlu0 %58  ;;  %v3909_v38 = vpop.permute.xlu1 %66 }
  0x82   :  { %v423_v26 = vmul.f32 %v3864_v21, %v3876_v25  ;;  %v341_v27 = vmul.f32 %v3868_v22, %v3876_v25  ;;  %v247_v30 = vmul.f32 %v3883_v28, %v3876_v25  ;;  %v165_v31 = vmul.f32 %v3886_v29, %v3876_v25 }
  0x83   :  { %v353_v40 = vmul.f32 %v3868_v22, %v3909_v38  ;;  %v435_v45 = vmul.f32 %v3864_v21, %v3909_v38  ;;  %v517_v48 = vmul.f32 %v3915_v39, %v3876_v25  ;;  %v599_v50 = vmul.f32 %v3926_v43, %v3876_v25 }
  0x84   :  { %427 = vrot.lane.b32.xlu1 %v423_v26, %s3735_s15  ;;  %345 = vrot.lane.b32.xlu0 %v341_v27, %s3735_s15  ;;  %v177_v52 = vmul.f32 %v3886_v29, %v3909_v38  ;;  %v775_v54 = vmul.f32 %v3954_v53, %v3876_v25  ;;  %v259_v55 = vmul.f32 %v3883_v28, %v3909_v38 }
  0x85   :  { %v3894_v32 = vpop.permute.xlu0 %62  ;;  %v3932_v46 = vpop.permute.xlu1 %70  ;;  %v693_v61 = vmul.f32 %v3970_v58, %v3876_v25  ;;  %v529_v63 = vmul.f32 %v3915_v39, %v3909_v38  ;;  %v611_v0 = vmul.f32 %v3926_v43, %v3909_v38  ;;  %v787_v1 = vmul.f32 %v3954_v53, %v3909_v38 }
  0x86   :  { %v342_v33 = vmul.f32 %v3868_v22, %v3894_v32  ;;  %v166_v34 = vmul.f32 %v3886_v29, %v3894_v32  ;;  %v424_v36 = vmul.f32 %v3864_v21, %v3894_v32  ;;  %v248_v37 = vmul.f32 %v3883_v28, %v3894_v32 }
  0x87   :  { %v518_v42 = vmul.f32 %v3915_v39, %v3894_v32  ;;  %v600_v44 = vmul.f32 %v3926_v43, %v3894_v32  ;;  %v178_v47 = vmul.f32 %v3886_v29, %v3932_v46  ;;  %v260_v49 = vmul.f32 %v3883_v28, %v3932_v46 }
  0x88   :  { %251 = vrot.lane.b32.xlu0 %v247_v30, %s3735_s15  ;;  %169 = vrot.lane.b32.xlu1 %v165_v31, %s3735_s15  ;;  %v436_v51 = vmul.f32 %v3864_v21, %v3932_v46  ;;  %v530_v56 = vmul.f32 %v3915_v39, %v3932_v46  ;;  %v354_v57 = vmul.f32 %v3868_v22, %v3932_v46 }
  0x89   :  { %v612_v60 = vmul.f32 %v3926_v43, %v3932_v46  ;;  %v776_v5 = vmul.f32 %v3954_v53, %v3894_v32  ;;  %v705_v7 = vmul.f32 %v3970_v58, %v3909_v38  ;;  %v694_v13 = vmul.f32 %v3970_v58, %v3894_v32 }
  0x8a   :  { %v3974_v59 = vpop.permute.xlu0 %82  ;;  %v3996_v3 = vpop.permute.xlu1 %86 }
  0x8b   :  { %v451_v62 = vmul.f32 %v3915_v39, %v3974_v59  ;;  %v369_v2 = vmul.f32 %v3864_v21, %v3974_v59  ;;  %v194_v6 = vmul.f32 %v3883_v28, %v3996_v3  ;;  %v276_v9 = vmul.f32 %v3868_v22, %v3996_v3 }
  0x8c   :  { %347 = vrot.lane.b32.xlu0 %v342_v33, %s3735_s15  ;;  %171 = vrot.lane.b32.xlu1 %v166_v34, %s3735_s15  ;;  %v193_v15 = vmul.f32 %v3883_v28, %v3974_v59  ;;  %v275_v17 = vmul.f32 %v3868_v22, %v3974_v59  ;;  %v546_v20 = vmul.f32 %v3926_v43, %v3996_v3 }
  0x8d   :  { %v370_v26 = vmul.f32 %v3864_v21, %v3996_v3  ;;  %v628_v27 = vmul.f32 %v3970_v58, %v3996_v3  ;;  %v452_v30 = vmul.f32 %v3915_v39, %v3996_v3  ;;  %v788_v34 = vmul.f32 %v3954_v53, %v3932_v46 }
  0x8f   :  { %v4010_v12 = vpop.permute.xlu1 %90  ;;  %v4040_v31 = vpop.permute.xlu0 %94 }
  0x90   :  { %429 = vrot.lane.b32.xlu0 %v424_v36, %s3735_s15  ;;  %253 = vrot.lane.b32.xlu1 %v248_v37, %s3735_s15  ;;  %5880 = vst [vmem:[#allocation6_spill] sm:$0xff] %v4010_v12  ;;  %v381_v14 = vmul.f32 %v3864_v21, %v4010_v12  ;;  %v463_v16 = vmul.f32 %v3915_v39, %v4010_v12  ;;  %5881 = vst [vmem:[#allocation7_spill] sm:$0xff] %v4040_v31 }
  0x91   :  { %v545_v36 = vmul.f32 %v3926_v43, %v3974_v59  ;;  %v206_v37 = vmul.f32 %v3883_v28, %v4040_v31 }
  0x94   :  { %523 = vrot.lane.b32.xlu0 %v518_v42, %s3735_s15  ;;  %357 = vrot.lane.b32.xlu1 %v353_v40, %s3736_s16  ;;  %v4042_v33 = vpop.permute.xlu1 %106  ;;  %v627_v40 = vmul.f32 %v3970_v58, %v3974_v59 }
  0x98   :  { %605 = vrot.lane.b32.xlu0 %v600_v44, %s3735_s15  ;;  %439 = vrot.lane.b32.xlu1 %v435_v45, %s3736_s16  ;;  %v4054_v42 = vpop.permute.xlu1 %110  ;;  %v288_v44 = vmul.f32 %v3868_v22, %v4040_v31  ;;  %v706_v45 = vmul.f32 %v3970_v58, %v3932_v46 }
  0x99   :  { %5882 = vst [vmem:[#allocation8_spill] sm:$0xff] %v4054_v42 }
  0x9c   :  { %183 = vrot.lane.b32.xlu0 %v178_v47, %s3736_s16  ;;  %521 = vrot.lane.b32.xlu1 %v517_v48, %s3735_s15  ;;  %v4062_v47 = vpop.permute.xlu0 %114  ;;  %v4067_v48 = vld [vmem:[%s5851_s0 + $0x8] sm:$0x7] }
  0xa0   :  { %265 = vrot.lane.b32.xlu0 %v260_v49, %s3736_s16  ;;  %603 = vrot.lane.b32.xlu1 %v599_v50, %s3735_s15  ;;  %v4071_v49 = vpop.permute.xlu1 %118  ;;  %v464_v50 = vmul.f32 %v3915_v39, %v4040_v31 }
  0xa4   :  { %441 = vrot.lane.b32.xlu0 %v436_v51, %s3736_s16  ;;  %181 = vrot.lane.b32.xlu1 %v177_v52, %s3736_s16  ;;  %v4077_v51 = vrot.slane %v4067_v48, %v3874_v24  ;;  %v205_v52 = vmul.f32 %v3883_v28, %v4010_v12 }
  0xa8   :  { %779 = vrot.lane.b32.xlu0 %v775_v54, %s3735_s15  ;;  %263 = vrot.lane.b32.xlu1 %v259_v55, %s3736_s16  ;;  %v4083_v54 = vpop.permute.xlu0 %98  ;;  %v4085_v55 = vpop.permute.xlu1 %49 }
  0xa9   :  { %5883 = vst [vmem:[#allocation9_spill] sm:$0xff] %v4083_v54 }
  0xac   :  { %535 = vrot.lane.b32.xlu0 %v530_v56, %s3736_s16  ;;  %359 = vrot.lane.b32.xlu1 %v354_v57, %s3736_s16  ;;  %v287_v56 = vmul.f32 %v3868_v22, %v4010_v12  ;;  %v803_v57 = vmul.f32 %v4077_v51, %v3974_v59 }
  0xb0   :  { %617 = vrot.lane.b32.xlu0 %v612_v60, %s3736_s16  ;;  %697 = vrot.lane.b32.xlu1 %v693_v61, %s3735_s15  ;;  %v382_v60 = vmul.f32 %v3864_v21, %v4040_v31  ;;  %v558_v61 = vmul.f32 %v3926_v43, %v4040_v31 }
  0xb4   :  { %533 = vrot.lane.b32.xlu1 %v529_v63, %s3736_s16  ;;  %455 = vrot.lane.b32.xlu0 %v451_v62, %s3735_s15  ;;  %v4097_v62 = vpop.permute.xlu0 %102  ;;  %v4099_v63 = vpop.permute.xlu1 %74 }
  0xb5   :  { %5884 = vst [vmem:[#allocation10_spill] sm:$0xff] %v4099_v63 }
  0xb8   :  { %615 = vrot.lane.b32.xlu1 %v611_v0, %s3736_s16  ;;  %791 = vrot.lane.b32.xlu0 %v787_v1, %s3736_s16  ;;  %v721_v0 = vmul.f32 %v3954_v53, %v3974_v59  ;;  %v640_v1 = vmul.f32 %v3970_v58, %v4040_v31 }
  0xbc   :  { %781 = vrot.lane.b32.xlu0 %v776_v5, %s3735_s15  ;;  %373 = vrot.lane.b32.xlu1 %v369_v2, %s3735_s15  ;;  %v4109_v2 = vrot.slane %v3845_v8, %v3871_v23  ;;  %v4113_v5 = vpop.permute.xlu0 %54 }
  0xc0   :  { %199 = vrot.lane.b32.xlu0 %v194_v6, %s3735_s15  ;;  %709 = vrot.lane.b32.xlu1 %v705_v7, %s3736_s16  ;;  %v4115_v6 = vpop.permute.xlu1 %78  ;;  %v557_v7 = vmul.f32 %v3926_v43, %v4010_v12 }
  0xc4   :  { %281 = vrot.lane.b32.xlu0 %v276_v9, %s3735_s15  ;;  %699 = vrot.lane.b32.xlu1 %v694_v13, %s3735_s15  ;;  %v994_v9 = vmul.f32 %v4109_v2, %v3876_v25  ;;  %v4125_v13 = vrot.slane %v3845_v8, %v133_v19 }
  0xc8   :  { %385 = vrot.lane.b32.xlu0 %v381_v14, %s3736_s16  ;;  %197 = vrot.lane.b32.xlu1 %v193_v15, %s3735_s15 }
  0xcc   :  { %467 = vrot.lane.b32.xlu0 %v463_v16, %s3736_s16  ;;  %279 = vrot.lane.b32.xlu1 %v275_v17, %s3735_s15  ;;  %v639_v16 = vmul.f32 %v3970_v58, %v4010_v12  ;;  %v1089_v17 = vmul.f32 %v4125_v13, %v3894_v32 }
  0xd0   :  { %551 = vrot.lane.b32.xlu0 %v546_v20, %s3735_s15  ;;  %375 = vrot.lane.b32.xlu1 %v370_v26, %s3735_s15  ;;  %v4134_v20 = vrot.slane %v3845_v8, %v3874_v24  ;;  %v4139_v26 = vrot.slane %v3845_v8, %v137_v18 }
  0xd2   :  { %5885 = vst [vmem:[#allocation11_spill] sm:$0xff] %v4134_v20 }
  0xd4   :  { %633 = vrot.lane.b32.xlu0 %v628_v27, %s3735_s15  ;;  %457 = vrot.lane.b32.xlu1 %v452_v30, %s3735_s15  ;;  %v912_v30 = vmul.f32 %v4134_v20, %v3876_v25 }
  0xd8   :  { %793 = vrot.lane.b32.xlu0 %v788_v34, %s3736_s16  ;;  %549 = vrot.lane.b32.xlu1 %v545_v36, %s3735_s15  ;;  %v1171_v34 = vmul.f32 %v4139_v26, %v3894_v32 }
  0xdc   :  { %631 = vrot.lane.b32.xlu1 %v627_v40, %s3735_s15  ;;  %211 = vrot.lane.b32.xlu0 %v206_v37, %s3736_s16  ;;  %v1088_v37 = vmul.f32 %v4125_v13, %v3876_v25  ;;  %v479_v40 = vmul.f32 %v3926_v43, %v4042_v33 }
  0xe0   :  { %711 = vrot.lane.b32.xlu1 %v706_v45, %s3736_s16  ;;  %293 = vrot.lane.b32.xlu0 %v288_v44, %s3736_s16  ;;  %v4164_v44 = vrot.slane %v3845_v8, %v145_v41  ;;  %v397_v41 = vmul.f32 %v3915_v39, %v4042_v33 }
  0xe4   :  { %209 = vrot.lane.b32.xlu1 %v205_v52, %s3736_s16  ;;  %469 = vrot.lane.b32.xlu0 %v464_v50, %s3736_s16  ;;  %v1170_v52 = vmul.f32 %v4139_v26, %v3876_v25 }
  0xe8   :  { %291 = vrot.lane.b32.xlu1 %v287_v56, %s3736_s16  ;;  %807 = vrot.lane.b32.xlu0 %v803_v57, %s3735_s15  ;;  %v815_v56 = vmul.f32 %v4077_v51, %v4010_v12  ;;  %v339_v57 = vmul.f32 %v3868_v22, %v4085_v55 }
  0xec   :  { %387 = vrot.lane.b32.xlu1 %v382_v60, %s3736_s16  ;;  %563 = vrot.lane.b32.xlu0 %v558_v61, %s3736_s16 }
  0xf0   :  { %725 = vrot.lane.b32.xlu1 %v721_v0, %s3735_s15  ;;  %645 = vrot.lane.b32.xlu0 %v640_v1, %s3736_s16  ;;  %v1346_v1 = vmul.f32 %v4164_v44, %v3876_v25 }
  0xf4   :  { %561 = vrot.lane.b32.xlu1 %v557_v7, %s3736_s16  ;;  %998 = vrot.lane.b32.xlu0 %v994_v9, %s3735_s15  ;;  %v421_v7 = vmul.f32 %v3864_v21, %v4085_v55 }
  0xf6   :  { %v428_v14 = vpop.permute.xlu1 %427  ;;  %v346_v15 = vpop.permute.xlu0 %345 }
  0xf7   :  { %v351_v60 = vadd.f32 %v346_v15, %v339_v57  ;;  %v433_v15 = vadd.f32 %v428_v14, %v421_v7  ;;  %v447_v57 = vmul.f32 %v3915_v39, %v4099_v63 }
  0xf8   :  { %643 = vrot.lane.b32.xlu1 %v639_v16, %s3736_s16  ;;  %1094 = vrot.lane.b32.xlu0 %v1089_v17, %s3735_s15  ;;  %v365_v16 = vmul.f32 %v3864_v21, %v4099_v63 }
  0xfa   :  { %v4143_v19 = vpop.permute.xlu1 %169  ;;  %v4145_v27 = vpop.permute.xlu0 %251 }
  0xfc   :  { %916 = vrot.lane.b32.xlu1 %v912_v30, %s3735_s15  ;;  %1176 = vrot.lane.b32.xlu0 %v1171_v34, %s3735_s15  ;;  %v4191_v30 = vrot.slane %v3845_v8, %v141_v35 }
  0xfe   :  { %v172_v18 = vpop.permute.xlu1 %171  ;;  %v4153_v36 = vpop.permute.xlu0 %347 }
 0x100   :  { %1092 = vrot.lane.b32.xlu1 %v1088_v37, %s3735_s15  ;;  %483 = vrot.lane.b32.xlu0 %v479_v40, %s3735_s15  ;;  %v733_v40 = vmul.f32 %v3954_v53, %v4010_v12  ;;  %v573_v12 = vmul.f32 %v3970_v58, %v4042_v33 }
 0x102   :  { %v254_v45 = vpop.permute.xlu1 %253  ;;  %v430_v50 = vpop.permute.xlu0 %429 }
 0x104   :  { %1174 = vrot.lane.b32.xlu1 %v1170_v52, %s3735_s15  ;;  %819 = vrot.lane.b32.xlu0 %v815_v56, %s3736_s16  ;;  %v804_v52 = vmul.f32 %v4077_v51, %v3996_v3  ;;  %v164_v56 = vmul.f32 %v3886_v29, %v4113_v5 }
 0x106   :  { %v358_v61 = vpop.permute.xlu1 %357  ;;  %v4174_v0 = vpop.permute.xlu0 %523  ;;  %v176_v4 = vadd.f32 %v172_v18, %v164_v56  ;;  %v163_v56 = vmul.f32 %v3886_v29, %v4085_v55 }
 0x107   :  { %v363_v9 = vadd.f32 %v358_v61, %v351_v60  ;;  %v1264_v61 = vmul.f32 %v4191_v30, %v3876_v25 }
 0x108   :  { %401 = vrot.lane.b32.xlu1 %v397_v41, %s3735_s15  ;;  %1350 = vrot.lane.b32.xlu0 %v1346_v1, %s3735_s15  ;;  %v924_v41 = vmul.f32 %v4134_v20, %v3909_v38  ;;  %v246_v1 = vmul.f32 %v3883_v28, %v4113_v5 }
 0x109   :  { %v4186_v17 = vadd.f32 %v365_v16, %v363_v9  ;;  %v190_v9 = vmul.f32 %v3883_v28, %v4115_v6 }
 0x10a   :  { %v440_v34 = vpop.permute.xlu1 %439  ;;  %v4193_v37 = vpop.permute.xlu0 %605  ;;  %v258_v18 = vadd.f32 %v254_v45, %v246_v1  ;;  %v272_v45 = vmul.f32 %v3868_v22, %v4115_v6 }
 0x10b   :  { %v445_v14 = vadd.f32 %v440_v34, %v433_v15 }
 0x10c   :  { %737 = vrot.lane.b32.xlu1 %v733_v40, %s3736_s16  ;;  %809 = vrot.lane.b32.xlu0 %v804_v52, %s3735_s15  ;;  %v722_v40 = vmul.f32 %v3954_v53, %v3996_v3  ;;  %v1006_v52 = vmul.f32 %v4109_v2, %v3909_v38 }
 0x10d   :  { %v4205_v8 = vadd.f32 %v447_v57, %v445_v14  ;;  %v422_v14 = vmul.f32 %v3864_v21, %v4113_v5 }
 0x10e   :  { %v4207_v35 = vpop.permute.xlu1 %521  ;;  %v184_v60 = vpop.permute.xlu0 %183 }
 0x10f   :  { %v188_v7 = vadd.f32 %v184_v60, %v176_v4  ;;  %v175_v4 = vadd.f32 %v4143_v19, %v163_v56  ;;  %v434_v60 = vadd.f32 %v430_v50, %v422_v14  ;;  %v448_v19 = vmul.f32 %v3915_v39, %v4115_v6 }
 0x110   :  { %1268 = vrot.lane.b32.xlu1 %v1264_v61, %s3735_s15  ;;  %928 = vrot.lane.b32.xlu0 %v924_v41, %s3736_s16  ;;  %v245_v41 = vmul.f32 %v3883_v28, %v4085_v55 }
 0x111   :  { %v4219_v16 = vadd.f32 %v190_v9, %v188_v7  ;;  %v913_v7 = vmul.f32 %v4134_v20, %v3894_v32  ;;  %v1101_v9 = vmul.f32 %v4125_v13, %v3932_v46 }
 0x112   :  { %v4221_v15 = vpop.permute.xlu1 %603  ;;  %v266_v34 = vpop.permute.xlu0 %265  ;;  %v257_v50 = vadd.f32 %v4145_v27, %v245_v41  ;;  %v271_v27 = vmul.f32 %v3868_v22, %v4099_v63 }
 0x113   :  { %v270_v57 = vadd.f32 %v266_v34, %v258_v18 }
 0x114   :  { %727 = vrot.lane.b32.xlu1 %v722_v40, %s3735_s15  ;;  %1010 = vrot.lane.b32.xlu0 %v1006_v52, %s3736_s16  ;;  %v189_v40 = vmul.f32 %v3883_v28, %v4099_v63  ;;  %v1183_v28 = vmul.f32 %v4139_v26, %v3932_v46 }
 0x115   :  { %v4236_v61 = vadd.f32 %v272_v45, %v270_v57  ;;  %v995_v45 = vmul.f32 %v4109_v2, %v3894_v32 }
 0x116   :  { %v182_v29 = vpop.permute.xlu1 %181  ;;  %v442_v1 = vpop.permute.xlu0 %441 }
 0x117   :  { %v187_v18 = vadd.f32 %v182_v29, %v175_v4  ;;  %v446_v34 = vadd.f32 %v442_v1, %v434_v60  ;;  %v340_v4 = vmul.f32 %v3868_v22, %v4113_v5  ;;  %v516_v60 = vmul.f32 %v3915_v39, %v4113_v5 }
 0x118   :  { %918 = vrot.lane.b32.xlu1 %v913_v7, %s3735_s15  ;;  %1106 = vrot.lane.b32.xlu0 %v1101_v9, %s3736_s16  ;;  %v598_v9 = vmul.f32 %v3926_v43, %v4113_v5 }
 0x119   :  { %v4251_v52 = vadd.f32 %v189_v40, %v187_v18  ;;  %v4253_v56 = vadd.f32 %v448_v19, %v446_v34  ;;  %v352_v41 = vadd.f32 %v4153_v36, %v340_v4  ;;  %v528_v1 = vadd.f32 %v4174_v0, %v516_v60 }
 0x11a   :  { %v264_v14 = vpop.permute.xlu1 %263  ;;  %v780_v57 = vpop.permute.xlu0 %779  ;;  %v1100_v40 = vmul.f32 %v4125_v13, %v3909_v38  ;;  %v222_v19 = vmul.f32 %v3868_v22, %v4054_v42  ;;  %v366_v36 = vmul.f32 %v3864_v21, %v4115_v6  ;;  %v542_v0 = vmul.f32 %v3926_v43, %v4115_v6 }
 0x11b   :  { %v269_v29 = vadd.f32 %v264_v14, %v257_v50 }
 0x11c   :  { %1000 = vrot.lane.b32.xlu1 %v995_v45, %s3735_s15  ;;  %1188 = vrot.lane.b32.xlu0 %v1183_v28, %s3736_s16  ;;  %v610_v45 = vadd.f32 %v4193_v37, %v598_v9 }
 0x11d   :  { %v4269_v7 = vadd.f32 %v271_v27, %v269_v29  ;;  %v1182_v27 = vmul.f32 %v4139_v26, %v3909_v38 }
 0x11e   :  { %v360_v18 = vpop.permute.xlu1 %359  ;;  %v536_v34 = vpop.permute.xlu0 %535 }
 0x11f   :  { %v364_v50 = vadd.f32 %v360_v18, %v352_v41  ;;  %v540_v14 = vadd.f32 %v536_v34, %v528_v1  ;;  %v304_v41 = vmul.f32 %v3864_v21, %v4054_v42  ;;  %v515_v1 = vmul.f32 %v3915_v39, %v4085_v55 }
 0x120   :  { %1104 = vrot.lane.b32.xlu1 %v1100_v40, %s3736_s16  ;;  %227 = vrot.lane.b32.xlu0 %v222_v19, %s3735_s15  ;;  %v624_v34 = vmul.f32 %v3970_v58, %v4115_v6 }
 0x121   :  { %v4284_v28 = vadd.f32 %v366_v36, %v364_v50  ;;  %v4286_v4 = vadd.f32 %v542_v0, %v540_v14  ;;  %v527_v37 = vadd.f32 %v4207_v35, %v515_v1  ;;  %v221_v50 = vmul.f32 %v3868_v22, %v4042_v33 }
 0x122   :  { %v698_v60 = vpop.permute.xlu1 %697  ;;  %v618_v29 = vpop.permute.xlu0 %617  ;;  %v409_v14 = vmul.f32 %v3915_v39, %v4062_v47  ;;  %v597_v36 = vmul.f32 %v3926_v43, %v4085_v55  ;;  %v773_v0 = vmul.f32 %v3954_v53, %v4085_v55  ;;  %v541_v35 = vmul.f32 %v3926_v43, %v4099_v63 }
 0x123   :  { %v622_v18 = vadd.f32 %v618_v29, %v610_v45 }
 0x124   :  { %1186 = vrot.lane.b32.xlu1 %v1182_v27, %s3736_s16  ;;  %309 = vrot.lane.b32.xlu0 %v304_v41, %s3735_s15  ;;  %v609_v29 = vadd.f32 %v4221_v15, %v597_v36  ;;  %v785_v27 = vadd.f32 %v780_v57, %v773_v0 }
 0x125   :  { %v4299_v9 = vadd.f32 %v624_v34, %v622_v18  ;;  %v303_v34 = vmul.f32 %v3864_v21, %v4042_v33 }
 0x126   :  { %v534_v40 = vpop.permute.xlu1 %533  ;;  %v456_v19 = vpop.permute.xlu0 %455 }
 0x127   :  { %v539_v45 = vadd.f32 %v534_v40, %v527_v37  ;;  %v491_v37 = vmul.f32 %v3926_v43, %v4062_v47 }
 0x128   :  { %225 = vrot.lane.b32.xlu1 %v221_v50, %s3735_s15  ;;  %413 = vrot.lane.b32.xlu0 %v409_v14, %s3736_s16  ;;  %v623_v50 = vmul.f32 %v3970_v58, %v4099_v63  ;;  %v799_v14 = vmul.f32 %v4077_v51, %v4099_v63 }
 0x129   :  { %v4314_v41 = vadd.f32 %v541_v35, %v539_v45  ;;  %v398_v45 = vmul.f32 %v3915_v39, %v4054_v42  ;;  %v1276_v35 = vmul.f32 %v4191_v30, %v3909_v38 }
 0x12a   :  { %v616_v1 = vpop.permute.xlu1 %615  ;;  %v792_v18 = vpop.permute.xlu0 %791 }
 0x12b   :  { %v621_v40 = vadd.f32 %v616_v1, %v609_v29  ;;  %v797_v24 = vadd.f32 %v792_v18, %v785_v27  ;;  %v691_v29 = vmul.f32 %v3970_v58, %v4085_v55 }
 0x12c   :  { %307 = vrot.lane.b32.xlu1 %v303_v34, %s3735_s15  ;;  %495 = vrot.lane.b32.xlu0 %v491_v37, %s3736_s16  ;;  %v1358_v34 = vmul.f32 %v4164_v44, %v3909_v38 }
 0x12d   :  { %v4326_v15 = vadd.f32 %v623_v50, %v621_v40  ;;  %v4328_v57 = vadd.f32 %v799_v14, %v797_v24  ;;  %v703_v27 = vadd.f32 %v698_v60, %v691_v29  ;;  %v480_v24 = vmul.f32 %v3926_v43, %v4054_v42 }
 0x12e   :  { %v374_v36 = vpop.permute.xlu1 %373  ;;  %v782_v0 = vpop.permute.xlu0 %781  ;;  %v717_v40 = vmul.f32 %v3954_v53, %v4099_v63  ;;  %v1440_v63 = vmul.f32 %v3850_v10, %v3876_v25 }
 0x12f   :  { %v379_v29 = vadd.f32 %v374_v36, %v4186_v17 }
 0x130   :  { %403 = vrot.lane.b32.xlu1 %v398_v45, %s3735_s15  ;;  %1280 = vrot.lane.b32.xlu0 %v1276_v35, %s3736_s16  ;;  %v1265_v45 = vmul.f32 %v4191_v30, %v3894_v32  ;;  %v574_v35 = vmul.f32 %v3970_v58, %v4054_v42 }
 0x132   :  { %v710_v1 = vpop.permute.xlu1 %709  ;;  %v200_v18 = vpop.permute.xlu0 %199 }
 0x133   :  { %v715_v37 = vadd.f32 %v710_v1, %v703_v27 }
 0x134   :  { %485 = vrot.lane.b32.xlu1 %v480_v24, %s3735_s15  ;;  %1362 = vrot.lane.b32.xlu0 %v1358_v34, %s3736_s16  ;;  %v1347_v24 = vmul.f32 %v4164_v44, %v3894_v32  ;;  %v656_v34 = vmul.f32 %v3954_v53, %v4054_v42  ;;  %v475_v42 = vmul.f32 %v3926_v43, %v4083_v54 }
 0x135   :  { %v4346_v50 = vadd.f32 %v717_v40, %v715_v37  ;;  %v393_v40 = vmul.f32 %v3915_v39, %v4083_v54 }
 0x136   :  { %v700_v14 = vpop.permute.xlu1 %699  ;;  %v282_v60 = vpop.permute.xlu0 %281 }
 0x138   :  { %1270 = vrot.lane.b32.xlu1 %v1265_v45, %s3735_s15  ;;  %579 = vrot.lane.b32.xlu0 %v574_v35, %s3735_s15  ;;  %v461_v45 = vadd.f32 %v456_v19, %v4205_v8 }
 0x13a   :  { %v4355_v27 = vpop.permute.xlu1 %197  ;;  %v386_v1 = vpop.permute.xlu0 %385 }
 0x13b   :  { %v391_v37 = vadd.f32 %v386_v1, %v379_v29  ;;  %v816_v29 = vmul.f32 %v4077_v51, %v4040_v31 }
 0x13c   :  { %1352 = vrot.lane.b32.xlu1 %v1347_v24, %s3735_s15  ;;  %661 = vrot.lane.b32.xlu0 %v656_v34, %s3735_s15  ;;  %v655_v34 = vmul.f32 %v3954_v53, %v4042_v33 }
 0x13d   :  { %v4366_v17 = vadd.f32 %v393_v40, %v391_v37  ;;  %v1007_v37 = vmul.f32 %v4109_v2, %v3932_v46 }
 0x13e   :  { %v4368_v36 = vpop.permute.xlu1 %279  ;;  %v468_v35 = vpop.permute.xlu0 %467 }
 0x13f   :  { %5886 = vst [vmem:[#allocation12_spill] sm:$0xff] %v4366_v17  ;;  %v473_v1 = vadd.f32 %v468_v35, %v461_v45  ;;  %v1522_v45 = vmul.f32 %v3855_v11, %v3876_v25  ;;  %v774_v35 = vmul.f32 %v3954_v53, %v4113_v5  ;;  %v234_v17 = vmul.f32 %v3868_v22, %v4071_v49 }
 0x140   :  { %577 = vrot.lane.b32.xlu1 %v573_v12, %s3735_s15  ;;  %821 = vrot.lane.b32.xlu0 %v816_v29, %s3736_s16 }
 0x141   :  { %v4378_v8 = vadd.f32 %v475_v42, %v473_v1  ;;  %v734_v42 = vmul.f32 %v3954_v53, %v4040_v31  ;;  %v786_v29 = vadd.f32 %v782_v0, %v774_v35  ;;  %v800_v31 = vmul.f32 %v4077_v51, %v4115_v6 }
 0x142   :  { %v4380_v19 = vpop.permute.xlu1 %375  ;;  %v4382_v24 = vpop.permute.xlu0 %551 }
 0x143   :  { %5887 = vst [vmem:[#allocation13_spill] sm:$0xff] %v4378_v8 }
 0x144   :  { %659 = vrot.lane.b32.xlu1 %v655_v34, %s3735_s15  ;;  %1012 = vrot.lane.b32.xlu0 %v1007_v37, %s3736_s16  ;;  %v925_v37 = vmul.f32 %v4134_v20, %v3932_v46 }
 0x146   :  { %v458_v40 = vpop.permute.xlu1 %457  ;;  %v4390_v12 = vpop.permute.xlu0 %633 }
 0x148   :  { %739 = vrot.lane.b32.xlu1 %v734_v42, %s3736_s16  ;;  %1526 = vrot.lane.b32.xlu0 %v1522_v45, %s3735_s15  ;;  %v204_v42 = vadd.f32 %v200_v18, %v4219_v16  ;;  %v286_v16 = vadd.f32 %v282_v60, %v4236_v61  ;;  %v203_v61 = vadd.f32 %v4355_v27, %v4251_v52 }
 0x149   :  { %v462_v60 = vadd.f32 %v458_v40, %v4253_v56  ;;  %v476_v52 = vmul.f32 %v3926_v43, %v4097_v62  ;;  %v285_v56 = vadd.f32 %v4368_v36, %v4269_v7  ;;  %v380_v7 = vadd.f32 %v4380_v19, %v4284_v28 }
 0x14a   :  { %v4400_v1 = vpop.permute.xlu1 %549  ;;  %v794_v34 = vpop.permute.xlu0 %793  ;;  %v556_v36 = vadd.f32 %v4382_v24, %v4286_v4  ;;  %v570_v28 = vmul.f32 %v3970_v58, %v4097_v62  ;;  %v638_v4 = vadd.f32 %v4390_v12, %v4299_v9 }
 0x14b   :  { %v798_v8 = vadd.f32 %v794_v34, %v786_v29  ;;  %v316_v29 = vmul.f32 %v3864_v21, %v4071_v49  ;;  %v692_v34 = vmul.f32 %v3970_v58, %v4113_v5  ;;  %v555_v9 = vadd.f32 %v4400_v1, %v4314_v41 }
 0x14c   :  { %930 = vrot.lane.b32.xlu1 %v925_v37, %s3736_s16  ;;  %239 = vrot.lane.b32.xlu0 %v234_v17, %s3736_s16  ;;  %v218_v17 = vmul.f32 %v3868_v22, %v4097_v62  ;;  %v233_v37 = vmul.f32 %v3868_v22, %v4062_v47 }
 0x14d   :  { %v4411_v0 = vadd.f32 %v800_v31, %v798_v8  ;;  %v704_v31 = vadd.f32 %v700_v14, %v692_v34  ;;  %v718_v14 = vmul.f32 %v3954_v53, %v4115_v6 }
 0x14e   :  { %v4413_v45 = vpop.permute.xlu1 %631  ;;  %v212_v35 = vpop.permute.xlu0 %211 }
 0x14f   :  { %5888 = vst [vmem:[#allocation14_spill] sm:$0xff] %v4411_v0  ;;  %v216_v20 = vadd.f32 %v212_v35, %v204_v42  ;;  %v492_v42 = vmul.f32 %v3926_v43, %v4071_v49  ;;  %v4434_v35 = vrot.slane %v4067_v48, %v3871_v23  ;;  %v1359_v43 = vmul.f32 %v4164_v44, %v3932_v46 }
 0x150   :  { %1444 = vrot.lane.b32.xlu1 %v1440_v63, %s3735_s15  ;;  %321 = vrot.lane.b32.xlu0 %v316_v29, %s3736_s16  ;;  %v637_v41 = vadd.f32 %v4413_v45, %v4326_v15 }
 0x151   :  { %v4426_v18 = vadd.f32 %v218_v17, %v216_v20  ;;  %v300_v20 = vmul.f32 %v3864_v21, %v4097_v62 }
 0x152   :  { %v712_v25 = vpop.permute.xlu1 %711  ;;  %v294_v8 = vpop.permute.xlu0 %293 }
 0x153   :  { %v716_v63 = vadd.f32 %v712_v25, %v704_v31  ;;  %v298_v0 = vadd.f32 %v294_v8, %v286_v16  ;;  %v315_v31 = vmul.f32 %v3864_v21, %v4062_v47  ;;  %v831_v16 = vmul.f32 %v4434_v35, %v4042_v33 }
 0x154   :  { %237 = vrot.lane.b32.xlu1 %v233_v37, %s3736_s16  ;;  %497 = vrot.lane.b32.xlu0 %v492_v42, %s3736_s16  ;;  %v217_v37 = vmul.f32 %v3868_v22, %v4083_v54  ;;  %v410_v22 = vmul.f32 %v3915_v39, %v4071_v49 }
 0x155   :  { %v4445_v29 = vadd.f32 %v718_v14, %v716_v63  ;;  %v4447_v48 = vadd.f32 %v300_v20, %v298_v0  ;;  %v299_v14 = vmul.f32 %v3864_v21, %v4083_v54  ;;  %v1523_v21 = vmul.f32 %v3855_v11, %v3894_v32 }
 0x156   :  { %v210_v34 = vpop.permute.xlu1 %209  ;;  %v470_v17 = vpop.permute.xlu0 %469 }
 0x157   :  { %v215_v25 = vadd.f32 %v210_v34, %v203_v61  ;;  %v474_v8 = vadd.f32 %v470_v17, %v462_v60  ;;  %v749_v34 = vmul.f32 %v4077_v51, %v4042_v33 }
 0x158   :  { %319 = vrot.lane.b32.xlu1 %v315_v31, %s3736_s16  ;;  %835 = vrot.lane.b32.xlu0 %v831_v16, %s3735_s15  ;;  %v394_v16 = vmul.f32 %v3915_v39, %v4097_v62  ;;  %v586_v39 = vmul.f32 %v3970_v58, %v4071_v49 }
 0x159   :  { %v4461_v27 = vadd.f32 %v217_v37, %v215_v25  ;;  %v4463_v40 = vadd.f32 %v476_v52, %v474_v8  ;;  %v1277_v37 = vmul.f32 %v4191_v30, %v3932_v46 }
 0x15a   :  { %v292_v0 = vpop.permute.xlu1 %291  ;;  %v4465_v42 = vpop.permute.xlu0 %807 }
 0x15b   :  { %v297_v63 = vadd.f32 %v292_v0, %v285_v56  ;;  %v652_v56 = vmul.f32 %v3954_v53, %v4097_v62 }
 0x15c   :  { %415 = vrot.lane.b32.xlu1 %v410_v22, %s3736_s16  ;;  %1364 = vrot.lane.b32.xlu0 %v1359_v43, %s3736_s16  ;;  %v1441_v43 = vmul.f32 %v3850_v10, %v3894_v32  ;;  %v585_v32 = vmul.f32 %v3970_v58, %v4062_v47 }
 0x15d   :  { %v4479_v20 = vadd.f32 %v299_v14, %v297_v63  ;;  %v668_v63 = vmul.f32 %v3954_v53, %v4071_v49 }
 0x15e   :  { %v388_v61 = vpop.permute.xlu1 %387  ;;  %v564_v60 = vpop.permute.xlu0 %563 }
 0x15f   :  { %v392_v17 = vadd.f32 %v388_v61, %v380_v7  ;;  %v568_v31 = vadd.f32 %v564_v60, %v556_v36  ;;  %v569_v7 = vmul.f32 %v3970_v58, %v4083_v54  ;;  %v1022_v60 = vmul.f32 %v4125_v13, %v3974_v59 }
 0x160   :  { %753 = vrot.lane.b32.xlu1 %v749_v34, %s3735_s15  ;;  %1528 = vrot.lane.b32.xlu0 %v1523_v21, %s3735_s15  ;;  %v651_v21 = vmul.f32 %v3954_v53, %v4083_v54  ;;  %v1117_v58 = vmul.f32 %v4139_v26, %v3996_v3 }
 0x161   :  { %v4493_v19 = vadd.f32 %v394_v16, %v392_v17  ;;  %v4495_v24 = vadd.f32 %v570_v28, %v568_v31  ;;  %v667_v31 = vmul.f32 %v3954_v53, %v4062_v47  ;;  %v813_v53 = vadd.f32 %v4465_v42, %v4328_v57 }
 0x162   :  { %v726_v25 = vpop.permute.xlu1 %725  ;;  %v646_v8 = vpop.permute.xlu0 %645 }
 0x163   :  { %v650_v52 = vadd.f32 %v646_v8, %v638_v4  ;;  %v940_v4 = vmul.f32 %v4109_v2, %v3974_v59  ;;  %v1199_v8 = vmul.f32 %v4191_v30, %v3996_v3 }
 0x164   :  { %1282 = vrot.lane.b32.xlu1 %v1277_v37, %s3736_s16  ;;  %591 = vrot.lane.b32.xlu0 %v586_v39, %s3736_s16 }
 0x165   :  { %v4507_v12 = vadd.f32 %v652_v56, %v650_v52  ;;  %v1116_v52 = vmul.f32 %v4139_v26, %v3974_v59  ;;  %v1534_v56 = vmul.f32 %v3855_v11, %v3909_v38 }
 0x166   :  { %v562_v0 = vpop.permute.xlu1 %561  ;;  %v4509_v22 = vpop.permute.xlu0 %998 }
 0x167   :  { %v567_v14 = vadd.f32 %v562_v0, %v555_v9  ;;  %v827_v0 = vmul.f32 %v4434_v35, %v4083_v54 }
 0x168   :  { %1446 = vrot.lane.b32.xlu1 %v1441_v43, %s3735_s15  ;;  %673 = vrot.lane.b32.xlu0 %v668_v63, %s3736_s16  ;;  %v1198_v63 = vmul.f32 %v4191_v30, %v3974_v59 }
 0x169   :  { %v4521_v1 = vadd.f32 %v569_v7, %v567_v14  ;;  %v843_v14 = vmul.f32 %v4434_v35, %v4062_v47  ;;  %v731_v7 = vadd.f32 %v726_v25, %v4346_v50 }
 0x16a   :  { %v644_v36 = vpop.permute.xlu1 %643  ;;  %v4523_v61 = vpop.permute.xlu0 %1094 }
 0x16b   :  { %5889 = vst [vmem:[#allocation15_spill] sm:$0xff] %v4523_v61  ;;  %v649_v34 = vadd.f32 %v644_v36, %v637_v41  ;;  %v828_v61 = vmul.f32 %v4434_v35, %v4097_v62 }
 0x16c   :  { %589 = vrot.lane.b32.xlu1 %v585_v32, %s3736_s16  ;;  %1026 = vrot.lane.b32.xlu0 %v1022_v60, %s3735_s15  ;;  %v1452_v32 = vmul.f32 %v3850_v10, %v3909_v38  ;;  %v1374_v60 = vmul.f32 %v3850_v10, %v3974_v59 }
 0x16d   :  { %v4533_v15 = vadd.f32 %v651_v21, %v649_v34  ;;  %v5891_v34 = vld [vmem:[#allocation11_spill] sm:$0xff] }
 0x16e   :  { %v917_v45 = vpop.permute.xlu1 %916  ;;  %v1177_v17 = vpop.permute.xlu0 %1176  ;;  %v910_v21 = vmul.f32 %v5891_v34, %v4085_v55 }
 0x170   :  { %671 = vrot.lane.b32.xlu1 %v667_v31, %s3736_s16  ;;  %1122 = vrot.lane.b32.xlu0 %v1117_v58, %s3735_s15  ;;  %v745_v58 = vmul.f32 %v4077_v51, %v4083_v54  ;;  %v922_v50 = vadd.f32 %v917_v45, %v910_v21  ;;  %v5896_v21 = vld [vmem:[#allocation6_spill] sm:$0xff]  ;;  %v1293_v54 = vmul.f32 %v4164_v44, %v3996_v3 }
 0x172   :  { %v4541_v16 = vpop.permute.xlu1 %1092  ;;  %v4543_v28 = vpop.permute.xlu0 %483 }
 0x173   :  { %5890 = vst [vmem:[#allocation16_spill] sm:$0xff] %v4541_v16 }
 0x174   :  { %944 = vrot.lane.b32.xlu1 %v940_v4, %s3735_s15  ;;  %1204 = vrot.lane.b32.xlu0 %v1199_v8, %s3735_s15  ;;  %v761_v8 = vmul.f32 %v4077_v51, %v4062_v47 }
 0x176   :  { %v4553_v37 = vpop.permute.xlu1 %1174  ;;  %v820_v39 = vpop.permute.xlu0 %819 }
 0x177   :  { %v825_v9 = vadd.f32 %v820_v39, %v813_v53  ;;  %v1535_v53 = vmul.f32 %v3855_v11, %v3932_v46 }
 0x178   :  { %1120 = vrot.lane.b32.xlu1 %v1116_v52, %s3735_s15  ;;  %1538 = vrot.lane.b32.xlu0 %v1534_v56, %s3736_s16  ;;  %v5892_v52 = vld [vmem:[#allocation10_spill] sm:$0xff] }
 0x179   :  { %v4563_v43 = vadd.f32 %v827_v0, %v825_v9  ;;  %v936_v56 = vmul.f32 %v4109_v2, %v5892_v52 }
 0x17a   :  { %v4565_v57 = vpop.permute.xlu1 %401  ;;  %v4567_v42 = vpop.permute.xlu0 %1350 }
 0x17c   :  { %1202 = vrot.lane.b32.xlu1 %v1198_v63, %s3735_s15  ;;  %847 = vrot.lane.b32.xlu0 %v843_v14, %s3736_s16  ;;  %v1292_v63 = vmul.f32 %v4164_v44, %v3974_v59  ;;  %v5894_v14 = vld [vmem:[#allocation8_spill] sm:$0xff] }
 0x17e   :  { %v738_v41 = vpop.permute.xlu1 %737  ;;  %v4576_v36 = vpop.permute.xlu0 %809 }
 0x17f   :  { %v743_v31 = vadd.f32 %v738_v41, %v731_v7  ;;  %v832_v7 = vmul.f32 %v4434_v35, %v5894_v14 }
 0x180   :  { %1456 = vrot.lane.b32.xlu1 %v1452_v32, %s3736_s16  ;;  %1378 = vrot.lane.b32.xlu0 %v1374_v60, %s3735_s15  ;;  %v1453_v60 = vmul.f32 %v3850_v10, %v3932_v46  ;;  %v1034_v46 = vmul.f32 %v4125_v13, %v5896_v21 }
 0x181   :  { %v4588_v25 = vadd.f32 %v745_v58, %v743_v31  ;;  %v952_v31 = vmul.f32 %v4109_v2, %v5896_v21  ;;  %v1169_v58 = vmul.f32 %v4139_v26, %v4113_v5 }
 0x182   :  { %v4590_v4 = vpop.permute.xlu1 %1268  ;;  %v929_v38 = vpop.permute.xlu0 %928 }
 0x183   :  { %v934_v39 = vadd.f32 %v929_v38, %v922_v50  ;;  %v1181_v50 = vadd.f32 %v1177_v17, %v1169_v58 }
 0x184   :  { %765 = vrot.lane.b32.xlu1 %v761_v8, %s3736_s16  ;;  %1540 = vrot.lane.b32.xlu0 %v1535_v53, %s3736_s16  ;;  %v750_v53 = vmul.f32 %v4077_v51, %v5894_v14 }
 0x185   :  { %v4600_v45 = vadd.f32 %v936_v56, %v934_v39  ;;  %v1195_v56 = vmul.f32 %v4191_v30, %v4115_v6 }
 0x186   :  { %v4602_v9 = vpop.permute.xlu1 %727  ;;  %v4604_v0 = vpop.permute.xlu0 %1010 }
 0x187   :  { %5893 = vst [vmem:[#allocation11_spill] sm:$0xff] %v4600_v45 }
 0x188   :  { %1296 = vrot.lane.b32.xlu1 %v1292_v63, %s3735_s15  ;;  %837 = vrot.lane.b32.xlu0 %v832_v7, %s3735_s15 }
 0x18a   :  { %v4612_v41 = vpop.permute.xlu1 %918  ;;  %v4614_v32 = vpop.permute.xlu0 %1106 }
 0x18b   :  { %5895 = vst [vmem:[#allocation10_spill] sm:$0xff] %v4614_v32  ;;  %v844_v32 = vmul.f32 %v4434_v35, %v4071_v49  ;;  %v732_v35 = vadd.f32 %v4602_v9, %v4445_v29 }
 0x18c   :  { %1458 = vrot.lane.b32.xlu1 %v1453_v60, %s3736_s16  ;;  %956 = vrot.lane.b32.xlu0 %v952_v31, %s3736_s16  ;;  %v941_v60 = vmul.f32 %v4109_v2, %v3996_v3  ;;  %v5900_v31 = vld [vmem:[#allocation7_spill] sm:$0xff] }
 0x18d   :  { %v1129_v58 = vmul.f32 %v4139_v26, %v5900_v31 }
 0x18e   :  { %v4624_v38 = vpop.permute.xlu1 %1000  ;;  %v1189_v8 = vpop.permute.xlu0 %1188 }
 0x18f   :  { %5897 = vst [vmem:[#allocation8_spill] sm:$0xff] %v4624_v38  ;;  %v1193_v39 = vadd.f32 %v1189_v8, %v1181_v50  ;;  %v1168_v50 = vmul.f32 %v4139_v26, %v4085_v55  ;;  %v1194_v38 = vmul.f32 %v4191_v30, %v5892_v52 }
 0x190   :  { %755 = vrot.lane.b32.xlu1 %v750_v53, %s3735_s15  ;;  %1038 = vrot.lane.b32.xlu0 %v1034_v46, %s3736_s16 }
 0x191   :  { %v4634_v63 = vadd.f32 %v1195_v56, %v1193_v39  ;;  %v1180_v8 = vadd.f32 %v4553_v37, %v1168_v50  ;;  %v1023_v39 = vmul.f32 %v4125_v13, %v3996_v3  ;;  %v1211_v56 = vmul.f32 %v4191_v30, %v5900_v31 }
 0x192   :  { %v4636_v17 = vpop.permute.xlu1 %1104  ;;  %v4638_v7 = vpop.permute.xlu0 %227  ;;  %v1128_v50 = vmul.f32 %v4139_v26, %v5896_v21 }
 0x193   :  { %5898 = vst [vmem:[#allocation6_spill] sm:$0xff] %v4634_v63  ;;  %5899 = vst [vmem:[#allocation17_spill] sm:$0xff] %v4636_v17  ;;  %v1304_v63 = vmul.f32 %v4164_v44, %v5896_v21  ;;  %v1386_v17 = vmul.f32 %v3850_v10, %v5896_v21 }
 0x194   :  { %946 = vrot.lane.b32.xlu1 %v941_v60, %s3735_s15  ;;  %1134 = vrot.lane.b32.xlu0 %v1129_v58, %s3736_s16 }
 0x196   :  { %v1187_v53 = vpop.permute.xlu1 %1186  ;;  %v4649_v46 = vpop.permute.xlu0 %309 }
 0x197   :  { %v1192_v45 = vadd.f32 %v1187_v53, %v1180_v8  ;;  %v5902_v8 = vld [vmem:[#allocation13_spill] sm:$0xff] }
 0x198   :  { %1028 = vrot.lane.b32.xlu1 %v1023_v39, %s3735_s15  ;;  %1216 = vrot.lane.b32.xlu0 %v1211_v56, %s3736_s16  ;;  %v489_v53 = vadd.f32 %v4543_v28, %v5902_v8  ;;  %v5903_v39 = vld [vmem:[#allocation12_spill] sm:$0xff] }
 0x199   :  { %v4659_v60 = vadd.f32 %v1194_v38, %v1192_v45  ;;  %v407_v45 = vadd.f32 %v4565_v57, %v5903_v39 }
 0x19a   :  { %v4661_v37 = vpop.permute.xlu1 %225  ;;  %v414_v58 = vpop.permute.xlu0 %413 }
 0x19b   :  { %5901 = vst [vmem:[#allocation7_spill] sm:$0xff] %v4659_v60  ;;  %v1210_v60 = vmul.f32 %v4191_v30, %v5896_v21  ;;  %v419_v16 = vadd.f32 %v414_v58, %v407_v45  ;;  %v4695_v58 = vld [vmem:[%s5851_s0 + $0x18] sm:$0x7]  ;;  %v5906_v45 = vld [vmem:[#allocation5_spill] sm:$0xff] }
 0x19c   :  { %1132 = vrot.lane.b32.xlu1 %v1128_v50, %s3736_s16  ;;  %1308 = vrot.lane.b32.xlu0 %v1304_v63, %s3736_s16  ;;  %v1262_v50 = vmul.f32 %v4191_v30, %v4085_v55 }
 0x19e   :  { %v4673_v38 = vpop.permute.xlu1 %307  ;;  %v496_v56 = vpop.permute.xlu0 %495  ;;  %v1274_v28 = vadd.f32 %v4590_v4, %v1262_v50 }
 0x19f   :  { %v501_v63 = vadd.f32 %v496_v56, %v489_v53  ;;  %v4708_v56 = vrot.slane %v4695_v58, %v5906_v45 }
 0x1a0   :  { %1214 = vrot.lane.b32.xlu1 %v1210_v60, %s3736_s16  ;;  %1390 = vrot.lane.b32.xlu0 %v1386_v17, %s3736_s16  ;;  %v1344_v17 = vmul.f32 %v4164_v44, %v4085_v55 }
 0x1a1   :  { %v4684_v57 = vmax.f32 %v419_v16, %v501_v63  ;;  %v1288_v16 = vmul.f32 %v4164_v44, %v5892_v52  ;;  %v1550_v45 = vmul.f32 %v4708_v56, %v3974_v59 }
 0x1a2   :  { %v4686_v8 = vpop.permute.xlu1 %403  ;;  %v1281_v39 = vpop.permute.xlu0 %1280  ;;  %v1356_v60 = vadd.f32 %v4567_v42, %v1344_v17 }
 0x1a3   :  { %5904 = vst [vmem:[#allocation13_spill] sm:$0xff] %v4684_v57  ;;  %v1286_v4 = vadd.f32 %v1281_v39, %v1274_v28  ;;  %v1375_v28 = vmul.f32 %v3850_v10, %v3996_v3  ;;  %v1035_v39 = vmul.f32 %v4125_v13, %v5900_v31 }
 0x1a4   :  { %1298 = vrot.lane.b32.xlu1 %v1293_v54, %s3735_s15  ;;  %849 = vrot.lane.b32.xlu0 %v844_v32, %s3736_s16  ;;  %v1370_v32 = vmul.f32 %v3850_v10, %v5892_v52 }
 0x1a5   :  { %v4704_v53 = vadd.f32 %v1288_v16, %v1286_v4  ;;  %v762_v16 = vmul.f32 %v4077_v51, %v4071_v49 }
 0x1a6   :  { %v4710_v50 = vpop.permute.xlu1 %485  ;;  %v1363_v63 = vpop.permute.xlu0 %1362 }
 0x1a7   :  { %5905 = vst [vmem:[#allocation12_spill] sm:$0xff] %v4704_v53  ;;  %v1368_v54 = vadd.f32 %v1363_v63, %v1356_v60  ;;  %v1551_v53 = vmul.f32 %v4708_v56, %v3996_v3 }
 0x1a8   :  { %1380 = vrot.lane.b32.xlu1 %v1375_v28, %s3735_s15  ;;  %1040 = vrot.lane.b32.xlu0 %v1035_v39, %s3736_s16  ;;  %v953_v28 = vmul.f32 %v4109_v2, %v5900_v31  ;;  %v1387_v39 = vmul.f32 %v3850_v10, %v5900_v31 }
 0x1a9   :  { %v4720_v42 = vadd.f32 %v1370_v32, %v1368_v54  ;;  %v5908_v54 = vld [vmem:[#allocation14_spill] sm:$0xff] }
 0x1aa   :  { %v4722_v17 = vpop.permute.xlu1 %1270  ;;  %v4724_v4 = vpop.permute.xlu0 %579  ;;  %v814_v32 = vadd.f32 %v4576_v36, %v5908_v54  ;;  %v1050_v54 = vmul.f32 %v4139_v26, %v4042_v33 }
 0x1ab   :  { %5907 = vst [vmem:[#allocation5_spill] sm:$0xff] %v4720_v42  ;;  %v1468_v42 = vmul.f32 %v3855_v11, %v3974_v59  ;;  %v1305_v59 = vmul.f32 %v4164_v44, %v5900_v31 }
 0x1ac   :  { %767 = vrot.lane.b32.xlu1 %v762_v16, %s3736_s16  ;;  %1554 = vrot.lane.b32.xlu0 %v1550_v45, %s3735_s15 }
 0x1ae   :  { %v4732_v60 = vpop.permute.xlu1 %1352  ;;  %v4734_v63 = vpop.permute.xlu0 %661 }
 0x1b0   :  { %958 = vrot.lane.b32.xlu1 %v953_v28, %s3736_s16  ;;  %1392 = vrot.lane.b32.xlu0 %v1387_v39, %s3736_s16 }
 0x1b2   :  { %v4744_v16 = vpop.permute.xlu1 %577  ;;  %v822_v45 = vpop.permute.xlu0 %821 }
 0x1b3   :  { %v826_v57 = vadd.f32 %v822_v45, %v814_v32  ;;  %v911_v32 = vmul.f32 %v5891_v34, %v4113_v5  ;;  %v1227_v34 = vmul.f32 %v4164_v44, %v5894_v14 }
 0x1b4   :  { %1472 = vrot.lane.b32.xlu1 %v1468_v42, %s3735_s15  ;;  %1556 = vrot.lane.b32.xlu0 %v1551_v53, %s3735_s15  ;;  %v1145_v42 = vmul.f32 %v4191_v30, %v5894_v14 }
 0x1b5   :  { %v4754_v28 = vadd.f32 %v828_v61, %v826_v57  ;;  %v1469_v57 = vmul.f32 %v3855_v11, %v3996_v3  ;;  %v923_v29 = vadd.f32 %v4612_v41, %v911_v32  ;;  %v232_v41 = vadd.f32 %v4638_v7, %v4426_v18 }
 0x1b6   :  { %v4756_v36 = vpop.permute.xlu1 %659  ;;  %v4758_v39 = vpop.permute.xlu0 %1012 }
 0x1b7   :  { %5909 = vst [vmem:[#allocation14_spill] sm:$0xff] %v4754_v28  ;;  %v968_v28 = vmul.f32 %v4125_v13, %v4042_v33 }
 0x1b8   :  { %1310 = vrot.lane.b32.xlu1 %v1305_v59, %s3736_s16  ;;  %1054 = vrot.lane.b32.xlu0 %v1050_v54, %s3735_s15  ;;  %v746_v59 = vmul.f32 %v4077_v51, %v4097_v62  ;;  %v937_v51 = vmul.f32 %v4109_v2, %v4115_v6 }
 0x1ba   :  { %v740_v53 = vpop.permute.xlu1 %739  ;;  %v4768_v61 = vpop.permute.xlu0 %1526 }
 0x1bb   :  { %v744_v45 = vadd.f32 %v740_v53, %v732_v35  ;;  %v314_v53 = vadd.f32 %v4649_v46, %v4447_v48  ;;  %v1226_v46 = vmul.f32 %v4164_v44, %v4042_v33 }
 0x1bc   :  { %1474 = vrot.lane.b32.xlu1 %v1469_v57, %s3735_s15  ;;  %1150 = vrot.lane.b32.xlu0 %v1145_v42, %s3735_s15 }
 0x1bd   :  { %v4781_v9 = vadd.f32 %v746_v59, %v744_v45  ;;  %v1144_v45 = vmul.f32 %v4191_v30, %v4042_v33  ;;  %v1562_v59 = vmul.f32 %v4708_v56, %v5896_v21 }
 0x1be   :  { %v931_v54 = vpop.permute.xlu1 %930  ;;  %v240_v3 = vpop.permute.xlu0 %239 }
 0x1bf   :  { %v935_v35 = vadd.f32 %v931_v54, %v923_v29  ;;  %v1402_v54 = vmul.f32 %v3855_v11, %v4042_v33 }
 0x1c0   :  { %972 = vrot.lane.b32.xlu1 %v968_v28, %s3735_s15  ;;  %1232 = vrot.lane.b32.xlu0 %v1227_v34, %s3735_s15  ;;  %v244_v28 = vadd.f32 %v240_v3, %v232_v41  ;;  %v231_v3 = vadd.f32 %v4661_v37, %v4461_v27  ;;  %v313_v34 = vadd.f32 %v4673_v38, %v4479_v20 }
 0x1c1   :  { %v4795_v57 = vadd.f32 %v937_v51, %v935_v35  ;;  %v1480_v41 = vmul.f32 %v3855_v11, %v5896_v21  ;;  %v408_v27 = vadd.f32 %v4686_v8, %v4493_v19  ;;  %v490_v20 = vadd.f32 %v4710_v50, %v4463_v40 }
 0x1c2   :  { %v4797_v42 = vpop.permute.xlu1 %1444  ;;  %v322_v32 = vpop.permute.xlu0 %321  ;;  %v1371_v19 = vmul.f32 %v3850_v10, %v4115_v6 }
 0x1c3   :  { %v326_v29 = vadd.f32 %v322_v32, %v314_v53  ;;  %v1563_v53 = vmul.f32 %v4708_v56, %v5900_v31  ;;  %v1345_v32 = vmul.f32 %v4164_v44, %v4113_v5 }
 0x1c4   :  { %1148 = vrot.lane.b32.xlu1 %v1144_v45, %s3735_s15  ;;  %1566 = vrot.lane.b32.xlu0 %v1562_v59, %s3736_s16 }
 0x1c5   :  { %v4805_v18 = vmax.f32 %v244_v28, %v326_v29  ;;  %v1357_v21 = vadd.f32 %v4732_v60, %v1345_v32  ;;  %v1320_v29 = vmul.f32 %v3850_v10, %v4042_v33 }
 0x1c6   :  { %v238_v48 = vpop.permute.xlu1 %237  ;;  %v498_v7 = vpop.permute.xlu0 %497 }
 0x1c7   :  { %v243_v45 = vadd.f32 %v238_v48, %v231_v3  ;;  %v980_v48 = vmul.f32 %v4125_v13, %v4062_v47 }
 0x1c8   :  { %1230 = vrot.lane.b32.xlu1 %v1226_v46, %s3735_s15  ;;  %1406 = vrot.lane.b32.xlu0 %v1402_v54, %s3735_s15  ;;  %v502_v46 = vadd.f32 %v498_v7, %v490_v20  ;;  %v1481_v7 = vmul.f32 %v3855_v11, %v5900_v31  ;;  %v1157_v31 = vmul.f32 %v4191_v30, %v4071_v49 }
 0x1c9   :  { %v584_v20 = vadd.f32 %v4724_v4, %v4495_v24 }
 0x1ca   :  { %v320_v35 = vpop.permute.xlu1 %319  ;;  %v4817_v51 = vpop.permute.xlu0 %835 }
 0x1cb   :  { %v325_v59 = vadd.f32 %v320_v35, %v313_v34  ;;  %v1062_v34 = vmul.f32 %v4139_v26, %v4062_v47  ;;  %v1263_v35 = vmul.f32 %v4191_v30, %v4113_v5 }
 0x1cc   :  { %1484 = vrot.lane.b32.xlu1 %v1480_v41, %s3736_s16  ;;  %1568 = vrot.lane.b32.xlu0 %v1563_v53, %s3736_s16 }
 0x1cd   :  { %v4832_v37 = vmax.f32 %v243_v45, %v325_v59  ;;  %v1275_v41 = vadd.f32 %v4722_v17, %v1263_v35  ;;  %v969_v45 = vmul.f32 %v4125_v13, %v5894_v14  ;;  %v666_v17 = vadd.f32 %v4734_v63, %v4507_v12 }
 0x1ce   :  { %v416_v38 = vpop.permute.xlu1 %415  ;;  %v1365_v28 = vpop.permute.xlu0 %1364  ;;  %v1156_v63 = vmul.f32 %v4191_v30, %v4062_v47 }
 0x1cf   :  { %v420_v54 = vadd.f32 %v416_v38, %v408_v27  ;;  %v1369_v3 = vadd.f32 %v1365_v28, %v1357_v21  ;;  %v1289_v27 = vmul.f32 %v4164_v44, %v4115_v6 }
 0x1d0   :  { %1324 = vrot.lane.b32.xlu1 %v1320_v29, %s3735_s15  ;;  %984 = vrot.lane.b32.xlu0 %v980_v48, %s3736_s16  ;;  %v1051_v29 = vmul.f32 %v4139_v26, %v5894_v14  ;;  %v1239_v48 = vmul.f32 %v4164_v44, %v4071_v49 }
 0x1d1   :  { %v4842_v40 = vmax.f32 %v420_v54, %v502_v46  ;;  %v4844_v8 = vadd.f32 %v1371_v19, %v1369_v3  ;;  %v1332_v3 = vmul.f32 %v3850_v10, %v4062_v47  ;;  %v583_v19 = vadd.f32 %v4744_v16, %v4521_v1 }
 0x1d2   :  { %v4846_v50 = vpop.permute.xlu1 %753  ;;  %v4848_v60 = vpop.permute.xlu0 %1528  ;;  %v1321_v16 = vmul.f32 %v3850_v10, %v5894_v14 }
 0x1d4   :  { %1486 = vrot.lane.b32.xlu1 %v1481_v7, %s3736_s16  ;;  %1066 = vrot.lane.b32.xlu0 %v1062_v34, %s3736_s16  ;;  %v665_v7 = vadd.f32 %v4756_v36, %v4533_v15  ;;  %v1063_v36 = vmul.f32 %v4139_v26, %v4071_v49 }
 0x1d6   :  { %v1283_v53 = vpop.permute.xlu1 %1282  ;;  %v592_v32 = vpop.permute.xlu0 %591 }
 0x1d7   :  { %v1287_v59 = vadd.f32 %v1283_v53, %v1275_v41  ;;  %v596_v46 = vadd.f32 %v592_v32, %v584_v20  ;;  %v1238_v41 = vmul.f32 %v4164_v44, %v4062_v47  ;;  %v1414_v53 = vmul.f32 %v3855_v11, %v4062_v47 }
 0x1d8   :  { %974 = vrot.lane.b32.xlu1 %v969_v45, %s3735_s15  ;;  %1162 = vrot.lane.b32.xlu0 %v1157_v31, %s3736_s16 }
 0x1d9   :  { %v4871_v21 = vadd.f32 %v1289_v27, %v1287_v59  ;;  %v4915_v59 = vrot.slane %v4695_v58, %v3871_v23  ;;  %v1520_v27 = vmul.f32 %v3855_v11, %v4085_v55  ;;  %v1546_v58 = vmul.f32 %v4708_v56, %v5892_v52 }
 0x1da   :  { %v4873_v38 = vpop.permute.xlu1 %1446  ;;  %v674_v28 = vpop.permute.xlu0 %673 }
 0x1db   :  { %v678_v54 = vadd.f32 %v674_v28, %v666_v17  ;;  %v1532_v20 = vadd.f32 %v4768_v61, %v1520_v27 }
 0x1dc   :  { %1056 = vrot.lane.b32.xlu1 %v1051_v29, %s3735_s15  ;;  %1244 = vrot.lane.b32.xlu0 %v1239_v48, %s3736_s16  ;;  %v1403_v29 = vmul.f32 %v3855_v11, %v5894_v14  ;;  %v1578_v48 = vmul.f32 %v4915_v59, %v4042_v33 }
 0x1dd   :  { %v4881_v24 = vmax.f32 %v596_v46, %v678_v54 }
 0x1de   :  { %v590_v12 = vpop.permute.xlu1 %589  ;;  %v4883_v4 = vpop.permute.xlu0 %1026 }
 0x1df   :  { %v595_v32 = vadd.f32 %v590_v12, %v583_v19  ;;  %v981_v12 = vmul.f32 %v4125_v13, %v4071_v49  ;;  %v1663_v19 = vld [vmem:[%s5856_s5] sm:$0xff] }
 0x1e0   :  { %1160 = vrot.lane.b32.xlu1 %v1156_v63, %s3736_s16  ;;  %1336 = vrot.lane.b32.xlu0 %v1332_v3, %s3736_s16  ;;  %v1415_v63 = vmul.f32 %v3855_v11, %v4071_v49  ;;  %v1438_v3 = vmul.f32 %v3850_v10, %v4085_v55 }
 0x1e2   :  { %v672_v34 = vpop.permute.xlu1 %671  ;;  %v4895_v35 = vpop.permute.xlu0 %1122 }
 0x1e3   :  { %v677_v45 = vadd.f32 %v672_v34, %v665_v7  ;;  %v1664_v7 = vld [vmem:[%s5856_s5 + $0x8] sm:$0xff] }
 0x1e4   :  { %1242 = vrot.lane.b32.xlu1 %v1238_v41, %s3736_s16  ;;  %1418 = vrot.lane.b32.xlu0 %v1414_v53, %s3736_s16  ;;  %v3307_v34 = vpack.c.bf16 %v1664_v7, %v1663_v19  ;;  %v1450_v41 = vadd.f32 %v4797_v42, %v1438_v3  ;;  %v841_v42 = vadd.f32 %v4817_v51, %v4563_v43 }
 0x1e5   :  { %v4903_v31 = vmax.f32 %v595_v32, %v677_v45  ;;  %v1496_v45 = vmul.f32 %v4708_v56, %v4042_v33  ;;  %v759_v33 = vadd.f32 %v4846_v50, %v4588_v25  ;;  %v1333_v25 = vmul.f32 %v3850_v10, %v4071_v49 }
 0x1e6   :  { %v4905_v1 = vpop.permute.xlu1 %944  ;;  %v4907_v15 = vpop.permute.xlu0 %1204  ;;  %3308 = vmatprep.subr.bf16.mxu0 %v3307_v34  ;;  %v1590_v51 = vmul.f32 %v4915_v59, %v4062_v47  ;;  %v1547_v19 = vmul.f32 %v4708_v56, %v4115_v6 }
 0x1e7   :  { %3310 = vmatpush3.bf16.msra.mxu0 %v3307_v34 }
 0x1e8   :  { %1326 = vrot.lane.b32.xlu1 %v1321_v16, %s3735_s15  ;;  %1068 = vrot.lane.b32.xlu0 %v1063_v36, %s3736_s16  ;;  %v1579_v16 = vmul.f32 %v4915_v59, %v5894_v14  ;;  %v1521_v36 = vmul.f32 %v3855_v11, %v4113_v5 }
 0x1ea   :  { %v4922_v17 = vpop.permute.xlu1 %1120  ;;  %v1539_v28 = vpop.permute.xlu0 %1538 }
 0x1eb   :  { %v1544_v23 = vadd.f32 %v1539_v28, %v1532_v20  ;;  %v1464_v20 = vmul.f32 %v3855_v11, %v5892_v52  ;;  %v1533_v28 = vadd.f32 %v4848_v60, %v1521_v36  ;;  %v1591_v36 = vmul.f32 %v4915_v59, %v4071_v49 }
 0x1ec   :  { %1408 = vrot.lane.b32.xlu1 %v1403_v29, %s3735_s15  ;;  %1582 = vrot.lane.b32.xlu0 %v1578_v48, %s3735_s15  ;;  %v1665_v48 = vld [vmem:[%s5856_s5 + $0x10] sm:$0xff] }
 0x1ed   :  { %v4932_v46 = vadd.f32 %v1546_v58, %v1544_v23  ;;  %v1666_v23 = vld [vmem:[%s5856_s5 + $0x18] sm:$0xff]  ;;  %v992_v58 = vmul.f32 %v4109_v2, %v4085_v55 }
 0x1ee   :  { %v4934_v61 = vpop.permute.xlu1 %1202  ;;  %v848_v54 = vpop.permute.xlu0 %847  ;;  %v3311_v50 = vpack.c.bf16 %v1666_v23, %v1665_v48  ;;  %v1018_v23 = vmul.f32 %v4125_v13, %v5892_v52 }
 0x1ef   :  { %v853_v60 = vadd.f32 %v848_v54, %v841_v42  ;;  %v1004_v7 = vadd.f32 %v4509_v22, %v992_v58  ;;  %v1667_v54 = vld [vmem:[%s5856_s5 + $0x20] sm:$0xff]  ;;  %v1497_v22 = vmul.f32 %v4708_v56, %v5894_v14 }
 0x1f0   :  { %986 = vrot.lane.b32.xlu1 %v981_v12, %s3736_s16  ;;  %1420 = vrot.lane.b32.xlu0 %v1415_v63, %s3736_s16 }
 0x1f1   :  { %3312 = vmatprep.subr.bf16.mxu0 %v3311_v50  ;;  %v1016_v42 = vadd.f32 %v4604_v0, %v1004_v7  ;;  %v1508_v0 = vmul.f32 %v4708_v56, %v4062_v47  ;;  %v1113_v7 = vmul.f32 %v4139_v26, %v4115_v6 }
 0x1f2   :  { %v1457_v53 = vpop.permute.xlu1 %1456  ;;  %v4951_v32 = vpop.permute.xlu0 %1378  ;;  %3314 = vmatpush3.bf16.msra.mxu0 %v3311_v50 }
 0x1f3   :  { %v1462_v27 = vadd.f32 %v1457_v53, %v1450_v41  ;;  %v1668_v53 = vld [vmem:[%s5856_s5 + $0x28] sm:$0xff]  ;;  %v1020_v50 = vadd.f32 %v1018_v23, %v1016_v42 }
 0x1f4   :  { %1500 = vrot.lane.b32.xlu1 %v1496_v45, %s3735_s15  ;;  %1584 = vrot.lane.b32.xlu0 %v1579_v16, %s3735_s15 }
 0x1f5   :  { %v4968_v29 = vadd.f32 %v1464_v20, %v1462_v27  ;;  %v3315_v27 = vpack.c.bf16 %v1668_v53, %v1667_v54  ;;  %v1087_v20 = vmul.f32 %v4125_v13, %v4113_v5 }
 0x1f6   :  { %v766_v12 = vpop.permute.xlu1 %765  ;;  %v1541_v43 = vpop.permute.xlu0 %1540 }
 0x1f7   :  { %v771_v63 = vadd.f32 %v766_v12, %v759_v33  ;;  %v1545_v3 = vadd.f32 %v1541_v43, %v1533_v28  ;;  %v1439_v33 = vmul.f32 %v3850_v10, %v4113_v5  ;;  %v5910_v28 = vld [vmem:[#allocation15_spill] sm:$0xff]  ;;  %3316 = vmatprep.subr.bf16.mxu0 %v3315_v27  ;;  %v1465_v43 = vmul.f32 %v3855_v11, %v4115_v6 }
 0x1f8   :  { %1338 = vrot.lane.b32.xlu1 %v1333_v25, %s3736_s16  ;;  %1594 = vrot.lane.b32.xlu0 %v1590_v51, %s3736_s16  ;;  %v1099_v48 = vadd.f32 %v5910_v28, %v1087_v20  ;;  %v5911_v25 = vld [vmem:[#allocation10_spill] sm:$0xff] }
 0x1f9   :  { %v4987_v34 = vmax.f32 %v771_v63, %v853_v60  ;;  %v4989_v41 = vadd.f32 %v1547_v19, %v1545_v3  ;;  %v1451_v14 = vadd.f32 %v4873_v38, %v1439_v33  ;;  %3318 = vmatpush3.bf16.msra.mxu0 %v3315_v27  ;;  %v1669_v38 = vld [vmem:[%s5856_s5 + $0x30] sm:$0xff]  ;;  %v1670_v63 = vld [vmem:[%s5856_s5 + $0x38] sm:$0x3]  ;;  %v1032_v19 = vadd.f32 %v4883_v4, %v1020_v50  ;;  %v5914_v4 = vld [vmem:[#allocation9_spill] sm:$0xff]  ;;  %s3760_s5 = smov 80  }
 0x1fa   :  { %v4997_v45 = vpop.permute.xlu1 %1296  ;;  %v4999_v16 = vpop.permute.xlu0 %837  ;;  %v1111_v51 = vadd.f32 %v5911_v25, %v1099_v48  ;;  %v3319_v47 = vpack.c.bf16 %v1670_v63, %v1669_v38  ;;  %v1086_v27 = vmul.f32 %v4125_v13, %v4085_v55  ;;  %v1046_v33 = vmul.f32 %v4139_v26, %v5914_v4  ;;  %v5918_v50 = vld [vmem:[#allocation6_spill] sm:$0xff] }
 0x1fb   :  { %v1141_v25 = vmul.f32 %v4191_v30, %v4097_v62 }
 0x1fc   :  { %1502 = vrot.lane.b32.xlu1 %v1497_v22, %s3735_s15  ;;  %1596 = vrot.lane.b32.xlu0 %v1591_v36, %s3736_s16  ;;  %v1509_v36 = vmul.f32 %v4708_v56, %v4071_v49  ;;  %v1115_v20 = vadd.f32 %v1113_v7, %v1111_v51  ;;  %v5915_v49 = vld [vmem:[#allocation16_spill] sm:$0xff]  ;;  %v5917_v51 = vld [vmem:[#allocation13_spill] sm:$0xff] }
 0x1fd   :  { %3321 = vmatprep.subr.msk.bf16.mxu0 %vm5033_vm2, %v3319_v47  ;;  %v1098_v28 = vadd.f32 %v5915_v49, %v1086_v27  ;;  %v5919_v27 = vld [vmem:[#allocation12_spill] sm:$0xff] }
 0x1fe   :  { %v1459_v58 = vpop.permute.xlu1 %1458  ;;  %v5016_v12 = vpop.permute.xlu0 %956  ;;  %3324 = vmatpush3.bf16.msk.msra.mxu0 %vm5033_vm2, %v3319_v47  ;;  %v1127_v48 = vadd.f32 %v4895_v35, %v1115_v20  ;;  %v1209_v35 = vadd.f32 %v4907_v15, %v5918_v50  ;;  %v1302_v15 = vadd.f32 %v4997_v45, %v5919_v27  ;;  %v5921_v45 = vld [vmem:[#allocation7_spill] sm:$0xff] }
 0x1ff   :  { %v1463_v60 = vadd.f32 %v1459_v58, %v1451_v14  ;;  %v5916_v58 = vld [vmem:[#allocation17_spill] sm:$0xff] }
 0x200   :  { %1512 = vrot.lane.b32.xlu1 %v1508_v0, %s3736_s16  ;;  %331 = vrot.lane.b32.xlu0 %v4832_v37, %s3735_s15  ;;  %v1110_v0 = vadd.f32 %v5916_v58, %v1098_v28  ;;  %v5920_v58 = vld [vmem:[#allocation8_spill] sm:$0xff] }
 0x201   :  { %v5040_v54 = vadd.f32 %v1465_v43, %v1463_v60  ;;  %v1112_v60 = vmul.f32 %v4139_v26, %v5892_v52  ;;  %v993_v52 = vmul.f32 %v4109_v2, %v4113_v5 }
 0x202   :  { %v5042_v53 = vpop.permute.xlu1 %755  ;;  %v1039_v22 = vpop.permute.xlu0 %1038 }
 0x203   :  { %v1044_v42 = vadd.f32 %v1039_v22, %v1032_v19  ;;  %v1114_v19 = vadd.f32 %v1112_v60, %v1110_v0  ;;  %v1223_v22 = vmul.f32 %v4164_v44, %v4097_v62  ;;  %v1208_v0 = vadd.f32 %v4934_v61, %v5921_v45 }
 0x204   :  { %1514 = vrot.lane.b32.xlu1 %v1509_v36, %s3736_s16  ;;  %509 = vrot.lane.b32.xlu0 %v4842_v40, %s3735_s15  ;;  %v1019_v61 = vmul.f32 %v4125_v13, %v4115_v6  ;;  %v760_v6 = vadd.f32 %v5042_v53, %v4781_v9  ;;  %v1399_v9 = vmul.f32 %v3855_v11, %v4097_v62 }
 0x205   :  { %v5059_v14 = vadd.f32 %v1046_v33, %v1044_v42  ;;  %v1126_v36 = vadd.f32 %v4922_v17, %v1114_v19  ;;  %v1005_v17 = vadd.f32 %v5920_v58, %v993_v52 }
 0x206   :  { %v5061_v55 = vpop.permute.xlu1 %946  ;;  %v1135_v23 = vpop.permute.xlu0 %1134 }
 0x207   :  { %v1139_v43 = vadd.f32 %v1135_v23, %v1127_v48  ;;  %v1140_v48 = vmul.f32 %v4191_v30, %v5914_v4  ;;  %v1316_v23 = vmul.f32 %v3850_v10, %v5914_v4  ;;  %v1017_v60 = vadd.f32 %v4758_v39, %v1005_v17 }
 0x208   :  { %507 = vrot.lane.b32.xlu1 %v5917_v51, %s3735_s15  ;;  %685 = vrot.lane.b32.xlu0 %v4881_v24, %s3735_s15 }
 0x209   :  { %v5074_v38 = vadd.f32 %v1141_v25, %v1139_v43  ;;  %v5922_v43 = vld [vmem:[#allocation5_spill] sm:$0xff] }
 0x20a   :  { %v1029_v63 = vpop.permute.xlu1 %1028  ;;  %v1217_v47 = vpop.permute.xlu0 %1216  ;;  %v1384_v2 = vadd.f32 %v4951_v32, %v5922_v43 }
 0x20b   :  { %v1221_v7 = vadd.f32 %v1217_v47, %v1209_v35  ;;  %v1222_v35 = vmul.f32 %v4164_v44, %v5914_v4  ;;  %v1021_v44 = vadd.f32 %v1019_v61, %v1017_v60 }
 0x20c   :  { %333 = vrot.lane.b32.xlu1 %v4805_v18, %s3735_s15 }
 0x20d   :  { %v5083_v20 = vadd.f32 %v1223_v22, %v1221_v7  ;;  %v1398_v7 = vmul.f32 %v3855_v11, %v5914_v4 }
 0x20e   :  { %v1133_v42 = vpop.permute.xlu1 %1132  ;;  %v1309_v33 = vpop.permute.xlu0 %1308 }
 0x20f   :  { %v1138_v49 = vadd.f32 %v1133_v42, %v1126_v36  ;;  %v1314_v28 = vadd.f32 %v1309_v33, %v1302_v15  ;;  %v1033_v15 = vadd.f32 %v1029_v63, %v1021_v44  ;;  %v1047_v33 = vmul.f32 %v4139_v26, %v4097_v62 }
 0x210   :  { %683 = vrot.lane.b32.xlu1 %v4903_v31, %s3735_s15 }
 0x211   :  { %v5098_v5 = vadd.f32 %v1140_v48, %v1138_v49  ;;  %v5100_v25 = vadd.f32 %v1316_v23, %v1314_v28  ;;  %v5923_v49 = vld [vmem:[#allocation14_spill] sm:$0xff] }
 0x212   :  { %v1215_v50 = vpop.permute.xlu1 %1214  ;;  %v1391_v30 = vpop.permute.xlu0 %1390  ;;  %v842_v28 = vadd.f32 %v4999_v16, %v5923_v49  ;;  %v5924_v49 = vld [vmem:[#allocation11_spill] sm:$0xff] }
 0x213   :  { %v1220_v47 = vadd.f32 %v1215_v50, %v1208_v0  ;;  %v1396_v19 = vadd.f32 %v1391_v30, %v1384_v2 }
 0x214   :  { %859 = vrot.lane.b32.xlu1 %v4987_v34, %s3735_s15 }
 0x215   :  { %v5111_v32 = vadd.f32 %v1222_v35, %v1220_v47  ;;  %v5113_v22 = vadd.f32 %v1398_v7, %v1396_v19  ;;  %v1317_v47 = vmul.f32 %v3850_v10, %v4097_v62  ;;  %v950_v10 = vadd.f32 %v4905_v1, %v5924_v49 }
 0x216   :  { %v1299_v36 = vpop.permute.xlu1 %1298  ;;  %v850_v27 = vpop.permute.xlu0 %849 }
 0x217   :  { %v854_v17 = vadd.f32 %v850_v27, %v842_v28  ;;  %v1303_v30 = vadd.f32 %v1299_v36, %v4871_v21  ;;  %v1574_v21 = vmul.f32 %v4915_v59, %v5914_v4 }
 0x21a   :  { %v1381_v39 = vpop.permute.xlu1 %1380  ;;  %v1041_v52 = vpop.permute.xlu0 %1040 }
 0x21b   :  { %v1045_v42 = vadd.f32 %v1041_v52, %v1033_v15  ;;  %v1385_v63 = vadd.f32 %v1381_v39, %v4844_v8 }
 0x21d   :  { %v5121_v48 = vadd.f32 %v1047_v33, %v1045_v42 }
 0x21e   :  { %v768_v23 = vpop.permute.xlu1 %767  ;;  %v1555_v58 = vpop.permute.xlu0 %1554 }
 0x21f   :  { %v772_v45 = vadd.f32 %v768_v23, %v760_v6  ;;  %v1560_v11 = vadd.f32 %v1555_v58, %v4932_v46  ;;  %v1492_v46 = vmul.f32 %v4708_v56, %v5914_v4  ;;  %v962_v58 = vadd.f32 %v5016_v12, %v950_v10 }
 0x221   :  { %v5124_v0 = vmax.f32 %v772_v45, %v854_v17 }
 0x222   :  { %v5126_v43 = vpop.permute.xlu1 %958  ;;  %v1393_v2 = vpop.permute.xlu0 %1392 }
 0x223   :  { %v1397_v26 = vadd.f32 %v1393_v2, %v1385_v63  ;;  %861 = vrot.lane.b32.xlu0 %v5124_v0, %s3735_s15  ;;  %v1575_v2 = vmul.f32 %v4915_v59, %v4097_v62 }
 0x225   :  { %v5132_v16 = vadd.f32 %v1399_v9, %v1397_v26  ;;  %v964_v26 = vmul.f32 %v4125_v13, %v5914_v4  ;;  %v1493_v4 = vmul.f32 %v4708_v56, %v4097_v62 }
 0x226   :  { %v1473_v53 = vpop.permute.xlu1 %1472  ;;  %v1557_v50 = vpop.permute.xlu0 %1556 }
 0x227   :  { %v1478_v28 = vadd.f32 %v1473_v53, %v4968_v29  ;;  %v1561_v6 = vadd.f32 %v1557_v50, %v4989_v41  ;;  %v966_v53 = vadd.f32 %v964_v26, %v962_v58 }
 0x22a   :  { %v1311_v35 = vpop.permute.xlu1 %1310  ;;  %v1055_v8 = vpop.permute.xlu0 %1054 }
 0x22b   :  { %v1315_v60 = vadd.f32 %v1311_v35, %v1303_v30  ;;  %v1060_v50 = vadd.f32 %v1055_v8, %v5059_v14 }
 0x22d   :  { %v5137_v19 = vadd.f32 %v1317_v47, %v1315_v60 }
 0x22e   :  { %v1475_v7 = vpop.permute.xlu1 %1474  ;;  %v1151_v61 = vpop.permute.xlu0 %1150 }
 0x22f   :  { %v1479_v30 = vadd.f32 %v1475_v7, %v5040_v54  ;;  %v1155_v54 = vadd.f32 %v1151_v61, %v5074_v38 }
 0x232   :  { %v973_v27 = vpop.permute.xlu1 %972  ;;  %v1233_v44 = vpop.permute.xlu0 %1232 }
 0x233   :  { %v978_v12 = vadd.f32 %v973_v27, %v966_v53  ;;  %v1237_v14 = vadd.f32 %v1233_v44, %v5083_v20 }
 0x236   :  { %v1149_v15 = vpop.permute.xlu1 %1148  ;;  %v1567_v39 = vpop.permute.xlu0 %1566 }
 0x237   :  { %v1572_v52 = vadd.f32 %v1567_v39, %v1560_v11 }
 0x239   :  { %v5142_v36 = vadd.f32 %v1574_v21, %v1572_v52 }
 0x23a   :  { %v1231_v42 = vpop.permute.xlu1 %1230  ;;  %v1407_v33 = vpop.permute.xlu0 %1406 }
 0x23e   :  { %v1485_v23 = vpop.permute.xlu1 %1484  ;;  %v1569_v17 = vpop.permute.xlu0 %1568 }
 0x23f   :  { %v1490_v45 = vadd.f32 %v1485_v23, %v1478_v28  ;;  %v1573_v63 = vadd.f32 %v1569_v17, %v1561_v6  ;;  %v1154_v23 = vadd.f32 %v1149_v15, %v5098_v5  ;;  %v1236_v17 = vadd.f32 %v1231_v42, %v5111_v32 }
 0x241   :  { %v5155_v1 = vadd.f32 %v1492_v46, %v1490_v45  ;;  %v5157_v29 = vadd.f32 %v1575_v2, %v1573_v63  ;;  %v1412_v46 = vadd.f32 %v1407_v33, %v5113_v22  ;;  %v951_v2 = vadd.f32 %v5061_v55, %v4795_v57 }
 0x242   :  { %v1325_v41 = vpop.permute.xlu1 %1324  ;;  %v985_v9 = vpop.permute.xlu0 %984 }
 0x243   :  { %v990_v47 = vadd.f32 %v985_v9, %v978_v12  ;;  %v1330_v38 = vadd.f32 %v1325_v41, %v5100_v25  ;;  %v963_v32 = vadd.f32 %v5126_v43, %v951_v2  ;;  %v965_v25 = vmul.f32 %v4125_v13, %v4097_v62 }
 0x245   :  { %v967_v33 = vadd.f32 %v965_v25, %v963_v32 }
 0x246   :  { %v1487_v35 = vpop.permute.xlu1 %1486  ;;  %v1067_v60 = vpop.permute.xlu0 %1066 }
 0x247   :  { %v1491_v11 = vadd.f32 %v1487_v35, %v1479_v30  ;;  %v1072_v59 = vadd.f32 %v1067_v60, %v1060_v50 }
 0x249   :  { %v5163_v39 = vmax.f32 %v990_v47, %v1072_v59  ;;  %v5165_v52 = vadd.f32 %v1493_v4, %v1491_v11 }
 0x24a   :  { %v975_v21 = vpop.permute.xlu1 %974  ;;  %v1163_v49 = vpop.permute.xlu0 %1162 }
 0x24b   :  { %1078 = vrot.lane.b32.xlu1 %v5163_v39, %s3735_s15  ;;  %v1167_v27 = vadd.f32 %v1163_v49, %v1155_v54  ;;  %v979_v57 = vadd.f32 %v975_v21, %v967_v33 }
 0x24e   :  { %v1057_v8 = vpop.permute.xlu1 %1056  ;;  %v1245_v7 = vpop.permute.xlu0 %1244 }
 0x24f   :  { %v1249_v10 = vadd.f32 %v1245_v7, %v1237_v14  ;;  %v1061_v55 = vadd.f32 %v1057_v8, %v5121_v48 }
 0x251   :  { %v5171_v28 = vmax.f32 %v1167_v27, %v1249_v10 }
 0x252   :  { %v1161_v56 = vpop.permute.xlu1 %1160  ;;  %v1337_v6 = vpop.permute.xlu0 %1336 }
 0x253   :  { %1256 = vrot.lane.b32.xlu1 %v5171_v28, %s3735_s15  ;;  %v1166_v44 = vadd.f32 %v1161_v56, %v1154_v23  ;;  %v1342_v58 = vadd.f32 %v1337_v6, %v1330_v38  ;;  %v1820_v38 = vld [vmem:[%s5853_s2 + $0x10] sm:$0xff] }
 0x256   :  { %v1243_v20 = vpop.permute.xlu1 %1242  ;;  %v1419_v61 = vpop.permute.xlu0 %1418 }
 0x257   :  { %v1248_v45 = vadd.f32 %v1243_v20, %v1236_v17  ;;  %v1424_v63 = vadd.f32 %v1419_v61, %v1412_v46  ;;  %v1818_v46 = vld [vmem:[%s5853_s2] sm:$0xff] }
 0x259   :  { %v5181_v26 = vmax.f32 %v1166_v44, %v1248_v45  ;;  %v5183_v9 = vmax.f32 %v1342_v58, %v1424_v63  ;;  %v1822_v58 = vld [vmem:[%s5853_s2 + $0x20] sm:$0xff]  ;;  %v1821_v45 = vld [vmem:[%s5853_s2 + $0x18] sm:$0xff] }
 0x25a   :  { %v1327_v5 = vpop.permute.xlu1 %1326  ;;  %v1069_v15 = vpop.permute.xlu0 %1068 }
 0x25b   :  { %1254 = vrot.lane.b32.xlu0 %v5181_v26, %s3735_s15  ;;  %v1073_v50 = vadd.f32 %v1069_v15, %v1061_v55  ;;  %v1331_v62 = vadd.f32 %v1327_v5, %v5137_v19 }
 0x25e   :  { %v1409_v22 = vpop.permute.xlu1 %1408  ;;  %v1583_v42 = vpop.permute.xlu0 %1582 }
 0x25f   :  { %1430 = vrot.lane.b32.xlu0 %v5183_v9, %s3735_s15  ;;  %v1413_v13 = vadd.f32 %v1409_v22, %v5132_v16  ;;  %v1588_v49 = vadd.f32 %v1583_v42, %v5142_v36 }
 0x262   :  { %v987_v41 = vpop.permute.xlu1 %986  ;;  %v1421_v53 = vpop.permute.xlu0 %1420 }
 0x263   :  { %v991_v30 = vadd.f32 %v987_v41, %v979_v57  ;;  %v1425_v11 = vadd.f32 %v1421_v53, %v1413_v13 }
 0x265   :  { %v5193_v43 = vmax.f32 %v991_v30, %v1073_v50 }
 0x266   :  { %v1501_v12 = vpop.permute.xlu1 %1500  ;;  %v1585_v35 = vpop.permute.xlu0 %1584 }
 0x267   :  { %1080 = vrot.lane.b32.xlu1 %v5193_v43, %s3735_s15  ;;  %v1506_v54 = vadd.f32 %v1501_v12, %v5155_v1  ;;  %v1589_v27 = vadd.f32 %v1585_v35, %v5157_v29  ;;  %v1819_v1 = vld [vmem:[%s5853_s2 + $0x8] sm:$0xff]  ;;  %s3738_s2 = smov 54  }
 0x26a   :  { %v1339_v60 = vpop.permute.xlu1 %1338  ;;  %v1595_v47 = vpop.permute.xlu0 %1594 }
 0x26b   :  { %v1343_v59 = vadd.f32 %v1339_v60, %v1331_v62  ;;  %v1600_v19 = vadd.f32 %v1595_v47, %v1588_v49 }
 0x26d   :  { %v5199_v48 = vmax.f32 %v1343_v59, %v1425_v11 }
 0x26e   :  { %v1503_v4 = vpop.permute.xlu1 %1502  ;;  %v1597_v21 = vpop.permute.xlu0 %1596 }
 0x26f   :  { %1432 = vrot.lane.b32.xlu0 %v5199_v48, %s3735_s15  ;;  %v1507_v10 = vadd.f32 %v1503_v4, %v5165_v52  ;;  %v1601_v23 = vadd.f32 %v1597_v21, %v1589_v27 }
 0x272   :  { %v1513_v14 = vpop.permute.xlu1 %1512  ;;  %v332_v8 = vpop.permute.xlu0 %331 }
 0x273   :  { %v1518_v16 = vadd.f32 %v1513_v14, %v1506_v54  ;;  %v337_v7 = vmax.f32 %v4832_v37, %v332_v8 }
 0x275   :  { %v5208_v56 = vmax.f32 %v1518_v16, %v1600_v19  ;;  %3193 = vmatprep.mubr.msk.f32.mxu0 %vm1671_vm3, %v337_v7 }
 0x276   :  { %v1515_v6 = vpop.permute.xlu1 %1514  ;;  %v510_v29 = vpop.permute.xlu0 %509 }
 0x277   :  { %v1519_v36 = vadd.f32 %v1515_v6, %v1507_v10  ;;  %1606 = vrot.lane.b32.xlu1 %v5208_v56, %s3735_s15 }
 0x279   :  { %v5216_v17 = vmax.f32 %v1519_v36, %v1601_v23 }
 0x27a   :  { %v508_v37 = vpop.permute.xlu1 %507  ;;  %v686_v63 = vpop.permute.xlu0 %685 }
 0x27b   :  { %v513_v52 = vmax.f32 %v5917_v51, %v508_v37  ;;  %1608 = vrot.lane.b32.xlu0 %v5216_v17, %s3735_s15  ;;  %1830 = vperm.xlu1 %3456, %v1819_v1   ;;  %v514_v51 = vmax.f32 %v4842_v40, %v510_v29  ;;  %v690_v40 = vmax.f32 %v4881_v24, %v686_v63 }
 0x27d   :  { %v1617_v61 = vrot.slane %v513_v52, 6  ;;  %v1618_v15 = vrot.slane %v514_v51, 6  ;;  %v1626_v57 = vrot.slane %v690_v40, 4 }
 0x27e   :  { %v334_v20 = vpop.permute.xlu1 %333 }
 0x27f   :  { %v338_v44 = vmax.f32 %v4805_v18, %v334_v20  ;;  %1825 = vperm.xlu0 %3455, %v1818_v46   ;;  %1835 = vperm.xlu1 %3456, %v1820_v38   ;;  %v1619_v25 = vsel %vm1616_vm0, %v1617_v61, %v1618_v15 }
 0x281   :  { %v1657_v2 = vsel %vm1616_vm0, %v338_v44, %v1617_v61 }
 0x282   :  { %v684_v5 = vpop.permute.xlu1 %683  ;;  %3194 = vmatmul.mubr.msk.f32.vlgmr.msra.gmra.mrb[0].mxu0 %vm1671_vm3, %v1657_v2 }
 0x283   :  { %v689_v18 = vmax.f32 %v4903_v31, %v684_v5  ;;  %1845 = vperm.xlu0 %3455, %v1822_v58   ;;  %1840 = vperm.xlu1 %3456, %v1821_v45  }
 0x285   :  { %v1625_v32 = vrot.slane %v689_v18, 4 }
 0x286   :  { %v860_v22 = vpop.permute.xlu1 %859 }
 0x287   :  { %v865_v42 = vmax.f32 %v4987_v34, %v860_v22  ;;  %v1658_v33 = vsel %vm1624_vm4, %v1619_v25, %v1625_v32  ;;  %v1627_v31 = vsel %vm1624_vm4, %v1625_v32, %v1626_v57 }
 0x288   :  { %3196 = vmatprep.mubr.msk.f32.mxu0 %vm1671_vm3, %v1658_v33 }
 0x289   :  { %v1633_v55 = vrot.slane %v865_v42, 2 }
 0x28b   :  { %v1659_v41 = vsel %vm1632_vm5, %v1627_v31, %v1633_v55 }
 0x28c   :  { %3197 = vmatmul.mubr.msk.f32.gmra.mrb[2].mxu0 %vm1671_vm3, %v1659_v41 }
 0x295   :  { %v862_v24 = vpop.permute.xlu0 %861 }
 0x296   :  { %v866_v53 = vmax.f32 %v5124_v0, %v862_v24 }
 0x298   :  { %v1634_v50 = vrot.slane %v866_v53, 2 }
 0x29a   :  { %v1635_v30 = vsel %vm1632_vm5, %v1633_v55, %v1634_v50 }
 0x29b   :  { %3199 = vmatprep.mubr.msk.f32.mxu0 %vm1671_vm3, %v1635_v30 }
 0x2bd   :  { %v1079_v34 = vpop.permute.xlu1 %1078 }
 0x2be   :  { %v1084_v12 = vmax.f32 %v5163_v39, %v1079_v34 }
 0x2c0   :  { %3200 = vmatmul.mubr.msk.f32.gmra.mrb[4].mxu0 %vm1671_vm3, %v1084_v12 }
 0x2c5   :  { %v1257_v13 = vpop.permute.xlu1 %1256 }
 0x2c6   :  { %v1261_v11 = vmax.f32 %v5171_v28, %v1257_v13 }
 0x2c8   :  { %v1640_v21 = vrot.slane %v1261_v11, 6 }
 0x2cd   :  { %v1255_v35 = vpop.permute.xlu0 %1254 }
 0x2ce   :  { %v1260_v60 = vmax.f32 %v5181_v26, %v1255_v35 }
 0x2d0   :  { %v1639_v0 = vrot.slane %v1260_v60, 6 }
 0x2d1   :  { %v1431_v62 = vpop.permute.xlu0 %1430 }
 0x2d2   :  { %v1436_v47 = vmax.f32 %v5183_v9, %v1431_v62  ;;  %v1641_v54 = vsel %vm1616_vm0, %v1639_v0, %v1640_v21 }
 0x2d4   :  { %v1646_v59 = vrot.slane %v1436_v47, 4 }
 0x2d6   :  { %v1661_v14 = vsel %vm1624_vm4, %v1641_v54, %v1646_v59 }
 0x2d9   :  { %v1081_v4 = vpop.permute.xlu1 %1080 }
 0x2da   :  { %v1085_v49 = vmax.f32 %v5193_v43, %v1081_v4 }
 0x2dc   :  { %v1660_v39 = vsel %vm1616_vm0, %v1085_v49, %v1639_v0 }
 0x2dd   :  { %3202 = vmatprep.mubr.msk.f32.mxu0 %vm1671_vm3, %v1660_v39 }
 0x2de   :  { %3203 = vmatmul.mubr.msk.f32.gmra.mrb[6].mxu0 %vm1671_vm3, %v1661_v14 }
 0x2e1   :  { %v1433_v26 = vpop.permute.xlu0 %1432 }
 0x2e2   :  { %v1437_v9 = vmax.f32 %v5199_v48, %v1433_v26 }
 0x2e4   :  { %v1647_v28 = vrot.slane %v1437_v9, 4 }
 0x2e6   :  { %v1648_v43 = vsel %vm1624_vm4, %v1646_v59, %v1647_v28 }
 0x2e9   :  { %v1607_v8 = vpop.permute.xlu1 %1606 }
 0x2ea   :  { %v1612_v19 = vmax.f32 %v5208_v56, %v1607_v8 }
 0x2ec   :  { %v1653_v16 = vrot.slane %v1612_v19, 2 }
 0x2ed   :  { %v1609_v7 = vpop.permute.xlu0 %1608 }
 0x2ee   :  { %v1613_v27 = vmax.f32 %v5216_v17, %v1609_v7  ;;  %v1662_v10 = vsel %vm1632_vm5, %v1648_v43, %v1653_v16 }
 0x2ef   :  { %3205 = vmatprep.mubr.msk.f32.mxu0 %vm1671_vm3, %v1662_v10 }
 0x2f0   :  { %v1654_v6 = vrot.slane %v1613_v27, 2 }
 0x2f2   :  { %v1655_v23 = vsel %vm1632_vm5, %v1653_v16, %v1654_v6 }
 0x2f3   :  { %3206 = vmatmul.mubr.msk.f32.gmra.mrb[8].mxu0 %vm1671_vm3, %v1655_v23  ;;  %vm2540_vm3 = vcmask 957440  }
 0x2fa   :  { %v1831_v37 = vpop.permute.xlu1 %1830 }
 0x2fe   :  { %v1826_v52 = vpop.permute.xlu0 %1825  ;;  %v1836_v5 = vpop.permute.xlu1 %1835 }
 0x302   :  { %v1841_v15 = vpop.permute.xlu1 %1840  ;;  %v1846_v9 = vpop.permute.xlu0 %1845 }
 0x355   :  { %v3195_v48 = vpop.f32.mrb[0].mxu0 }
 0x356   :  { %v5268_v36 = vpop.f32.mrb[1].mxu0  ;;  %v1849_v29 = vadd.f32 %v3195_v48, %v1831_v37 }
 0x357   :  { %v1848_v10 = vadd.f32 %v1826_v52, %v5268_v36 }
 0x358   :  { %v5270_v38 = vmax.f32 %v1849_v29, 0.0 }
 0x35a   :  { %v5275_v44 = vrot.slane %v5270_v38, 4  ;;  %v1926_v51 = vrot.slane %v5270_v38, 6 }
 0x35f   :  { %v3198_v1 = vpop.f32.mrb[2].mxu0 }
 0x360   :  { %v1779_v56 = vpop.f32.mrb[3].mxu0  ;;  %v1851_v40 = vadd.f32 %v3198_v1, %v1841_v15 }
 0x361   :  { %v1850_v18 = vadd.f32 %v1836_v5, %v1779_v56 }
 0x362   :  { %v5285_v57 = vmax.f32 %v1851_v40, 0.0 }
 0x363   :  { %v5283_v32 = vmax.f32 %v1850_v18, 0.0 }
 0x364   :  { %v5301_v62 = vrot.slane %v5285_v57, 4 }
 0x365   :  { %v1887_v55 = vrot.slane %v5283_v32, 4  ;;  %v1927_v31 = vrot.slane %v5283_v32, 6 }
 0x367   :  { %v5305_v13 = vsel %vm1624_vm4, %v5275_v44, %v1887_v55  ;;  %v1928_v60 = vsel %vm1616_vm0, %v1926_v51, %v1927_v31  ;;  %v5322_v54 = vsel %vm1624_vm4, %v1887_v55, %v5301_v62 }
 0x393   :  { %v3201_v46 = vpop.f32.mrb[4].mxu0 }
 0x394   :  { %v1946_v17 = vadd.f32 %v3201_v46, %v1826_v52  ;;  %v1789_v20 = vpop.f32.mrb[5].mxu0  ;;  %v5342_v46 = vmax.f32 %v1848_v10, 0.0 }
 0x395   :  { %v1852_v28 = vadd.f32 %v1846_v9, %v1789_v20 }
 0x396   :  { %v5272_v61 = vmax.f32 %v1946_v17, 0.0 }
 0x397   :  { %v5330_v19 = vmax.f32 %v1852_v28, 0.0 }
 0x398   :  { %v1960_v58 = vrot.slane %v5272_v61, 2  ;;  %v1979_v45 = vrot.slane %v5272_v61, 4 }
 0x399   :  { %v1912_v6 = vrot.slane %v5330_v19, 4  ;;  %v1931_v40 = vrot.slane %v5330_v19, 6 }
 0x39a   :  { %v3462_v63 = vpack.i.bf16 %v1979_v45, %v1926_v51  ;;  %v3457_v2 = vpack.i.bf16 %v1960_v58, %v5275_v44 }
 0x39b   :  { %v1913_v17 = vsel %vm1624_vm4, %v5301_v62, %v1912_v6 }
 0x39c   :  { %3463 = vrot.lane.b32.xlu0 %v3462_v63, %s3736_s16  ;;  %3458 = vrot.lane.b32.xlu1 %v3457_v2, %s3735_s15  ;;  %v1862_v63 = vrot.slane %v5342_v46, 2  ;;  %v1929_v2 = vrot.slane %v5285_v57, 6 }
 0x3b1   :  { %v3204_v25 = vpop.f32.mrb[6].mxu0 }
 0x3b2   :  { %v1948_v22 = vadd.f32 %v3204_v25, %v1836_v5  ;;  %v1799_v42 = vpop.f32.mrb[7].mxu0  ;;  %v1930_v25 = vsel %vm1616_vm0, %v1927_v31, %v1929_v2  ;;  %v1884_v31 = vrot.slane %v5342_v46, 4 }
 0x3b3   :  { %v1947_v33 = vadd.f32 %v1831_v37, %v1799_v42 }
 0x3b4   :  { %v5289_v41 = vmax.f32 %v1948_v22, 0.0 }
 0x3b5   :  { %v5291_v24 = vmax.f32 %v1947_v33, 0.0 }
 0x3b6   :  { %v1963_v53 = vrot.slane %v5289_v41, 2  ;;  %v1982_v50 = vrot.slane %v5289_v41, 4  ;;  %v2018_v47 = vrot.slane %v5289_v41, 6 }
 0x3b7   :  { %v1961_v30 = vrot.slane %v5291_v24, 2  ;;  %v1980_v34 = vrot.slane %v5291_v24, 4  ;;  %v2017_v12 = vrot.slane %v5291_v24, 6  ;;  %v3537_v35 = vpack.i.bf16 %v5291_v24, %v5272_v61 }
 0x3b9   :  { %v3467_v11 = vpack.i.bf16 %v5305_v13, %v1980_v34  ;;  %v3472_v0 = vpack.i.bf16 %v1928_v60, %v2017_v12  ;;  %v5313_v59 = vsel %vm1632_vm5, %v1961_v30, %v1963_v53  ;;  %v1983_v4 = vsel %vm1624_vm4, %v1980_v34, %v1982_v50 }
 0x3ba   :  { %v1962_v21 = vsel %vm1632_vm5, %v1960_v58, %v1961_v30  ;;  %v1981_v49 = vsel %vm1624_vm4, %v1979_v45, %v1980_v34  ;;  %v3482_v39 = vpack.i.bf16 %v1983_v4, %v5313_v59  ;;  %v2019_v26 = vsel %vm1616_vm0, %v2017_v12, %v2018_v47 }
 0x3bb   :  { %3468 = vrot.lane.b32.xlu0 %v3467_v11, %s3735_s15  ;;  %3473 = vrot.lane.b32.xlu1 %v3472_v0, %s3736_s16  ;;  %v3477_v14 = vpack.i.bf16 %v1962_v21, %v5322_v54  ;;  %v3502_v8 = vpack.i.bf16 %v2019_v26, %v1983_v4  ;;  %v3497_v22 = vpack.i.bf16 %v1981_v49, %v1930_v25  ;;  %v1867_v30 = vrot.slane %v5285_v57, 2 }
 0x3bc   :  { %v1865_v34 = vrot.slane %v5283_v32, 2  ;;  %v1863_v60 = vrot.slane %v5270_v38, 2  ;;  %v1886_v4 = vsel %vm1624_vm4, %v1884_v31, %v5275_v44  ;;  %v3557_v26 = vpack.i.bf16 %v5322_v54, %v5305_v13 }
 0x3bd   :  { %v3552_v49 = vpack.i.bf16 %v1886_v4, %v1884_v31 }
 0x3be   :  { %v1866_v11 = vsel %vm1632_vm5, %v1863_v60, %v1865_v34  ;;  %v1868_v0 = vsel %vm1632_vm5, %v1865_v34, %v1867_v30 }
 0x3bf   :  { %3483 = vrot.lane.b32.xlu0 %v3482_v39, %s3735_s15  ;;  %3478 = vrot.lane.b32.xlu1 %v3477_v14, %s3735_s15  ;;  %v3532_v21 = vpack.i.bf16 %v1868_v0, %v1866_v11  ;;  %v3740_v39 = vmov 0.0|0.0   ;;  %v1864_v14 = vsel %vm1632_vm5, %v1862_v63, %v1863_v60  ;;  %v3547_v61 = vpack.i.bf16 %v1868_v0, %v1867_v30 }
 0x3c0   :  { %3325 = vmatprep.subr.bf16.mxu1 %v3740_v39  ;;  %3344 = vmatprep.subr.bf16.mxu0 %v3740_v39  ;;  %v3542_v44 = vpack.i.bf16 %v1866_v11, %v1864_v14 }
 0x3c3   :  { %3503 = vrot.lane.b32.xlu0 %v3502_v8, %s3736_s16 }
 0x3c6   :  { %v3207_v16 = vpop.f32.mrb[8].mxu0 }
 0x3c7   :  { %v1950_v43 = vadd.f32 %v3207_v16, %v1846_v9  ;;  %v1809_v7 = vpop.f32.mrb[9].mxu0 }
 0x3c8   :  { %v1949_v27 = vadd.f32 %v1841_v15, %v1809_v7 }
 0x3c9   :  { %v5334_v23 = vmax.f32 %v1950_v43, 0.0 }
 0x3ca   :  { %v5336_v48 = vmax.f32 %v1949_v27, 0.0 }
 0x3cb   :  { %v2000_v1 = vrot.slane %v5334_v23, 2  ;;  %v2003_v56 = vrot.slane %v5334_v23, 4  ;;  %v2022_v42 = vrot.slane %v5334_v23, 6 }
 0x3cc   :  { %v1965_v37 = vrot.slane %v5336_v48, 2  ;;  %v1984_v29 = vrot.slane %v5336_v48, 4  ;;  %v2020_v18 = vrot.slane %v5336_v48, 6 }
 0x3ce   :  { %v3487_v36 = vpack.i.bf16 %v1965_v37, %v1913_v17  ;;  %v1966_v52 = vsel %vm1632_vm5, %v1963_v53, %v1965_v37  ;;  %v1985_v51 = vsel %vm1624_vm4, %v1982_v50, %v1984_v29  ;;  %v2004_v58 = vsel %vm1624_vm4, %v1984_v29, %v2003_v56 }
 0x3cf   :  { %v3507_v20 = vpack.i.bf16 %v2003_v56, %v1966_v52  ;;  %v5353_v45 = vsel %vm1632_vm5, %v1965_v37, %v2000_v1  ;;  %v3492_v5 = vpack.i.bf16 %v1912_v6, %v1985_v51  ;;  %v3512_v15 = vpack.i.bf16 %v1862_v63, %v2004_v58 }
 0x3d0   :  { %3488 = vrot.lane.b32.xlu1 %v3487_v36, %s3735_s15  ;;  %v3522_v33 = vpack.i.bf16 %v1985_v51, %v1931_v40  ;;  %v2021_v55 = vsel %vm1616_vm0, %v2018_v47, %v2020_v18  ;;  %v1932_v53 = vsel %vm1616_vm0, %v1929_v2, %v1931_v40  ;;  %v2023_v12 = vsel %vm1616_vm0, %v2020_v18, %v2022_v42 }
 0x3d1   :  { %3508 = vrot.lane.b32.xlu0 %v3507_v20, %s3735_s15  ;;  %v3517_v50 = vpack.i.bf16 %v1932_v53, %v2021_v55  ;;  %v3527_v47 = vpack.i.bf16 %v2023_v12, %v1984_v29  ;;  %v3562_v24 = vpack.i.bf16 %v1966_v52, %v5313_v59  ;;  %vm2534_vm0 = vcmask 637952  }
 0x3d4   :  { %3493 = vrot.lane.b32.xlu1 %v3492_v5, %s3735_s15 }
 0x3d5   :  { %3513 = vrot.lane.b32.xlu0 %v3512_v15, %s3735_s15 }
 0x3d8   :  { %3498 = vrot.lane.b32.xlu1 %v3497_v22, %s3736_s16 }
 0x3d9   :  { %3523 = vrot.lane.b32.xlu0 %v3522_v33, %s3736_s16 }
 0x3dc   :  { %3518 = vrot.lane.b32.xlu1 %v3517_v50, %s3736_s16 }
 0x3dd   :  { %2032 = vrot.lane.b32.xlu0 %v2022_v42, %s3736_s16 }
 0x3e0   :  { %3528 = vrot.lane.b32.xlu1 %v3527_v47, %s3736_s16 }
 0x3e1   :  { %3538 = vrot.lane.b32.xlu0 %v3537_v35, %s3738_s2  ;;  %v1909_v35 = vrot.slane %v5330_v19, 2 }
 0x3e3   :  { %v1910_v8 = vsel %vm1632_vm5, %v1867_v30, %v1909_v35 }
 0x3e4   :  { %3533 = vrot.lane.b32.xlu1 %v3532_v21, %s3739_s28 }
 0x3e5   :  { %3553 = vrot.lane.b32.xlu0 %v3552_v49, %s3736_s16 }
 0x3e8   :  { %3543 = vrot.lane.b32.xlu1 %v3542_v44, %s3735_s15 }
 0x3e9   :  { %3558 = vrot.lane.b32.xlu0 %v3557_v26, %s3736_s16 }
 0x3ec   :  { %3548 = vrot.lane.b32.xlu1 %v3547_v61, %s3735_s15 }
 0x3f0   :  { %3563 = vrot.lane.b32.xlu1 %v3562_v24, %s3741_s29 }
 0x40e   :  { %v3459_v9 = vpop.permute.xlu1 %3458  ;;  %v3464_v16 = vpop.permute.xlu0 %3463 }
 0x40f   :  { %v3460_v28 = vunpack.i.l.bf16 %v3459_v9  ;;  %v3461_v51 = vunpack.i.h.bf16 %v3459_v9  ;;  %v3466_v55 = vunpack.i.h.bf16 %v3464_v16  ;;  %v3465_v53 = vunpack.i.l.bf16 %v3464_v16 }
 0x411   :  { %v1944_v13 = vsel %vm1632_vm5, %v1909_v35, %v3460_v28  ;;  %v1997_v40 = vsel %vm1632_vm5, %v5336_v48, %v3461_v51 }
 0x412   :  { %v3567_v54 = vpack.i.bf16 %v1944_v13, %v1910_v8  ;;  %v3582_v50 = vpack.i.bf16 %v1997_v40, %v5289_v41 }
 0x414   :  { %3568 = vrot.lane.b32.xlu0 %v3567_v54, %s3739_s28 }
 0x42d   :  { %v5402_v43 = vpop.permute.xlu1 %3473  ;;  %v3469_v7 = vpop.permute.xlu0 %3468 }
 0x42e   :  { %v3470_v27 = vunpack.i.l.bf16 %v3469_v7  ;;  %v3471_v6 = vunpack.i.h.bf16 %v3469_v7  ;;  %v3475_v7 = vunpack.i.l.bf16 %v5402_v43 }
 0x430   :  { %v2035_v59 = vsel %vm1632_vm5, %v2000_v1, %v3470_v27  ;;  %v3476_v1 = vunpack.i.h.bf16 %v5402_v43 }
 0x431   :  { %v3592_v19 = vpack.i.bf16 %v2035_v59, %v5353_v45  ;;  %v3479_v10 = vpop.permute.xlu1 %3478  ;;  %v3484_v29 = vpop.permute.xlu0 %3483 }
 0x432   :  { %v3480_v56 = vunpack.i.l.bf16 %v3479_v10  ;;  %v3486_v33 = vunpack.i.h.bf16 %v3484_v29  ;;  %v3481_v11 = vunpack.i.h.bf16 %v3479_v10  ;;  %v3485_v0 = vunpack.i.l.bf16 %v3484_v29 }
 0x434   :  { %v3572_v37 = vpack.i.bf16 %v3480_v56, %v3471_v6  ;;  %v3597_v41 = vpack.i.bf16 %v3485_v0, %v3481_v11 }
 0x435   :  { %v5410_v36 = vpop.permute.xlu0 %3503 }
 0x436   :  { %3573 = vrot.lane.b32.xlu0 %v3572_v37, %s3739_s28  ;;  %v3505_v58 = vunpack.i.l.bf16 %v5410_v36  ;;  %v3506_v37 = vunpack.i.h.bf16 %v5410_v36 }
 0x43a   :  { %3593 = vrot.lane.b32.xlu0 %v3592_v19, %s3741_s29  ;;  %v2193_v19 = vld [vmem:[%s5855_s4] sm:$0xff] }
 0x442   :  { %v3489_v17 = vpop.permute.xlu1 %3488 }
 0x443   :  { %v3509_v20 = vpop.permute.xlu0 %3508  ;;  %v3491_v25 = vunpack.i.h.bf16 %v3489_v17  ;;  %v3490_v60 = vunpack.i.l.bf16 %v3489_v17 }
 0x444   :  { %v3510_v30 = vunpack.i.l.bf16 %v3509_v20  ;;  %v3511_v9 = vunpack.i.h.bf16 %v3509_v20 }
 0x445   :  { %v1998_v12 = vsel %vm1624_vm4, %v3491_v25, %v3466_v55 }
 0x446   :  { %v3494_v52 = vpop.permute.xlu1 %3493  ;;  %v3612_v4 = vpack.i.bf16 %v1998_v12, %v3510_v30 }
 0x447   :  { %v3495_v2 = vunpack.i.l.bf16 %v3494_v52  ;;  %v5414_v5 = vpop.permute.xlu0 %3513  ;;  %v3496_v22 = vunpack.i.h.bf16 %v3494_v52 }
 0x448   :  { %v3515_v28 = vunpack.i.l.bf16 %v5414_v5 }
 0x449   :  { %v3607_v34 = vpack.i.bf16 %v3495_v2, %v3486_v33  ;;  %v1945_v31 = vsel %vm1624_vm4, %v3496_v22, %v3465_v53 }
 0x44a   :  { %v3499_v23 = vpop.permute.xlu1 %3498  ;;  %v3587_v21 = vpack.i.bf16 %v1945_v31, %v3490_v60 }
 0x44b   :  { %v3501_v45 = vunpack.i.h.bf16 %v3499_v23  ;;  %v3500_v63 = vunpack.i.l.bf16 %v3499_v23  ;;  %v3524_v47 = vpop.permute.xlu0 %3523  ;;  %v2195_v23 = vld [vmem:[%s5855_s4 + $0x10] sm:$0xf] }
 0x44c   :  { %v3526_v24 = vunpack.i.h.bf16 %v3524_v47  ;;  %v3525_v35 = vunpack.i.l.bf16 %v3524_v47 }
 0x44d   :  { %v3577_v18 = vpack.i.bf16 %v3500_v63, %v3476_v1  ;;  %v3602_v15 = vpack.i.bf16 %v3505_v58, %v3501_v45 }
 0x44e   :  { %v5418_v42 = vpop.permute.xlu1 %3518 }
 0x44f   :  { %3578 = vrot.lane.b32.xlu1 %v3577_v18, %s3739_s28  ;;  %3603 = vrot.lane.b32.xlu0 %v3602_v15, %s3738_s2  ;;  %v3521_v14 = vunpack.i.h.bf16 %v5418_v42  ;;  %v2033_v44 = vpop.permute.xlu0 %2032  ;;  %v3520_v6 = vunpack.i.l.bf16 %v5418_v42  ;;  %v2194_v15 = vld [vmem:[%s5855_s4 + $0x8] sm:$0xff]  ;;  %s3753_s4 = smov 65  }
 0x451   :  { %v3617_v8 = vpack.i.bf16 %v3525_v35, %v3521_v14  ;;  %v3627_v36 = vpack.i.bf16 %v3520_v6, %v3506_v37 }
 0x452   :  { %v5425_v48 = vpop.permute.xlu1 %3528 }
 0x453   :  { %3583 = vrot.lane.b32.xlu1 %v3582_v50, %s3738_s2  ;;  %3608 = vrot.lane.b32.xlu0 %v3607_v34, %s3741_s29  ;;  %v3530_v26 = vunpack.i.l.bf16 %v5425_v48  ;;  %v3539_v59 = vpop.permute.xlu0 %3538  ;;  %v3531_v58 = vunpack.i.h.bf16 %v5425_v48  ;;  %v3516_v50 = vunpack.i.h.bf16 %v5414_v5 }
 0x454   :  { %v3541_v29 = vunpack.i.h.bf16 %v3539_v59  ;;  %v3540_v17 = vunpack.i.l.bf16 %v3539_v59 }
 0x455   :  { %v3632_v13 = vpack.i.bf16 %v3530_v26, %v3526_v24  ;;  %v3637_v18 = vpack.i.bf16 %v2033_v44, %v3531_v58  ;;  %v1906_v31 = vsel %vm1632_vm5, %v5285_v57, %v3516_v50  ;;  %vm2542_vm5 = vcmask 15360  }
 0x456   :  { %v3534_v49 = vpop.permute.xlu1 %3533 }
 0x457   :  { %3613 = vrot.lane.b32.xlu0 %v3612_v4, %s3738_s2  ;;  %3588 = vrot.lane.b32.xlu1 %v3587_v21, %s3739_s28  ;;  %v3536_v54 = vunpack.i.h.bf16 %v3534_v49  ;;  %v3535_v16 = vunpack.i.l.bf16 %v3534_v49  ;;  %v5473_v40 = vpop.permute.xlu0 %3553 }
 0x459   :  { %v2153_v43 = vsel %vm2151_vm6, %v5270_v38, %v3536_v54  ;;  %v2152_v56 = vsel %vm2151_vm6, %v5342_v46, %v3535_v16  ;;  %v3743_v46 = vmov 0.0  }
 0x45a   :  { %v5433_v61 = vpop.permute.xlu1 %3543  ;;  %v2165_v38 = vsel %vm2164_vm7, %v2152_v56, %v3540_v17  ;;  %v2166_v1 = vsel %vm2164_vm7, %v2153_v43, %v3541_v29  ;;  %3232 = vmatprep.mubr.msk.f32.mxu1 %vm3742_vm9, %v3743_v46  ;;  %3249 = vmatprep.mubr.msk.f32.mxu0 %vm3742_vm9, %v3743_v46 }
 0x45b   :  { %1899 = vrot.lane.b32.xlu0 %v5301_v62, %s3736_s16  ;;  %3598 = vrot.lane.b32.xlu1 %v3597_v41, %s3738_s2  ;;  %v2036_v62 = vsel %vm1624_vm4, %v3511_v9, %v3475_v7  ;;  %v5475_v25 = vpop.permute.xlu0 %3558  ;;  %v3546_v9 = vunpack.i.h.bf16 %v5433_v61  ;;  %s3747_s16 = smov 26  }
 0x45c   :  { %v3622_v10 = vpack.i.bf16 %v2036_v62, %v3515_v28 }
 0x45e   :  { %v5440_v27 = vpop.permute.xlu1 %3548 }
 0x45f   :  { %3633 = vrot.lane.b32.xlu0 %v3632_v13, %s3738_s2  ;;  %3618 = vrot.lane.b32.xlu1 %v3617_v8, %s3739_s28  ;;  %v3555_v8 = vunpack.i.l.bf16 %v5473_v40  ;;  %v3550_v13 = vunpack.i.l.bf16 %v5440_v27  ;;  %v3551_v17 = vunpack.i.h.bf16 %v5440_v27  ;;  %s3759_s28 = smov 104  }
 0x462   :  { %v3564_v52 = vpop.permute.xlu1 %3563 }
 0x463   :  { %v3566_v20 = vunpack.i.h.bf16 %v3564_v52  ;;  %v3565_v51 = vunpack.i.l.bf16 %v3564_v52  ;;  %2198 = vperm.xlu0 %3455, %v2193_v19   ;;  %3623 = vrot.lane.b32.xlu1 %v3622_v10, %s3741_s29  ;;  %v1907_v52 = vsel %vm1624_vm4, %v3550_v13, %v3555_v8 }
 0x465   :  { %v2178_v45 = vsel %vm2177_vm8, %v2165_v38, %v3565_v51  ;;  %v2179_v63 = vsel %vm2177_vm8, %v2166_v1, %v3566_v20 }
 0x466   :  { %v3326_v2 = vpack.c.bf16 %v2179_v63, %v2178_v45  ;;  %v3556_v63 = vunpack.i.h.bf16 %v5473_v40 }
 0x467   :  { %2208 = vperm.xlu0 %3455, %v2195_v23   ;;  %3628 = vrot.lane.b32.xlu1 %v3627_v36, %s3741_s29 }
 0x468   :  { %3327 = vmatpush3.bf16.msra.mxu1 %v3326_v2  ;;  %v3560_v2 = vunpack.i.l.bf16 %v5475_v25 }
 0x469   :  { %3328 = vmatprep.subr.bf16.mxu1 %v3740_v39 }
 0x46b   :  { %3638 = vrot.lane.b32.xlu1 %v3637_v18, %s3741_s29  ;;  %s3744_s29 = smov 101  }
 0x46f   :  { %2203 = vperm.xlu1 %3456, %v2194_v15  }
 0x486   :  { %v3569_v22 = vpop.permute.xlu0 %3568 }
 0x487   :  { %v3571_v30 = vunpack.i.h.bf16 %v3569_v22  ;;  %v3570_v34 = vunpack.i.l.bf16 %v3569_v22 }
 0x489   :  { %v2154_v11 = vsel %vm2151_vm6, %v5283_v32, %v3570_v34  ;;  %v2155_v0 = vsel %vm2151_vm6, %v1906_v31, %v3571_v30  ;;  %v3545_v32 = vunpack.i.l.bf16 %v5433_v61 }
 0x4a8   :  { %v3574_v42 = vpop.permute.xlu0 %3573 }
 0x4a9   :  { %v3576_v57 = vunpack.i.h.bf16 %v3574_v42  ;;  %v3575_v26 = vunpack.i.l.bf16 %v3574_v42 }
 0x4ab   :  { %v2157_v7 = vsel %vm2151_vm6, %v3546_v9, %v3576_v57  ;;  %v2156_v59 = vsel %vm2151_vm6, %v3545_v32, %v3575_v26 }
 0x4ac   :  { %v3594_v33 = vpop.permute.xlu0 %3593 }
 0x4ad   :  { %v3596_v4 = vunpack.i.h.bf16 %v3594_v33  ;;  %v3595_v21 = vunpack.i.l.bf16 %v3594_v33 }
 0x4c1   :  { %v5477_v55 = vpop.permute.xlu1 %3578  ;;  %v5479_v53 = vpop.permute.xlu0 %3603 }
 0x4c2   :  { %v3581_v20 = vunpack.i.h.bf16 %v5477_v55  ;;  %v3580_v23 = vunpack.i.l.bf16 %v5477_v55  ;;  %v3606_v18 = vunpack.i.h.bf16 %v5479_v53  ;;  %v3605_v15 = vunpack.i.l.bf16 %v5479_v53 }
 0x4c4   :  { %v2160_v33 = vsel %vm2151_vm6, %v3556_v63, %v3580_v23  ;;  %v2161_v55 = vsel %vm2151_vm6, %v3560_v2, %v3581_v20 }
 0x4c5   :  { %v3584_v12 = vpop.permute.xlu1 %3583  ;;  %v3609_v47 = vpop.permute.xlu0 %3608 }
 0x4c6   :  { %v3586_v48 = vunpack.i.h.bf16 %v3584_v12  ;;  %v3585_v60 = vunpack.i.l.bf16 %v3584_v12  ;;  %v3611_v62 = vunpack.i.h.bf16 %v3609_v47  ;;  %v3610_v19 = vunpack.i.l.bf16 %v3609_v47 }
 0x4c7   :  { %v3561_v47 = vunpack.i.h.bf16 %v5475_v25 }
 0x4c8   :  { %v2167_v49 = vsel %vm2164_vm7, %v2154_v11, %v3585_v60  ;;  %v2168_v5 = vsel %vm2164_vm7, %v2155_v0, %v3586_v48 }
 0x4c9   :  { %v3589_v41 = vpop.permute.xlu1 %3588  ;;  %v2180_v14 = vsel %vm2177_vm8, %v2167_v49, %v3595_v21  ;;  %v2181_v44 = vsel %vm2177_vm8, %v2168_v5, %v3596_v4  ;;  %v3614_v35 = vpop.permute.xlu0 %3613  ;;  %v2174_v4 = vsel %vm2164_vm7, %v2161_v55, %v3606_v18  ;;  %v2173_v21 = vsel %vm2164_vm7, %v2160_v33, %v3605_v15 }
 0x4ca   :  { %v3329_v24 = vpack.c.bf16 %v2181_v44, %v2180_v14  ;;  %v3591_v10 = vunpack.i.h.bf16 %v3589_v41  ;;  %v3590_v6 = vunpack.i.l.bf16 %v3589_v41  ;;  %v3616_v38 = vunpack.i.h.bf16 %v3614_v35 }
 0x4cb   :  { %v3615_v1 = vunpack.i.l.bf16 %v3614_v35 }
 0x4cc   :  { %3330 = vmatpush3.bf16.msra.mxu1 %v3329_v24  ;;  %v2159_v58 = vsel %vm2151_vm6, %v1907_v52, %v3591_v10  ;;  %v2158_v45 = vsel %vm2151_vm6, %v3551_v17, %v3590_v6  ;;  %v2351_v10 = vld [vmem:[%s5857_s6 + $0x8] sm:$0xff]  ;;  %v2352_v6 = vld [vmem:[%s5857_s6 + $0x10] sm:$0xff] }
 0x4cd   :  { %v3599_v28 = vpop.permute.xlu1 %3598  ;;  %3331 = vmatprep.subr.bf16.mxu1 %v3740_v39  ;;  %v1900_v51 = vpop.permute.xlu0 %1899  ;;  %v2171_v50 = vsel %vm2164_vm7, %v2158_v45, %v3615_v1  ;;  %v2172_v40 = vsel %vm2164_vm7, %v2159_v58, %v3616_v38 }
 0x4ce   :  { %v3601_v54 = vunpack.i.h.bf16 %v3599_v28  ;;  %v3600_v16 = vunpack.i.l.bf16 %v3599_v28 }
 0x4d0   :  { %v2170_v61 = vsel %vm2164_vm7, %v2157_v7, %v3601_v54  ;;  %v2169_v43 = vsel %vm2164_vm7, %v2156_v59, %v3600_v16  ;;  %v2190_v54 = vld [vmem:[%s5854_s3] sm:$0xff]  ;;  %v2191_v16 = vld [vmem:[%s5854_s3 + $0x8] sm:$0xff]  ;;  %v2192_v7 = vld [vmem:[%s5854_s3 + $0x10] sm:$0xf] }
 0x4d1   :  { %v3619_v56 = vpop.permute.xlu1 %3618  ;;  %v2182_v37 = vsel %vm2177_vm8, %v2169_v43, %v3610_v19  ;;  %v2183_v29 = vsel %vm2177_vm8, %v2170_v61, %v3611_v62  ;;  %v3634_v30 = vpop.permute.xlu0 %3633  ;;  %v2350_v19 = vld [vmem:[%s5857_s6] sm:$0xff] }
 0x4d2   :  { %v3332_v36 = vpack.c.bf16 %v2183_v29, %v2182_v37  ;;  %v3621_v34 = vunpack.i.h.bf16 %v3619_v56  ;;  %v3620_v12 = vunpack.i.l.bf16 %v3619_v56  ;;  %v3636_v49 = vunpack.i.h.bf16 %v3634_v30  ;;  %v2353_v37 = vld [vmem:[%s5857_s6 + $0x18] sm:$0x3]  ;;  %s3745_s6 = smov 74  }
 0x4d3   :  { %v3635_v5 = vunpack.i.l.bf16 %v3634_v30  ;;  %v3345_v56 = vpack.c.bf16 %v2351_v10, %v2350_v19  ;;  %v3348_v29 = vpack.c.bf16 %v2353_v37, %v2352_v6 }
 0x4d4   :  { %3333 = vmatpush3.bf16.msra.mxu1 %v3332_v36  ;;  %v2163_v41 = vsel %vm2151_vm6, %v1900_v51, %v3621_v34  ;;  %v2162_v14 = vsel %vm2151_vm6, %v3561_v47, %v3620_v12  ;;  %vm2544_vm6 = vcmask 121856  }
 0x4d5   :  { %v3624_v27 = vpop.permute.xlu1 %3623  ;;  %3334 = vmatprep.subr.bf16.mxu1 %v3740_v39  ;;  %v2175_v9 = vsel %vm2164_vm7, %v2162_v14, %v3635_v5  ;;  %v2176_v32 = vsel %vm2164_vm7, %v2163_v41, %v3636_v49  ;;  %3346 = vmatpush3.bf16.msra.mxu0 %v3345_v56 }
 0x4d6   :  { %v3626_v22 = vunpack.i.h.bf16 %v3624_v27  ;;  %v3625_v42 = vunpack.i.l.bf16 %v3624_v27  ;;  %3347 = vmatprep.subr.bf16.mxu0 %v3740_v39 }
 0x4d8   :  { %v2184_v31 = vsel %vm2177_vm8, %v2171_v50, %v3625_v42  ;;  %v2185_v48 = vsel %vm2177_vm8, %v2172_v40, %v3626_v22 }
 0x4d9   :  { %v3629_v53 = vpop.permute.xlu1 %3628  ;;  %v3335_v60 = vpack.c.bf16 %v2185_v48, %v2184_v31  ;;  %3350 = vmatpush3.bf16.msk.msra.mxu0 %vm5033_vm2, %v3348_v29 }
 0x4da   :  { %v3631_v11 = vunpack.i.h.bf16 %v3629_v53  ;;  %v3630_v0 = vunpack.i.l.bf16 %v3629_v53  ;;  %3264 = vmatprep.subr.mxu0 %v3743_v46 }
 0x4db   :  { %3336 = vmatpush3.bf16.msra.mxu1 %v3335_v60 }
 0x4dc   :  { %3337 = vmatprep.subr.bf16.mxu1 %v3740_v39  ;;  %v2186_v44 = vsel %vm2177_vm8, %v2173_v21, %v3630_v0  ;;  %v2187_v57 = vsel %vm2177_vm8, %v2174_v4, %v3631_v11 }
 0x4dd   :  { %v3639_v25 = vpop.permute.xlu1 %3638  ;;  %v3338_v26 = vpack.c.bf16 %v2187_v57, %v2186_v44 }
 0x4de   :  { %v3641_v24 = vunpack.i.h.bf16 %v3639_v25  ;;  %v3640_v35 = vunpack.i.l.bf16 %v3639_v25 }
 0x4df   :  { %3339 = vmatpush3.bf16.msra.mxu1 %v3338_v26 }
 0x4e0   :  { %v2188_v28 = vsel %vm2177_vm8, %v2175_v9, %v3640_v35  ;;  %v2189_v8 = vsel %vm2177_vm8, %v2176_v32, %v3641_v24  ;;  %3340 = vmatprep.subr.bf16.mxu1 %v3740_v39  ;;  %vm2546_vm8 = vcmask 228352  }
 0x4e1   :  { %v3341_v13 = vpack.c.bf16 %v2189_v8, %v2188_v28 }
 0x4e2   :  { %v2199_v59 = vpop.permute.xlu0 %2198 }
 0x4e3   :  { %3343 = vmatpush3.bf16.msk.msra.mxu1 %vm5033_vm2, %v3341_v13  ;;  %vm2538_vm2 = vcmask 850944  }
 0x4e6   :  { %3233 = vmatmul.mubr.msk.f32.vlgmr.msra.gmra.mrb[0].mxu1 %vm2211_vm10, %v2190_v54  ;;  %v2209_v23 = vpop.permute.xlu0 %2208 }
 0x4e7   :  { %3235 = vmatprep.mubr.msk.f32.mxu1 %vm3742_vm9, %v3743_v46 }
 0x4ea   :  { %3236 = vmatmul.mubr.msk.f32.gmra.mrb[2].mxu1 %vm2211_vm10, %v2191_v16 }
 0x4eb   :  { %3238 = vmatprep.mubr.msk.f32.mxu1 %vm3742_vm9, %v3743_v46 }
 0x4ee   :  { %3239 = vmatmul.mubr.msk.f32.gmra.mrb[4].mxu1 %vm2211_vm10, %v2192_v7  ;;  %v2204_v17 = vpop.permute.xlu1 %2203  ;;  %vm2548_vm10 = vcmask 334848  }
 0x5b9   :  { %v2290_v62 = vpop.f32.mrb[0].mxu1 }
 0x5ba   :  { %v2291_v61 = vadd.f32 %v2290_v62, %v2199_v59  ;;  %v3234_v43 = vpop.f32.mrb[1].mxu1 }
 0x5bc   :  { %2307 = vrot.lane.b32.xlu1 %v2291_v61, %s3744_s29 }
 0x5bd   :  { %v2295_v52 = vpop.f32.mrb[2].mxu1 }
 0x5be   :  { %v2296_v20 = vadd.f32 %v2295_v52, %v2204_v17  ;;  %v3237_v51 = vpop.f32.mrb[3].mxu1 }
 0x5c0   :  { %2309 = vrot.lane.b32.xlu0 %v2296_v20, %s3744_s29 }
 0x5c1   :  { %v2300_v38 = vpop.f32.mrb[4].mxu1 }
 0x5c2   :  { %v2301_v1 = vadd.f32 %v2300_v38, %v2209_v23  ;;  %v3240_v36 = vpop.f32.mrb[5].mxu1 }
 0x5c4   :  { %2311 = vrot.lane.b32.xlu1 %v2301_v1, %s3744_s29 }
 0x62e   :  { %v2308_v58 = vpop.permute.xlu1 %2307 }
 0x62f   :  { %v2316_v45 = vmax.f32 %v2291_v61, %v2308_v58 }
 0x631   :  { %2322 = vrot.lane.b32.xlu0 %v2316_v45, %s3735_s15 }
 0x632   :  { %v2310_v63 = vpop.permute.xlu0 %2309 }
 0x633   :  { %v2317_v2 = vmax.f32 %v2296_v20, %v2310_v63 }
 0x635   :  { %2324 = vrot.lane.b32.xlu1 %v2317_v2, %s3735_s15 }
 0x636   :  { %v2312_v27 = vpop.permute.xlu1 %2311 }
 0x637   :  { %v2318_v18 = vmax.f32 %v2301_v1, %v2312_v27 }
 0x639   :  { %2326 = vrot.lane.b32.xlu0 %v2318_v18, %s3735_s15  ;;  %s3746_s15 = smov 13  }
 0x6a3   :  { %v2323_v3 = vpop.permute.xlu0 %2322 }
 0x6a4   :  { %v2331_v15 = vmax.f32 %v2316_v45, %v2323_v3 }
 0x6a6   :  { %v2337_v22 = vrot.slane %v2331_v15, 4  ;;  %3250 = vmatmul.mubr.msk.f32.vlgmr.msra.gmra.mrb[10].mxu0 %vm2354_vm11, %v2331_v15 }
 0x6a7   :  { %v2325_v42 = vpop.permute.xlu1 %2324  ;;  %3252 = vmatprep.mubr.msk.f32.mxu0 %vm3742_vm9, %v3743_v46 }
 0x6a8   :  { %v2332_v33 = vmax.f32 %v2317_v2, %v2325_v42  ;;  %2342 = vrot.lane.b32.xlu1 %v2337_v22, %s3745_s6 }
 0x6aa   :  { %v2338_v55 = vrot.slane %v2332_v33, 4  ;;  %3253 = vmatmul.mubr.msk.f32.gmra.mrb[12].mxu0 %vm2354_vm11, %v2332_v33  ;;  %v2684_v33 = vld [vmem:[%s5858_s7 + $0x80] sm:$0xff] }
 0x6ab   :  { %v2327_v50 = vpop.permute.xlu0 %2326  ;;  %3255 = vmatprep.mubr.msk.f32.mxu0 %vm3742_vm9, %v3743_v46 }
 0x6ac   :  { %v2333_v40 = vmax.f32 %v2318_v18, %v2327_v50  ;;  %v2339_v30 = vsel %vm1624_vm4, %v2337_v22, %v2338_v55  ;;  %v2668_v50 = vld [vmem:[%s5858_s7] sm:$0xff] }
 0x6ad   :  { %2344 = vrot.lane.b32.xlu0 %v2339_v30, %s3745_s6 }
 0x6ae   :  { %v2340_v34 = vrot.slane %v2333_v40, 4 }
 0x6b0   :  { %v2341_v12 = vsel %vm1624_vm4, %v2338_v55, %v2340_v34  ;;  %v2685_v55 = vld [vmem:[%s5858_s7 + $0x88] sm:$0xff] }
 0x6b1   :  { %2346 = vrot.lane.b32.xlu1 %v2341_v12, %s3745_s6  ;;  %v3351_v34 = vpack.c.bf16 %v2685_v55, %v2684_v33  ;;  %v2669_v12 = vld [vmem:[%s5858_s7 + $0x8] sm:$0xff] }
 0x6b3   :  { %3352 = vmatprep.subr.bf16.mxu1 %v3351_v34 }
 0x71a   :  { %v2343_v31 = vpop.permute.xlu1 %2342 }
 0x71b   :  { %v2349_v48 = vsel %vm1624_vm4, %v2333_v40, %v2343_v31  ;;  %v2686_v31 = vld [vmem:[%s5858_s7 + $0x90] sm:$0xff] }
 0x71c   :  { %3256 = vmatmul.mubr.msk.f32.gmra.mrb[14].mxu0 %vm2354_vm11, %v2349_v48  ;;  %v3353_v48 = vpack.c.bf16 %v2669_v12, %v2668_v50 }
 0x71d   :  { %3258 = vmatprep.mubr.msk.f32.mxu0 %vm3742_vm9, %v3743_v46 }
 0x71e   :  { %3354 = vmatpush3.bf16.msra.mxu1 %v3353_v48 }
 0x71f   :  { %v2345_v53 = vpop.permute.xlu0 %2344 }
 0x720   :  { %3259 = vmatmul.mubr.msk.f32.gmra.mrb[16].mxu0 %vm2354_vm11, %v2345_v53  ;;  %v2687_v53 = vld [vmem:[%s5858_s7 + $0x98] sm:$0xff] }
 0x721   :  { %3261 = vmatprep.mubr.msk.f32.mxu0 %vm3742_vm9, %v3743_v46 }
 0x723   :  { %v2347_v60 = vpop.permute.xlu1 %2346 }
 0x724   :  { %3262 = vmatmul.mubr.msk.f32.gmra.mrb[18].mxu0 %vm2354_vm11, %v2347_v60  ;;  %v2670_v60 = vld [vmem:[%s5858_s7 + $0x10] sm:$0xff] }
 0x725   :  { %3266 = vmatprep.mubr.msk.f32.mxu0 %vm3742_vm9, %v3743_v46 }
 0x779   :  { %v2435_v47 = vpop.f32.mrb[10].mxu0 }
 0x77a   :  { %v3251_v11 = vpop.f32.mrb[11].mxu0  ;;  %v5608_v43 = vmax.f32 %v2435_v47, 0.0  ;;  %v2671_v47 = vld [vmem:[%s5858_s7 + $0x18] sm:$0xff] }
 0x77c   :  { %v2465_v37 = vrot.slane %v5608_v43, 1  ;;  %v2469_v29 = vrot.slane %v5608_v43, 2  ;;  %v2477_v20 = vrot.slane %v5608_v43, 4  ;;  %v2481_v51 = vrot.slane %v5608_v43, 5 }
 0x77d   :  { %v2440_v0 = vpop.f32.mrb[12].mxu0  ;;  %v2485_v36 = vrot.slane %v5608_v43, 6  ;;  %v2473_v58 = vrot.slane %v5608_v43, 3  ;;  %v2489_v27 = vrot.slane %v5608_v43, 7 }
 0x77e   :  { %v3254_v4 = vpop.f32.mrb[13].mxu0  ;;  %v5586_v41 = vmax.f32 %v2440_v0, 0.0 }
 0x780   :  { %v2497_v26 = vrot.slane %v5586_v41, 1  ;;  %v2501_v24 = vrot.slane %v5586_v41, 2  ;;  %v2505_v32 = vrot.slane %v5586_v41, 3  ;;  %v2513_v18 = vrot.slane %v5586_v41, 5 }
 0x781   :  { %v2517_v40 = vrot.slane %v5586_v41, 6  ;;  %v2509_v30 = vrot.slane %v5586_v41, 4 }
 0x7ef   :  { %v2445_v21 = vpop.f32.mrb[14].mxu0 }
 0x7f0   :  { %v5584_v49 = vmax.f32 %v2445_v21, 0.0  ;;  %v3257_v5 = vpop.f32.mrb[15].mxu0  ;;  %v3355_v21 = vpack.c.bf16 %v2687_v53, %v2686_v31 }
 0x7f1   :  { %v2688_v5 = vld [vmem:[%s5858_s7 + $0xa0] sm:$0xff] }
 0x7f2   :  { %v2554_v14 = vrot.slane %v5584_v49, 1  ;;  %v2558_v61 = vrot.slane %v5584_v49, 2  ;;  %v2562_v56 = vrot.slane %v5584_v49, 3  ;;  %3356 = vmatprep.subr.bf16.mxu1 %v3355_v21 }
 0x7f3   :  { %v2450_v44 = vpop.f32.mrb[16].mxu0 }
 0x7f4   :  { %v5589_v57 = vmax.f32 %v2450_v44, 0.0  ;;  %2555 = vrot.lane.b32.xlu0 %v2554_v14, %s3746_s15  ;;  %v3260_v25 = vpop.f32.mrb[17].mxu0  ;;  %v2689_v14 = vld [vmem:[%s5858_s7 + $0xa8] sm:$0xff]  ;;  %v3357_v44 = vpack.c.bf16 %v2671_v47, %v2670_v60 }
 0x7f5   :  { %v2521_v25 = vrot.slane %v5586_v41, 7 }
 0x7f6   :  { %v2595_v35 = vrot.slane %v5589_v57, 1  ;;  %v2599_v9 = vrot.slane %v5589_v57, 2  ;;  %v2603_v28 = vrot.slane %v5589_v57, 3  ;;  %v3682_v13 = vpack.i.bf16 %v5586_v41, %v5589_v57  ;;  %3358 = vmatpush3.bf16.msra.mxu1 %v3357_v44 }
 0x7f7   :  { %v2455_v8 = vpop.f32.mrb[18].mxu0  ;;  %v2576_v17 = vrot.slane %v5589_v57, 4  ;;  %v2580_v52 = vrot.slane %v5589_v57, 5  ;;  %v2584_v1 = vrot.slane %v5589_v57, 6  ;;  %v2588_v63 = vrot.slane %v5589_v57, 7 }
 0x7f8   :  { %v5600_v54 = vmax.f32 %v2455_v8, 0.0  ;;  %v3263_v16 = vpop.f32.mrb[19].mxu0  ;;  %v3642_v7 = vpack.i.bf16 %v2497_v26, %v2595_v35  ;;  %v3647_v59 = vpack.i.bf16 %v2501_v24, %v2599_v9  ;;  %v3652_v62 = vpack.i.bf16 %v2505_v32, %v2603_v28  ;;  %v2672_v26 = vld [vmem:[%s5858_s7 + $0x20] sm:$0xff]  ;;  %v2673_v24 = vld [vmem:[%s5858_s7 + $0x28] sm:$0xff]  ;;  %v2690_v9 = vld [vmem:[%s5858_s7 + $0xb0] sm:$0xff] }
 0x7f9   :  { %v3657_v23 = vpack.i.bf16 %v2477_v20, %v2576_v17  ;;  %v3662_v38 = vpack.i.bf16 %v2481_v51, %v2580_v52  ;;  %v3667_v45 = vpack.i.bf16 %v2485_v36, %v2584_v1  ;;  %v3672_v3 = vpack.i.bf16 %v2489_v27, %v2588_v63  ;;  %v2691_v32 = vld [vmem:[%s5858_s7 + $0xb8] sm:$0xff]  ;;  %v2700_v8 = vld [vmem:[%s5858_s7 + $0x100] sm:$0xf]  ;;  %v2678_v17 = vld [vmem:[%s5858_s7 + $0x50] sm:$0xff] }
 0x7fa   :  { %v2640_v19 = vrot.slane %v5600_v54, 2  ;;  %v2636_v10 = vrot.slane %v5600_v54, 1  ;;  %v2644_v6 = vrot.slane %v5600_v54, 3  ;;  %v2612_v2 = vrot.slane %v5600_v54, 5  ;;  %3265 = vmatpush3.msk.msra.mxu0 %vm1624_vm4, %v2700_v8  ;;  %v2679_v52 = vld [vmem:[%s5858_s7 + $0x58] sm:$0xff]  ;;  %v2696_v20 = vld [vmem:[%s5858_s7 + $0xe0] sm:$0xff] }
 0x7fb   :  { %v2616_v22 = vrot.slane %v5600_v54, 6  ;;  %v2608_v42 = vrot.slane %v5600_v54, 4  ;;  %v2620_v4 = vrot.slane %v5600_v54, 7  ;;  %v3359_v35 = vpack.c.bf16 %v2689_v14, %v2688_v5  ;;  %3383 = vmatprep.subr.bf16.mxu0 %v3740_v39  ;;  %v2697_v51 = vld [vmem:[%s5858_s7 + $0xe8] sm:$0xff]  ;;  %v2680_v1 = vld [vmem:[%s5858_s7 + $0x60] sm:$0xff]  ;;  %v2699_v63 = vld [vmem:[%s5858_s7 + $0xf8] sm:$0xff] }
 0x7fc   :  { %2641 = vrot.lane.b32.xlu1 %v2640_v19, %s3747_s16  ;;  %2637 = vrot.lane.b32.xlu0 %v2636_v10, %s3746_s15  ;;  %v3687_v15 = vpack.i.bf16 %v2513_v18, %v2612_v2  ;;  %v3361_v16 = vpack.c.bf16 %v2673_v24, %v2672_v26  ;;  %v2692_v19 = vld [vmem:[%s5858_s7 + $0xc0] sm:$0xff]  ;;  %v2693_v10 = vld [vmem:[%s5858_s7 + $0xc8] sm:$0xff]  ;;  %vm2664_vm4 = vcmask 1040384  }
 0x7fd   :  { %v3692_v11 = vpack.i.bf16 %v2517_v40, %v2616_v22  ;;  %v3677_v0 = vpack.i.bf16 %v2509_v30, %v2608_v42  ;;  %v3697_v28 = vpack.i.bf16 %v2521_v25, %v2620_v4  ;;  %3360 = vmatprep.subr.bf16.mxu1 %v3359_v35  ;;  %v3367_v57 = vpack.c.bf16 %v2693_v10, %v2692_v19  ;;  %v2681_v36 = vld [vmem:[%s5858_s7 + $0x68] sm:$0xff]  ;;  %v2682_v18 = vld [vmem:[%s5858_s7 + $0x70] sm:$0xff] }
 0x7fe   :  { %3362 = vmatpush3.bf16.msra.mxu1 %v3361_v16 }
 0x800   :  { %2645 = vrot.lane.b32.xlu1 %v2644_v6, %s3748_s30  ;;  %2559 = vrot.lane.b32.xlu0 %v2558_v61, %s3747_s16  ;;  %v2677_v6 = vld [vmem:[%s5858_s7 + $0x48] sm:$0xff]  ;;  %v2694_v61 = vld [vmem:[%s5858_s7 + $0xd0] sm:$0xff] }
 0x804   :  { %2563 = vrot.lane.b32.xlu1 %v2562_v56, %s3748_s30  ;;  %3643 = vrot.lane.b32.xlu0 %v3642_v7, %s3749_s1  ;;  %v3363_v7 = vpack.c.bf16 %v2691_v32, %v2690_v9  ;;  %v2695_v56 = vld [vmem:[%s5858_s7 + $0xd8] sm:$0xff] }
 0x806   :  { %3364 = vmatprep.subr.bf16.mxu1 %v3363_v7 }
 0x808   :  { %3648 = vrot.lane.b32.xlu1 %v3647_v59, %s3750_s14  ;;  %2466 = vrot.lane.b32.xlu0 %v2465_v37, %s3746_s15  ;;  %v2674_v59 = vld [vmem:[%s5858_s7 + $0x30] sm:$0xff] }
 0x80c   :  { %3653 = vrot.lane.b32.xlu1 %v3652_v62, %s3751_s17  ;;  %2470 = vrot.lane.b32.xlu0 %v2469_v29, %s3747_s16  ;;  %v2675_v62 = vld [vmem:[%s5858_s7 + $0x38] sm:$0xff]  ;;  %v3371_v29 = vpack.c.bf16 %v2695_v56, %v2694_v61 }
 0x80d   :  { %v3365_v41 = vpack.c.bf16 %v2675_v62, %v2674_v59 }
 0x80f   :  { %3366 = vmatpush3.bf16.msra.mxu1 %v3365_v41 }
 0x810   :  { %3658 = vrot.lane.b32.xlu1 %v3657_v23, %s3752_s18  ;;  %3663 = vrot.lane.b32.xlu0 %v3662_v38, %s3753_s4  ;;  %v3373_v23 = vpack.c.bf16 %v2679_v52, %v2678_v17  ;;  %v3375_v38 = vpack.c.bf16 %v2697_v51, %v2696_v20 }
 0x811   :  { %3368 = vmatprep.subr.bf16.mxu1 %v3367_v57 }
 0x814   :  { %2474 = vrot.lane.b32.xlu1 %v2473_v58, %s3748_s30  ;;  %3668 = vrot.lane.b32.xlu0 %v3667_v45, %s3754_s19  ;;  %s3757_s19 = smov 28   ;;  %v2698_v58 = vld [vmem:[%s5858_s7 + $0xf0] sm:$0xff]  ;;  %v3377_v45 = vpack.c.bf16 %v2681_v36, %v2680_v1 }
 0x815   :  { %v3379_v27 = vpack.c.bf16 %v2699_v63, %v2698_v58 }
 0x818   :  { %3673 = vrot.lane.b32.xlu0 %v3672_v3, %s3755_s24  ;;  %3688 = vrot.lane.b32.xlu1 %v3687_v15, %s3756_s25  ;;  %v2683_v3 = vld [vmem:[%s5858_s7 + $0x78] sm:$0xff] }
 0x819   :  { %v3381_v15 = vpack.c.bf16 %v2683_v3, %v2682_v18 }
 0x81c   :  { %3693 = vrot.lane.b32.xlu1 %v3692_v11, %s3738_s2  ;;  %3678 = vrot.lane.b32.xlu0 %v3677_v0, %s3757_s19 }
 0x820   :  { %3698 = vrot.lane.b32.xlu1 %v3697_v28, %s3758_s27  ;;  %3683 = vrot.lane.b32.xlu0 %v3682_v13, %s3759_s28  ;;  %v2676_v13 = vld [vmem:[%s5858_s7 + $0x40] sm:$0xff]  ;;  %s3761_s28 = smov [#allocation2]  }
 0x821   :  { %v3369_v37 = vpack.c.bf16 %v2677_v6, %v2676_v13  ;;  %s3042_s3 = sshll.u32 %s3761_s28, 4  ;;  %s3043_s3 = int_to_ptr.vmem [resolvable:$true] %s3042_s3 }
 0x822   :  { %p3707_p1 = scmp.lt.s32.totalorder %s3043_s3, %s3043_s3 }
 0x823   :  { %3370 = vmatpush3.bf16.msra.mxu1 %v3369_v37 }
 0x824   :  { %3372 = vmatprep.subr.bf16.mxu1 %v3371_v29 }
 0x827   :  { %3374 = vmatpush3.bf16.msra.mxu1 %v3373_v23 }
 0x828   :  { %3376 = vmatprep.subr.bf16.mxu1 %v3375_v38 }
 0x82b   :  { %3378 = vmatpush3.bf16.msra.mxu1 %v3377_v45 }
 0x82c   :  { %3380 = vmatprep.subr.bf16.mxu1 %v3379_v27 }
 0x82f   :  { %3382 = vmatpush3.bf16.msra.mxu1 %v3381_v15 }
 0x830   :  { %3395 = vmatprep.subr.bf16.mxu1 %v3740_v39 }
 0x866   :  { %v2556_v2 = vpop.permute.xlu0 %2555 }
 0x867   :  { %v2566_v34 = vsel %vm2525_vm12, %v5584_v49, %v2556_v2 }
 0x86e   :  { %v2642_v22 = vpop.permute.xlu1 %2641  ;;  %v2638_v42 = vpop.permute.xlu0 %2637 }
 0x86f   :  { %v2648_v33 = vsel %vm2525_vm12, %v5600_v54, %v2638_v42 }
 0x870   :  { %v2649_v50 = vsel %vm2354_vm11, %v2648_v33, %v2642_v22 }
 0x872   :  { %v2646_v55 = vpop.permute.xlu1 %2645  ;;  %v2560_v40 = vpop.permute.xlu0 %2559 }
 0x873   :  { %v2650_v30 = vsel %vm2528_vm13, %v2649_v50, %v2646_v55  ;;  %v2567_v12 = vsel %vm2354_vm11, %v2566_v34, %v2560_v40 }
 0x874   :  { %2652 = vrot.lane.b32.xlu1 %v2650_v30, %s3760_s5 }
 0x876   :  { %v2564_v31 = vpop.permute.xlu1 %2563  ;;  %v5746_v48 = vpop.permute.xlu0 %3643 }
 0x877   :  { %v2568_v54 = vsel %vm2528_vm13, %v2567_v12, %v2564_v31  ;;  %v3645_v61 = vunpack.i.l.bf16 %v5746_v48  ;;  %v3646_v52 = vunpack.i.h.bf16 %v5746_v48 }
 0x878   :  { %2570 = vrot.lane.b32.xlu0 %v2568_v54, %s3760_s5 }
 0x87a   :  { %v5749_v53 = vpop.permute.xlu1 %3648  ;;  %v2467_v60 = vpop.permute.xlu0 %2466 }
 0x87b   :  { %v2526_v21 = vsel %vm2525_vm12, %v5608_v43, %v2467_v60  ;;  %v3650_v36 = vunpack.i.l.bf16 %v5749_v53  ;;  %v3651_v2 = vunpack.i.h.bf16 %v5749_v53  ;;  %vm2573_vm12 = vcmask 654336  }
 0x87d   :  { %v2630_v27 = vsel %vm2542_vm5, %v3645_v61, %v3650_v36  ;;  %v2543_v33 = vsel %vm2542_vm5, %v3646_v52, %v3651_v2 }
 0x87e   :  { %v5751_v47 = vpop.permute.xlu1 %3653  ;;  %v2471_v11 = vpop.permute.xlu0 %2470 }
 0x87f   :  { %v2527_v49 = vsel %vm2354_vm11, %v2526_v21, %v2471_v11  ;;  %v3655_v58 = vunpack.i.l.bf16 %v5751_v47  ;;  %v3656_v18 = vunpack.i.h.bf16 %v5751_v47  ;;  %vm2551_vm11 = vcmask 547840  }
 0x881   :  { %v2631_v3 = vsel %vm2544_vm6, %v2630_v27, %v3655_v58  ;;  %v2545_v50 = vsel %vm2544_vm6, %v2543_v33, %v3656_v18  ;;  %v2952_v58 = vld [vmem:[%s5862_s11 + $0x30] sm:$0xff] }
 0x882   :  { %v3659_v0 = vpop.permute.xlu1 %3658  ;;  %v3664_v4 = vpop.permute.xlu0 %3663 }
 0x883   :  { %v3661_v26 = vunpack.i.h.bf16 %v3659_v0  ;;  %v3660_v24 = vunpack.i.l.bf16 %v3659_v0  ;;  %v3666_v9 = vunpack.i.h.bf16 %v3664_v4  ;;  %v3665_v32 = vunpack.i.l.bf16 %v3664_v4  ;;  %v2856_v0 = vld [vmem:[%s5860_s9] sm:$0xff]  ;;  %v2857_v4 = vld [vmem:[%s5860_s9 + $0x8] sm:$0xff] }
 0x885   :  { %v2624_v8 = vsel %vm2530_vm14, %v2568_v54, %v3660_v24 }
 0x886   :  { %v2475_v5 = vpop.permute.xlu1 %2474  ;;  %v3669_v14 = vpop.permute.xlu0 %3668  ;;  %v2625_v19 = vsel %vm2532_vm15, %v2624_v8, %v3665_v32  ;;  %v2858_v32 = vld [vmem:[%s5860_s9 + $0x10] sm:$0xff] }
 0x887   :  { %v2529_v44 = vsel %vm2528_vm13, %v2527_v49, %v2475_v5  ;;  %v3671_v16 = vunpack.i.h.bf16 %v3669_v14  ;;  %v3670_v7 = vunpack.i.l.bf16 %v3669_v14  ;;  %vm2708_vm13 = vcmask 31744  }
 0x888   :  { %v2531_v35 = vsel %vm2530_vm14, %v2529_v44, %v3661_v26  ;;  %v3384_v14 = vpack.c.bf16 %v2857_v4, %v2856_v0 }
 0x889   :  { %v2533_v59 = vsel %vm2532_vm15, %v2531_v35, %v3666_v9  ;;  %v2626_v57 = vsel %vm2534_vm0, %v2625_v19, %v3670_v7  ;;  %v2862_v7 = vld [vmem:[%s5860_s9 + $0x30] sm:$0xff]  ;;  %v2947_v19 = vld [vmem:[%s5862_s11 + $0x8] sm:$0xff] }
 0x88a   :  { %v3674_v25 = vpop.permute.xlu0 %3673  ;;  %v2535_v41 = vsel %vm2534_vm0, %v2533_v59, %v3671_v16  ;;  %v3689_v1 = vpop.permute.xlu1 %3688  ;;  %v2860_v16 = vld [vmem:[%s5860_s9 + $0x20] sm:$0xff] }
 0x88b   :  { %v3676_v43 = vunpack.i.h.bf16 %v3674_v25  ;;  %v3675_v62 = vunpack.i.l.bf16 %v3674_v25  ;;  %v3690_v42 = vunpack.i.l.bf16 %v3689_v1  ;;  %v3691_v12 = vunpack.i.h.bf16 %v3689_v1 }
 0x88d   :  { %v2537_v56 = vsel %vm2536_vm1, %v2535_v41, %v3676_v43  ;;  %v2627_v37 = vsel %vm2536_vm1, %v2626_v57, %v3675_v62  ;;  %v2863_v43 = vld [vmem:[%s5860_s9 + $0x38] sm:$0xff]  ;;  %v2946_v62 = vld [vmem:[%s5862_s11] sm:$0xff] }
 0x88e   :  { %v3679_v28 = vpop.permute.xlu0 %3678  ;;  %v3694_v45 = vpop.permute.xlu1 %3693  ;;  %v3393_v41 = vpack.c.bf16 %v2863_v43, %v2862_v7  ;;  %v3396_v57 = vpack.c.bf16 %v2947_v19, %v2946_v62 }
 0x88f   :  { %v3680_v63 = vunpack.i.l.bf16 %v3679_v28  ;;  %v3681_v15 = vunpack.i.h.bf16 %v3679_v28  ;;  %v3695_v30 = vunpack.i.l.bf16 %v3694_v45  ;;  %v3696_v53 = vunpack.i.h.bf16 %v3694_v45  ;;  %v2859_v28 = vld [vmem:[%s5860_s9 + $0x18] sm:$0xff] }
 0x890   :  { %v3387_v8 = vpack.c.bf16 %v2859_v28, %v2858_v32 }
 0x891   :  { %v2632_v22 = vsel %vm2546_vm8, %v2631_v3, %v3680_v63  ;;  %v2547_v34 = vsel %vm2546_vm8, %v2545_v50, %v3681_v15  ;;  %v3076_v63 = vld [vmem:[%s5861_s10] ss:$0 sm:$0xff] }
 0x892   :  { %v3684_v10 = vpop.permute.xlu0 %3683  ;;  %v3699_v55 = vpop.permute.xlu1 %3698  ;;  %v2633_v40 = vsel %vm2548_vm10, %v2632_v22, %v3690_v42  ;;  %v2549_v54 = vsel %vm2548_vm10, %v2547_v34, %v3691_v12  ;;  %v3078_v15 = vld [vmem:[%s5863_s12] ss:$0 sm:$0xff] }
 0x893   :  { %v3686_v13 = vunpack.i.h.bf16 %v3684_v10  ;;  %v3685_v6 = vunpack.i.l.bf16 %v3684_v10  ;;  %v3700_v31 = vunpack.i.l.bf16 %v3699_v55  ;;  %v2634_v48 = vsel %vm2164_vm7, %v2633_v40, %v3695_v30  ;;  %v2948_v10 = vld [vmem:[%s5862_s11 + $0x10] sm:$0xff] }
 0x894   :  { %v3701_v60 = vunpack.i.h.bf16 %v3699_v55  ;;  %v2550_v49 = vsel %vm2164_vm7, %v2549_v54, %v3696_v53  ;;  %vm2871_vm7 = vcmask 523264  }
 0x895   :  { %v2539_v29 = vsel %vm2538_vm2, %v2537_v56, %v3686_v13  ;;  %v2628_v17 = vsel %vm2538_vm2, %v2627_v37, %v3685_v6  ;;  %v2635_v11 = vsel %vm2551_vm11, %v2634_v48, %v3700_v31  ;;  %v2949_v13 = vld [vmem:[%s5862_s11 + $0x18] sm:$0xff]  ;;  %v2951_v56 = vld [vmem:[%s5862_s11 + $0x28] sm:$0xff] }
 0x896   :  { %v2629_v20 = vsel %vm2540_vm3, %v2628_v17, %v3645_v61  ;;  %v2541_v23 = vsel %vm2540_vm3, %v2539_v29, %v3646_v52  ;;  %v2552_v26 = vsel %vm2551_vm11, %v2550_v49, %v3701_v60  ;;  %v3399_v6 = vpack.c.bf16 %v2949_v13, %v2948_v10  ;;  %v2950_v61 = vld [vmem:[%s5862_s11 + $0x20] sm:$0xff] }
 0x897   :  { %v2658_v51 = vrot.slane %v2629_v20, 3  ;;  %v3402_v37 = vpack.c.bf16 %v2951_v56, %v2950_v61  ;;  %v3073_v20 = vld [vmem:[%s5859_s8] ss:$0 sm:$0xff] }
 0x899   :  { %v2665_v38 = vsel %vm2664_vm4, %v2541_v23, %v2658_v51 }
 0x8e6   :  { %v2653_v47 = vpop.permute.xlu1 %2652 }
 0x8e7   :  { %v2655_v21 = vsel %vm2573_vm12, %v2635_v11, %v2653_v47  ;;  %v2660_v5 = vrot.slane %v2653_v47, 3 }
 0x8e8   :  { %v2659_v44 = vrot.slane %v2655_v21, 3 }
 0x8ea   :  { %v2571_v25 = vpop.permute.xlu0 %2570 }
 0x8eb   :  { %v2574_v24 = vsel %vm2573_vm12, %v2552_v26, %v2571_v25  ;;  %v2667_v35 = vsel %vm2664_vm4, %v2571_v25, %v2660_v5 }
 0x8ec   :  { %3267 = vmatmul.mubr.msk.f32.vlgmr.msra.gmra.mrb[20].mxu0 %vm2708_vm13, %v2667_v35  ;;  %v2666_v9 = vsel %vm2664_vm4, %v2574_v24, %v2659_v44 }
 0x8ed   :  { %2779 = vmatprep.mubr.f32.mxu1 %v2666_v9  ;;  %3385 = vmatpush3.bf16.msra.mxu0 %v3384_v14 }
 0x8ee   :  { %2780 = vmatmul.mubr.f32.vlgmr.msra.gmra.mrb[6].mxu1 %v2665_v38  ;;  %3386 = vmatprep.subr.bf16.mxu0 %v3740_v39 }
 0x8ef   :  { %3285 = vmatprep.mubr.msk.f32.mxu0 %vm3742_vm9, %v3743_v46  ;;  %3304 = vmatprep.mubr.msk.f32.mxu1 %vm3742_vm9, %v3743_v46  ;;  %v2861_v46 = vld [vmem:[%s5860_s9 + $0x28] sm:$0xff]  ;;  %vm3034_vm9 = vcmask 17408  }
 0x8f0   :  { %v3390_v59 = vpack.c.bf16 %v2861_v46, %v2860_v16  ;;  %3397 = vmatpush3.bf16.msra.mxu1 %v3396_v57 }
 0x8f1   :  { %3388 = vmatpush3.bf16.msra.mxu0 %v3387_v8  ;;  %3398 = vmatprep.subr.bf16.mxu1 %v3740_v39 }
 0x8f2   :  { %3389 = vmatprep.subr.bf16.mxu0 %v3740_v39 }
 0x8f4   :  { %3400 = vmatpush3.bf16.msra.mxu1 %v3399_v6 }
 0x8f5   :  { %3391 = vmatpush3.bf16.msra.mxu0 %v3390_v59  ;;  %3401 = vmatprep.subr.bf16.mxu1 %v3740_v39 }
 0x8f6   :  { %3392 = vmatprep.subr.bf16.mxu0 %v3740_v39 }
 0x8f8   :  { %3403 = vmatpush3.bf16.msra.mxu1 %v3402_v37 }
 0x8f9   :  { %3394 = vmatpush3.bf16.msra.mxu0 %v3393_v41  ;;  %3404 = vmatprep.subr.bf16.mxu1 %v3740_v39  ;;  %v2953_v39 = vld [vmem:[%s5862_s11 + $0x38] sm:$0xff]  ;;  %s3702_s11 = scalar_lea.vmem %s3043_s3, 32 }
 0x8fa   :  { %v3405_v45 = vpack.c.bf16 %v2953_v39, %v2952_v58  ;;  %p3703_p0 = scmp.ne.s32.totalorder %s3043_s3, %s3702_s11  ;;  %p3708_p2 = scmp.lt.s32.totalorder %s3702_s11, %s3702_s11 }
 0x8fc   :  { %3406 = vmatpush3.bf16.msra.mxu1 %v3405_v45  ;;  %p3709_p3 = por %p3708_p2, %p3707_p1 }
 0x8fe   :  { %p3710_p4 = pnand %p3709_p3, %p3703_p0 }
 0x9bf   :  { %v2851_v29 = vpop.f32.mrb[20].mxu0 }
 0x9c0   :  { %v3268_v17 = vpop.f32.mrb[21].mxu0 }
 0x9c1   :  { %v3154_v52 = vpop.f32.mrb[6].mxu1 }
 0x9c2   :  { %v3155_v51 = vpop.f32.mrb[7].mxu1 }
 0x9c3   :  { %v3156_v23 = vadd.f32 %v3155_v51, %v3154_v52 }
 0x9c5   :  { %v2782_v38 = vadd.f32 %v3156_v23, %v3073_v20 }
 0x9c7   :  { %v2852_v1 = vadd.f32 %v2851_v29, %v2782_v38 }
 0x9c9   :  { %v2855_v36 = vmax.f32 %v2852_v1, 0.0 }
 0x9cb   :  { %3286 = vmatmul.mubr.msk.f32.vlgmr.msra.gmra.mrb[22].mxu0 %vm2871_vm7, %v2855_v36 }
 0xa9e   :  { %v2941_v2 = vpop.f32.mrb[22].mxu0 }
 0xa9f   :  { %v2942_v27 = vadd.f32 %v3076_v63, %v2941_v2  ;;  %v3287_v18 = vpop.f32.mrb[23].mxu0 }
 0xaa1   :  { %v2945_v3 = vmax.f32 %v2942_v27, 0.0 }
 0xaa3   :  { %3305 = vmatmul.mubr.msk.f32.vlgmr.msra.gmra.mrb[8].mxu1 %vm2871_vm7, %v2945_v3 }
 0xb76   :  { %v3030_v22 = vpop.f32.mrb[8].mxu1 }
 0xb77   :  { %v3031_v42 = vadd.f32 %v3078_v15, %v3030_v22  ;;  %v3306_v33 = vpop.f32.mrb[9].mxu1 }
 0xb79   :  { %3035 = vst.msk [vmem:[#allocation2] sm:$0x3] %vm3034_vm9, %v3031_v42 }
 0xb7a   :  { %3713 = shalt.err (!%p3710_p4)
}
 0xb7b   :  { %s3714_s6 = scalar_lea.hbm %s5864_s13, 32 }
 0xb7c   :  { %p3715_p5 = scmp.ne.s32.totalorder %s5864_s13, %s3714_s6  ;;  %p3718_p6 = scmp.lt.u32.totalorder %s3714_s6, %s5864_s13 }
 0xb7e   :  { %p3720_p7 = pnand %p3718_p6, %p3715_p5 }
 0xb80   :  { %3723 = shalt.err (!%p3720_p7)
}
 0xb81   :  { %3045 = dma.vmem_to_hbm [thread:$0]  %s3043_s3, 32, %s5864_s13, [#allocation3]  }
 0xb82   :  { %3724 = dma.done.wait [#allocation3], 32  }
 0xb83   :  { %3725 = vsyncadd [#allocation3], 4294967264 }
 0xb84   :  { %3049 = vsyncpa [#allocation3], 1 }

</bundles_post_ra>
